<compile_context>
chip_gen: v6e
topology: v6e:2x2x1
jax: 0.10.0
libtpu: 0.0.40
codegen_flags: <defaults>
</compile_context>

<pallas_src>
import functools

import jax
import jax.numpy as jnp
from jax.experimental import pallas as pl
from jax.experimental.pallas import tpu as pltpu


def _unroll_for(trip):
    # Fully unroll short fixed trip counts (LLO scheduling visibility),
    # partially unroll long ones to bound compile time.
    return True if trip <= 32 else 8


def _lstm_predictor_kernel(L, H, future,
                           x_ref, wih1_ref, whh1_ref, b1_ref,
                           wih2_ref, whh2_ref, b2_ref,
                           waux_ref, baux_ref, wlin_ref, blin_ref,
                           out_ref, h2_scratch):
    N = x_ref.shape[1]

    # Hoist all weight loads out of the recurrence.
    wih1 = wih1_ref[...]     # (1, 4H)  gate order (i, f, o, g)
    whh1 = whh1_ref[...]     # (H, 4H)
    b1 = b1_ref[...]         # (1, 4H)
    wih2 = wih2_ref[...]     # (H, 4H)
    whh2 = whh2_ref[...]     # (H, 4H)
    b2 = b2_ref[...]         # (1, 4H)
    waux = waux_ref[...]     # (H, 4H) = wlin @ wih1   (AR fused head+input)
    baux = baux_ref[...]     # (1, 4H) = blin * wih1
    wlin = wlin_ref[...]     # (1, H)  linear weight as a row vector
    blin = blin_ref[...]     # (1, 1)

    def sig(v):
        # sigmoid(x) = 0.5*(tanh(x/2)+1): one EUP pass instead of exp+recip.
        return 0.5 * jnp.tanh(0.5 * v) + 0.5

    def cell_step(ih1, h1, c1, h2, c2):
        # Cell-2 recurrent projection first: only depends on the previous
        # step's h2, so the MXU can run it while cell-1's activation chain
        # is still in flight.
        pre2 = jnp.dot(h2, whh2, preferred_element_type=jnp.float32) + b2

        # --- LSTMCell 1 (columns reordered to i, f, o, g) ---
        g1 = ih1 + jnp.dot(h1, whh1, preferred_element_type=jnp.float32) + b1
        s1 = sig(g1[:, :3 * H])                  # i | f | o
        t1 = jnp.tanh(g1[:, 3 * H:])             # g
        c1n = s1[:, H:2 * H] * c1 + s1[:, :H] * t1
        h1n = s1[:, 2 * H:3 * H] * jnp.tanh(c1n)

        # --- LSTMCell 2 ---
        g2 = pre2 + jnp.dot(h1n, wih2, preferred_element_type=jnp.float32)
        s2 = sig(g2[:, :3 * H])
        t2 = jnp.tanh(g2[:, 3 * H:])
        c2n = s2[:, H:2 * H] * c2 + s2[:, :H] * t2
        h2n = s2[:, 2 * H:3 * H] * jnp.tanh(c2n)
        return h1n, c1n, h2n, c2n

    z = jnp.zeros((N, H), jnp.float32)

    # Phase 1: teacher-forced over the observed sequence.
    def body_tf(t, carry):
        h1, c1, h2, c2 = carry
        ih1 = x_ref[t] * wih1                    # (N,1)*(1,4H) on the VPU
        h1, c1, h2, c2 = cell_step(ih1, h1, c1, h2, c2)
        h2_scratch[t] = h2
        return h1, c1, h2, c2

    carry = jax.lax.fori_loop(0, L, body_tf, (z, z, z, z),
                              unroll=_unroll_for(L))

    # Phase 2: autoregressive. The head is folded into the next-step input
    # projection (W_aux), so y never enters the carried dependence chain.
    if future > 0:
        h1, c1, h2, c2 = carry

        def body_ar(i, c):
            h1, c1, h2, c2, ih = c
            h1, c1, h2, c2 = cell_step(ih, h1, c1, h2, c2)
            h2_scratch[L + i] = h2
            ih_next = jnp.dot(h2, waux,
                              preferred_element_type=jnp.float32) + baux
            return h1, c1, h2, c2, ih_next

        ih0 = jnp.dot(h2, waux, preferred_element_type=jnp.float32) + baux
        jax.lax.fori_loop(0, future, body_ar, (h1, c1, h2, c2, ih0),
                          unroll=_unroll_for(future))

    # Batched linear head over all T steps, off the serial critical path:
    # (T, N, H) * (1, H) broadcast-mul + lane reduce -> (T, N), plus bias.
    h2_all = h2_scratch[...]
    out_ref[...] = jnp.sum(h2_all * wlin, axis=-1) + blin


def _reorder_gates(w, H):
    """PyTorch gate column order (i, f, g, o) -> (i, f, o, g). Exact permute."""
    return jnp.concatenate(
        [w[..., :2 * H], w[..., 3 * H:4 * H], w[..., 2 * H:3 * H]], axis=-1)


def init_params(key, n_hidden=32):
    """Deterministic PyTorch-style init: uniform(-1/sqrt(H), 1/sqrt(H))."""
    H = n_hidden
    bound = 1.0 / float(H) ** 0.5
    keys = jax.random.split(key, 10)

    def u(k, shape):
        return jax.random.uniform(k, shape, jnp.float32, -bound, bound)

    return dict(
        H=H,
        # lstm1: W_ih (4H,1)->(1,4H), W_hh (4H,H)->(H,4H), b = b_ih + b_hh
        wih1=u(keys[0], (1, 4 * H)),
        whh1=u(keys[1], (H, 4 * H)),
        b1=u(keys[2], (1, 4 * H)) + u(keys[3], (1, 4 * H)),
        # lstm2
        wih2=u(keys[4], (H, 4 * H)),
        whh2=u(keys[5], (H, 4 * H)),
        b2=u(keys[6], (1, 4 * H)) + u(keys[7], (1, 4 * H)),
        # linear: W (1,H)->(H,1), b (1,)->(1,1)
        wlin=u(keys[8], (H, 1)),
        blin=u(keys[9], (1, 1)),
    )


def lstm_predictor_forward(x, params, future=0):
    N, L = x.shape
    H = params["H"]
    T = L + future

    # Gate-column permutation (exact) so the kernel's sigmoid/tanh slices are
    # contiguous.
    wih1 = _reorder_gates(params["wih1"], H)
    whh1 = _reorder_gates(params["whh1"], H)
    b1 = _reorder_gates(params["b1"], H)
    wih2 = _reorder_gates(params["wih2"], H)
    whh2 = _reorder_gates(params["whh2"], H)
    b2 = _reorder_gates(params["b2"], H)

    # AR-phase fused head + input projection.
    waux = params["wlin"] @ wih1        # (H, 1) @ (1, 4H) -> (H, 4H)
    baux = params["blin"] * wih1        # (1, 4H)
    wlin_row = params["wlin"].T         # (1, H)
    blin = params["blin"]               # (1, 1)

    x_seq = x.T[:, :, None]             # (L, N, 1) raw inputs (no pre-scale)

    args = (x_seq, wih1, whh1, b1, wih2, whh2, b2,
            waux, baux, wlin_row, blin)

    kernel = functools.partial(_lstm_predictor_kernel, L, H, future)

    vmem_spec = pl.BlockSpec(memory_space=pltpu.MemorySpace.VMEM)
    out = pl.pallas_call(
        kernel,
        out_shape=jax.ShapeDtypeStruct((T, N), jnp.float32),
        in_specs=[vmem_spec] * len(args),
        out_specs=vmem_spec,
        scratch_shapes=[pltpu.VMEM((T, N, H), jnp.float32)],
    )(*args)

    # (T, N) -> (N, T), matching torch.cat(outputs, dim=1)
    return out.T


def lstm_predictor_reference(x, params, future=0):
    """Pure-JAX reference of the PyTorch forward (unfused, original order)."""
    N, L = x.shape
    H = params["H"]

    def cell(inp, h, c, wih, whh, b):
        g = inp @ wih + h @ whh + b
        i = jax.nn.sigmoid(g[:, 0:H])
        f = jax.nn.sigmoid(g[:, H:2 * H])
        gg = jnp.tanh(g[:, 2 * H:3 * H])
        o = jax.nn.sigmoid(g[:, 3 * H:4 * H])
        cn = f * c + i * gg
        return o * jnp.tanh(cn), cn

    h1 = c1 = h2 = c2 = jnp.zeros((N, H), jnp.float32)
    y = jnp.zeros((N, 1), jnp.float32)
    outs = []
    for t in range(L):
        h1, c1 = cell(x[:, t:t + 1], h1, c1,
                      params["wih1"], params["whh1"], params["b1"])
        h2, c2 = cell(h1, h2, c2,
                      params["wih2"], params["whh2"], params["b2"])
        y = h2 @ params["wlin"] + params["blin"]
        outs.append(y)
    for _ in range(future):
        h1, c1 = cell(y, h1, c1,
                      params["wih1"], params["whh1"], params["b1"])
        h2, c2 = cell(h1, h2, c2,
                      params["wih2"], params["whh2"], params["b2"])
        y = h2 @ params["wlin"] + params["blin"]
        outs.append(y)
    return jnp.concatenate(outs, axis=1)


if __name__ == "__main__":
    key = jax.random.PRNGKey(0)
    pkey, xkey = jax.random.split(key)

    N, L, H = 8, 16, 32      # small shapes: batch=8, seq=16, hidden=32
    params = init_params(pkey, n_hidden=H)
    x = jax.random.normal(xkey, (N, L), jnp.float32)

    # teacher-forced phase only (future=0, matches default forward)
    out = lstm_predictor_forward(x, params, future=0)
    jax.block_until_ready(out)
    assert out.shape == (N, L), out.shape

    # with autoregressive future steps
    out_f = lstm_predictor_forward(x, params, future=4)
    jax.block_until_ready(out_f)
    assert out_f.shape == (N, L + 4), out_f.shape

    # numerical check against the pure-JAX reference
    ref_f = lstm_predictor_reference(x, params, future=4)
    err = float(jnp.max(jnp.abs(out_f - ref_f)))
    assert err < 1e-3, err

    ref_0 = lstm_predictor_reference(x, params, future=0)
    assert jnp.allclose(out, ref_0, atol=1e-3, rtol=1e-3)

    print("KERNEL_OK")
</pallas_src>

<mosaic_0001>
module attributes {stable_mosaic.version = 11 : i64} {
  func.func @_lstm_predictor_kernel(%arg0: memref<16x8x1xf32, #tpu.memory_space<vmem>>, %arg1: memref<1x128xf32, #tpu.memory_space<vmem>>, %arg2: memref<32x128xf32, #tpu.memory_space<vmem>>, %arg3: memref<1x128xf32, #tpu.memory_space<vmem>>, %arg4: memref<32x128xf32, #tpu.memory_space<vmem>>, %arg5: memref<32x128xf32, #tpu.memory_space<vmem>>, %arg6: memref<1x128xf32, #tpu.memory_space<vmem>>, %arg7: memref<32x128xf32, #tpu.memory_space<vmem>>, %arg8: memref<1x128xf32, #tpu.memory_space<vmem>>, %arg9: memref<1x32xf32, #tpu.memory_space<vmem>>, %arg10: memref<1x1xf32, #tpu.memory_space<vmem>>, %arg11: memref<16x8xf32, #tpu.memory_space<vmem>>, %arg12: memref<16x8x32xf32, #tpu.memory_space<vmem>>) attributes {dimension_semantics = [], scalar_prefetch = 0 : i64, scratch_operands = 1 : i64, tpu.core_type = #tpu.core_type<tc>} {
    %c0 = arith.constant 0 : index
    %c0_0 = arith.constant 0 : index
    %0 = vector.load %arg1[%c0, %c0_0] : memref<1x128xf32, #tpu.memory_space<vmem>>, vector<1x128xf32>
    %c0_1 = arith.constant 0 : index
    %c0_2 = arith.constant 0 : index
    %1 = vector.load %arg2[%c0_1, %c0_2] : memref<32x128xf32, #tpu.memory_space<vmem>>, vector<32x128xf32>
    %c0_3 = arith.constant 0 : index
    %c0_4 = arith.constant 0 : index
    %2 = vector.load %arg3[%c0_3, %c0_4] : memref<1x128xf32, #tpu.memory_space<vmem>>, vector<1x128xf32>
    %c0_5 = arith.constant 0 : index
    %c0_6 = arith.constant 0 : index
    %3 = vector.load %arg4[%c0_5, %c0_6] : memref<32x128xf32, #tpu.memory_space<vmem>>, vector<32x128xf32>
    %c0_7 = arith.constant 0 : index
    %c0_8 = arith.constant 0 : index
    %4 = vector.load %arg5[%c0_7, %c0_8] : memref<32x128xf32, #tpu.memory_space<vmem>>, vector<32x128xf32>
    %c0_9 = arith.constant 0 : index
    %c0_10 = arith.constant 0 : index
    %5 = vector.load %arg6[%c0_9, %c0_10] : memref<1x128xf32, #tpu.memory_space<vmem>>, vector<1x128xf32>
    %c0_11 = arith.constant 0 : index
    %c0_12 = arith.constant 0 : index
    %6 = vector.load %arg9[%c0_11, %c0_12] : memref<1x32xf32, #tpu.memory_space<vmem>>, vector<1x32xf32>
    %c0_13 = arith.constant 0 : index
    %c0_14 = arith.constant 0 : index
    %7 = vector.load %arg10[%c0_13, %c0_14] : memref<1x1xf32, #tpu.memory_space<vmem>>, vector<1x1xf32>
    %cst = arith.constant 0.000000e+00 : f32
    %8 = vector.broadcast %cst : f32 to vector<8x32xf32>
    %c0_i32 = arith.constant 0 : i32
    %9 = arith.index_cast %c0_i32 : i32 to index
    %c0_15 = arith.constant 0 : index
    %c0_16 = arith.constant 0 : index
    %10 = vector.load %arg0[%9, %c0_15, %c0_16] : memref<16x8x1xf32, #tpu.memory_space<vmem>>, vector<1x8x1xf32>
    %11 = vector.shape_cast %10 : vector<1x8x1xf32> to vector<8x1xf32>
    %12 = vector.broadcast %11 : vector<8x1xf32> to vector<8x128xf32>
    %13 = vector.broadcast %0 : vector<1x128xf32> to vector<8x128xf32>
    %14 = arith.mulf %12, %13 : vector<8x128xf32>
    %cst_17 = arith.constant dense<0.000000e+00> : vector<8x128xf32>
    %15 = tpu.matmul %8, %4, %cst_17 {dimension_numbers = #tpu.dot_dimension_numbers<[1], [0], [0], [1], [0, 0, 1, 1], [], []>} : vector<8x32xf32>, vector<32x128xf32>, vector<8x128xf32> -> vector<8x128xf32>
    %16 = vector.broadcast %5 : vector<1x128xf32> to vector<8x128xf32>
    %17 = arith.addf %15, %16 : vector<8x128xf32>
    %cst_18 = arith.constant dense<0.000000e+00> : vector<8x128xf32>
    %18 = tpu.matmul %8, %1, %cst_18 {dimension_numbers = #tpu.dot_dimension_numbers<[1], [0], [0], [1], [0, 0, 1, 1], [], []>} : vector<8x32xf32>, vector<32x128xf32>, vector<8x128xf32> -> vector<8x128xf32>
    %19 = arith.addf %14, %18 : vector<8x128xf32>
    %20 = vector.broadcast %2 : vector<1x128xf32> to vector<8x128xf32>
    %21 = arith.addf %19, %20 : vector<8x128xf32>
    %22 = vector.extract_strided_slice %21 {offsets = [0, 0], sizes = [8, 96], strides = [1, 1]} : vector<8x128xf32> to vector<8x96xf32>
    %cst_19 = arith.constant 5.000000e-01 : f32
    %23 = vector.broadcast %cst_19 : f32 to vector<8x96xf32>
    %24 = arith.mulf %23, %22 : vector<8x96xf32>
    %25 = math.tanh %24 : vector<8x96xf32>
    %cst_20 = arith.constant 5.000000e-01 : f32
    %26 = vector.broadcast %cst_20 : f32 to vector<8x96xf32>
    %27 = arith.mulf %26, %25 : vector<8x96xf32>
    %cst_21 = arith.constant 5.000000e-01 : f32
    %28 = vector.broadcast %cst_21 : f32 to vector<8x96xf32>
    %29 = arith.addf %27, %28 : vector<8x96xf32>
    %30 = vector.extract_strided_slice %21 {offsets = [0, 96], sizes = [8, 32], strides = [1, 1]} : vector<8x128xf32> to vector<8x32xf32>
    %31 = math.tanh %30 : vector<8x32xf32>
    %32 = vector.extract_strided_slice %29 {offsets = [0, 32], sizes = [8, 32], strides = [1, 1]} : vector<8x96xf32> to vector<8x32xf32>
    %33 = arith.mulf %32, %8 : vector<8x32xf32>
    %34 = vector.extract_strided_slice %29 {offsets = [0, 0], sizes = [8, 32], strides = [1, 1]} : vector<8x96xf32> to vector<8x32xf32>
    %35 = arith.mulf %34, %31 : vector<8x32xf32>
    %36 = arith.addf %33, %35 : vector<8x32xf32>
    %37 = vector.extract_strided_slice %29 {offsets = [0, 64], sizes = [8, 32], strides = [1, 1]} : vector<8x96xf32> to vector<8x32xf32>
    %38 = math.tanh %36 : vector<8x32xf32>
    %39 = arith.mulf %37, %38 : vector<8x32xf32>
    %cst_22 = arith.constant dense<0.000000e+00> : vector<8x128xf32>
    %40 = tpu.matmul %39, %3, %cst_22 {dimension_numbers = #tpu.dot_dimension_numbers<[1], [0], [0], [1], [0, 0, 1, 1], [], []>} : vector<8x32xf32>, vector<32x128xf32>, vector<8x128xf32> -> vector<8x128xf32>
    %41 = arith.addf %17, %40 : vector<8x128xf32>
    %42 = vector.extract_strided_slice %41 {offsets = [0, 0], sizes = [8, 96], strides = [1, 1]} : vector<8x128xf32> to vector<8x96xf32>
    %cst_23 = arith.constant 5.000000e-01 : f32
    %43 = vector.broadcast %cst_23 : f32 to vector<8x96xf32>
    %44 = arith.mulf %43, %42 : vector<8x96xf32>
    %45 = math.tanh %44 : vector<8x96xf32>
    %cst_24 = arith.constant 5.000000e-01 : f32
    %46 = vector.broadcast %cst_24 : f32 to vector<8x96xf32>
    %47 = arith.mulf %46, %45 : vector<8x96xf32>
    %cst_25 = arith.constant 5.000000e-01 : f32
    %48 = vector.broadcast %cst_25 : f32 to vector<8x96xf32>
    %49 = arith.addf %47, %48 : vector<8x96xf32>
    %50 = vector.extract_strided_slice %41 {offsets = [0, 96], sizes = [8, 32], strides = [1, 1]} : vector<8x128xf32> to vector<8x32xf32>
    %51 = math.tanh %50 : vector<8x32xf32>
    %52 = vector.extract_strided_slice %49 {offsets = [0, 32], sizes = [8, 32], strides = [1, 1]} : vector<8x96xf32> to vector<8x32xf32>
    %53 = arith.mulf %52, %8 : vector<8x32xf32>
    %54 = vector.extract_strided_slice %49 {offsets = [0, 0], sizes = [8, 32], strides = [1, 1]} : vector<8x96xf32> to vector<8x32xf32>
    %55 = arith.mulf %54, %51 : vector<8x32xf32>
    %56 = arith.addf %53, %55 : vector<8x32xf32>
    %57 = vector.extract_strided_slice %49 {offsets = [0, 64], sizes = [8, 32], strides = [1, 1]} : vector<8x96xf32> to vector<8x32xf32>
    %58 = math.tanh %56 : vector<8x32xf32>
    %59 = arith.mulf %57, %58 : vector<8x32xf32>
    %60 = arith.index_cast %c0_i32 : i32 to index
    %c0_26 = arith.constant 0 : index
    %c0_27 = arith.constant 0 : index
    %61 = vector.load %arg12[%60, %c0_26, %c0_27] : memref<16x8x32xf32, #tpu.memory_space<vmem>>, vector<1x8x32xf32>
    %62 = vector.shape_cast %61 : vector<1x8x32xf32> to vector<8x32xf32>
    %63 = vector.shape_cast %59 : vector<8x32xf32> to vector<1x8x32xf32>
    tpu.vector_store %arg12[%60, %c0_26, %c0_27], %63 {strides = array<i32>} : memref<16x8x32xf32, #tpu.memory_space<vmem>>, vector<1x8x32xf32>,
    %c1_i32 = arith.constant 1 : i32
    %64 = arith.index_cast %c1_i32 : i32 to index
    %c0_28 = arith.constant 0 : index
    %c0_29 = arith.constant 0 : index
    %65 = vector.load %arg0[%64, %c0_28, %c0_29] : memref<16x8x1xf32, #tpu.memory_space<vmem>>, vector<1x8x1xf32>
    %66 = vector.shape_cast %65 : vector<1x8x1xf32> to vector<8x1xf32>
    %67 = vector.broadcast %66 : vector<8x1xf32> to vector<8x128xf32>
    %68 = vector.broadcast %0 : vector<1x128xf32> to vector<8x128xf32>
    %69 = arith.mulf %67, %68 : vector<8x128xf32>
    %cst_30 = arith.constant dense<0.000000e+00> : vector<8x128xf32>
    %70 = tpu.matmul %59, %4, %cst_30 {dimension_numbers = #tpu.dot_dimension_numbers<[1], [0], [0], [1], [0, 0, 1, 1], [], []>} : vector<8x32xf32>, vector<32x128xf32>, vector<8x128xf32> -> vector<8x128xf32>
    %71 = vector.broadcast %5 : vector<1x128xf32> to vector<8x128xf32>
    %72 = arith.addf %70, %71 : vector<8x128xf32>
    %cst_31 = arith.constant dense<0.000000e+00> : vector<8x128xf32>
    %73 = tpu.matmul %39, %1, %cst_31 {dimension_numbers = #tpu.dot_dimension_numbers<[1], [0], [0], [1], [0, 0, 1, 1], [], []>} : vector<8x32xf32>, vector<32x128xf32>, vector<8x128xf32> -> vector<8x128xf32>
    %74 = arith.addf %69, %73 : vector<8x128xf32>
    %75 = vector.broadcast %2 : vector<1x128xf32> to vector<8x128xf32>
    %76 = arith.addf %74, %75 : vector<8x128xf32>
    %77 = vector.extract_strided_slice %76 {offsets = [0, 0], sizes = [8, 96], strides = [1, 1]} : vector<8x128xf32> to vector<8x96xf32>
    %cst_32 = arith.constant 5.000000e-01 : f32
    %78 = vector.broadcast %cst_32 : f32 to vector<8x96xf32>
    %79 = arith.mulf %78, %77 : vector<8x96xf32>
    %80 = math.tanh %79 : vector<8x96xf32>
    %cst_33 = arith.constant 5.000000e-01 : f32
    %81 = vector.broadcast %cst_33 : f32 to vector<8x96xf32>
    %82 = arith.mulf %81, %80 : vector<8x96xf32>
    %cst_34 = arith.constant 5.000000e-01 : f32
    %83 = vector.broadcast %cst_34 : f32 to vector<8x96xf32>
    %84 = arith.addf %82, %83 : vector<8x96xf32>
    %85 = vector.extract_strided_slice %76 {offsets = [0, 96], sizes = [8, 32], strides = [1, 1]} : vector<8x128xf32> to vector<8x32xf32>
    %86 = math.tanh %85 : vector<8x32xf32>
    %87 = vector.extract_strided_slice %84 {offsets = [0, 32], sizes = [8, 32], strides = [1, 1]} : vector<8x96xf32> to vector<8x32xf32>
    %88 = arith.mulf %87, %36 : vector<8x32xf32>
    %89 = vector.extract_strided_slice %84 {offsets = [0, 0], sizes = [8, 32], strides = [1, 1]} : vector<8x96xf32> to vector<8x32xf32>
    %90 = arith.mulf %89, %86 : vector<8x32xf32>
    %91 = arith.addf %88, %90 : vector<8x32xf32>
    %92 = vector.extract_strided_slice %84 {offsets = [0, 64], sizes = [8, 32], strides = [1, 1]} : vector<8x96xf32> to vector<8x32xf32>
    %93 = math.tanh %91 : vector<8x32xf32>
    %94 = arith.mulf %92, %93 : vector<8x32xf32>
    %cst_35 = arith.constant dense<0.000000e+00> : vector<8x128xf32>
    %95 = tpu.matmul %94, %3, %cst_35 {dimension_numbers = #tpu.dot_dimension_numbers<[1], [0], [0], [1], [0, 0, 1, 1], [], []>} : vector<8x32xf32>, vector<32x128xf32>, vector<8x128xf32> -> vector<8x128xf32>
    %96 = arith.addf %72, %95 : vector<8x128xf32>
    %97 = vector.extract_strided_slice %96 {offsets = [0, 0], sizes = [8, 96], strides = [1, 1]} : vector<8x128xf32> to vector<8x96xf32>
    %cst_36 = arith.constant 5.000000e-01 : f32
    %98 = vector.broadcast %cst_36 : f32 to vector<8x96xf32>
    %99 = arith.mulf %98, %97 : vector<8x96xf32>
    %100 = math.tanh %99 : vector<8x96xf32>
    %cst_37 = arith.constant 5.000000e-01 : f32
    %101 = vector.broadcast %cst_37 : f32 to vector<8x96xf32>
    %102 = arith.mulf %101, %100 : vector<8x96xf32>
    %cst_38 = arith.constant 5.000000e-01 : f32
    %103 = vector.broadcast %cst_38 : f32 to vector<8x96xf32>
    %104 = arith.addf %102, %103 : vector<8x96xf32>
    %105 = vector.extract_strided_slice %96 {offsets = [0, 96], sizes = [8, 32], strides = [1, 1]} : vector<8x128xf32> to vector<8x32xf32>
    %106 = math.tanh %105 : vector<8x32xf32>
    %107 = vector.extract_strided_slice %104 {offsets = [0, 32], sizes = [8, 32], strides = [1, 1]} : vector<8x96xf32> to vector<8x32xf32>
    %108 = arith.mulf %107, %56 : vector<8x32xf32>
    %109 = vector.extract_strided_slice %104 {offsets = [0, 0], sizes = [8, 32], strides = [1, 1]} : vector<8x96xf32> to vector<8x32xf32>
    %110 = arith.mulf %109, %106 : vector<8x32xf32>
    %111 = arith.addf %108, %110 : vector<8x32xf32>
    %112 = vector.extract_strided_slice %104 {offsets = [0, 64], sizes = [8, 32], strides = [1, 1]} : vector<8x96xf32> to vector<8x32xf32>
    %113 = math.tanh %111 : vector<8x32xf32>
    %114 = arith.mulf %112, %113 : vector<8x32xf32>
    %115 = arith.index_cast %c1_i32 : i32 to index
    %c0_39 = arith.constant 0 : index
    %c0_40 = arith.constant 0 : index
    %116 = vector.load %arg12[%115, %c0_39, %c0_40] : memref<16x8x32xf32, #tpu.memory_space<vmem>>, vector<1x8x32xf32>
    %117 = vector.shape_cast %116 : vector<1x8x32xf32> to vector<8x32xf32>
    %118 = vector.shape_cast %114 : vector<8x32xf32> to vector<1x8x32xf32>
    tpu.vector_store %arg12[%115, %c0_39, %c0_40], %118 {strides = array<i32>} : memref<16x8x32xf32, #tpu.memory_space<vmem>>, vector<1x8x32xf32>,
    %c2_i32 = arith.constant 2 : i32
    %119 = arith.index_cast %c2_i32 : i32 to index
    %c0_41 = arith.constant 0 : index
    %c0_42 = arith.constant 0 : index
    %120 = vector.load %arg0[%119, %c0_41, %c0_42] : memref<16x8x1xf32, #tpu.memory_space<vmem>>, vector<1x8x1xf32>
    %121 = vector.shape_cast %120 : vector<1x8x1xf32> to vector<8x1xf32>
    %122 = vector.broadcast %121 : vector<8x1xf32> to vector<8x128xf32>
    %123 = vector.broadcast %0 : vector<1x128xf32> to vector<8x128xf32>
    %124 = arith.mulf %122, %123 : vector<8x128xf32>
    %cst_43 = arith.constant dense<0.000000e+00> : vector<8x128xf32>
    %125 = tpu.matmul %114, %4, %cst_43 {dimension_numbers = #tpu.dot_dimension_numbers<[1], [0], [0], [1], [0, 0, 1, 1], [], []>} : vector<8x32xf32>, vector<32x128xf32>, vector<8x128xf32> -> vector<8x128xf32>
    %126 = vector.broadcast %5 : vector<1x128xf32> to vector<8x128xf32>
    %127 = arith.addf %125, %126 : vector<8x128xf32>
    %cst_44 = arith.constant dense<0.000000e+00> : vector<8x128xf32>
    %128 = tpu.matmul %94, %1, %cst_44 {dimension_numbers = #tpu.dot_dimension_numbers<[1], [0], [0], [1], [0, 0, 1, 1], [], []>} : vector<8x32xf32>, vector<32x128xf32>, vector<8x128xf32> -> vector<8x128xf32>
    %129 = arith.addf %124, %128 : vector<8x128xf32>
    %130 = vector.broadcast %2 : vector<1x128xf32> to vector<8x128xf32>
    %131 = arith.addf %129, %130 : vector<8x128xf32>
    %132 = vector.extract_strided_slice %131 {offsets = [0, 0], sizes = [8, 96], strides = [1, 1]} : vector<8x128xf32> to vector<8x96xf32>
    %cst_45 = arith.constant 5.000000e-01 : f32
    %133 = vector.broadcast %cst_45 : f32 to vector<8x96xf32>
    %134 = arith.mulf %133, %132 : vector<8x96xf32>
    %135 = math.tanh %134 : vector<8x96xf32>
    %cst_46 = arith.constant 5.000000e-01 : f32
    %136 = vector.broadcast %cst_46 : f32 to vector<8x96xf32>
    %137 = arith.mulf %136, %135 : vector<8x96xf32>
    %cst_47 = arith.constant 5.000000e-01 : f32
    %138 = vector.broadcast %cst_47 : f32 to vector<8x96xf32>
    %139 = arith.addf %137, %138 : vector<8x96xf32>
    %140 = vector.extract_strided_slice %131 {offsets = [0, 96], sizes = [8, 32], strides = [1, 1]} : vector<8x128xf32> to vector<8x32xf32>
    %141 = math.tanh %140 : vector<8x32xf32>
    %142 = vector.extract_strided_slice %139 {offsets = [0, 32], sizes = [8, 32], strides = [1, 1]} : vector<8x96xf32> to vector<8x32xf32>
    %143 = arith.mulf %142, %91 : vector<8x32xf32>
    %144 = vector.extract_strided_slice %139 {offsets = [0, 0], sizes = [8, 32], strides = [1, 1]} : vector<8x96xf32> to vector<8x32xf32>
    %145 = arith.mulf %144, %141 : vector<8x32xf32>
    %146 = arith.addf %143, %145 : vector<8x32xf32>
    %147 = vector.extract_strided_slice %139 {offsets = [0, 64], sizes = [8, 32], strides = [1, 1]} : vector<8x96xf32> to vector<8x32xf32>
    %148 = math.tanh %146 : vector<8x32xf32>
    %149 = arith.mulf %147, %148 : vector<8x32xf32>
    %cst_48 = arith.constant dense<0.000000e+00> : vector<8x128xf32>
    %150 = tpu.matmul %149, %3, %cst_48 {dimension_numbers = #tpu.dot_dimension_numbers<[1], [0], [0], [1], [0, 0, 1, 1], [], []>} : vector<8x32xf32>, vector<32x128xf32>, vector<8x128xf32> -> vector<8x128xf32>
    %151 = arith.addf %127, %150 : vector<8x128xf32>
    %152 = vector.extract_strided_slice %151 {offsets = [0, 0], sizes = [8, 96], strides = [1, 1]} : vector<8x128xf32> to vector<8x96xf32>
    %cst_49 = arith.constant 5.000000e-01 : f32
    %153 = vector.broadcast %cst_49 : f32 to vector<8x96xf32>
    %154 = arith.mulf %153, %152 : vector<8x96xf32>
    %155 = math.tanh %154 : vector<8x96xf32>
    %cst_50 = arith.constant 5.000000e-01 : f32
    %156 = vector.broadcast %cst_50 : f32 to vector<8x96xf32>
    %157 = arith.mulf %156, %155 : vector<8x96xf32>
    %cst_51 = arith.constant 5.000000e-01 : f32
    %158 = vector.broadcast %cst_51 : f32 to vector<8x96xf32>
    %159 = arith.addf %157, %158 : vector<8x96xf32>
    %160 = vector.extract_strided_slice %151 {offsets = [0, 96], sizes = [8, 32], strides = [1, 1]} : vector<8x128xf32> to vector<8x32xf32>
    %161 = math.tanh %160 : vector<8x32xf32>
    %162 = vector.extract_strided_slice %159 {offsets = [0, 32], sizes = [8, 32], strides = [1, 1]} : vector<8x96xf32> to vector<8x32xf32>
    %163 = arith.mulf %162, %111 : vector<8x32xf32>
    %164 = vector.extract_strided_slice %159 {offsets = [0, 0], sizes = [8, 32], strides = [1, 1]} : vector<8x96xf32> to vector<8x32xf32>
    %165 = arith.mulf %164, %161 : vector<8x32xf32>
    %166 = arith.addf %163, %165 : vector<8x32xf32>
    %167 = vector.extract_strided_slice %159 {offsets = [0, 64], sizes = [8, 32], strides = [1, 1]} : vector<8x96xf32> to vector<8x32xf32>
    %168 = math.tanh %166 : vector<8x32xf32>
    %169 = arith.mulf %167, %168 : vector<8x32xf32>
    %170 = arith.index_cast %c2_i32 : i32 to index
    %c0_52 = arith.constant 0 : index
    %c0_53 = arith.constant 0 : index
    %171 = vector.load %arg12[%170, %c0_52, %c0_53] : memref<16x8x32xf32, #tpu.memory_space<vmem>>, vector<1x8x32xf32>
    %172 = vector.shape_cast %171 : vector<1x8x32xf32> to vector<8x32xf32>
    %173 = vector.shape_cast %169 : vector<8x32xf32> to vector<1x8x32xf32>
    tpu.vector_store %arg12[%170, %c0_52, %c0_53], %173 {strides = array<i32>} : memref<16x8x32xf32, #tpu.memory_space<vmem>>, vector<1x8x32xf32>,
    %c3_i32 = arith.constant 3 : i32
    %174 = arith.index_cast %c3_i32 : i32 to index
    %c0_54 = arith.constant 0 : index
    %c0_55 = arith.constant 0 : index
    %175 = vector.load %arg0[%174, %c0_54, %c0_55] : memref<16x8x1xf32, #tpu.memory_space<vmem>>, vector<1x8x1xf32>
    %176 = vector.shape_cast %175 : vector<1x8x1xf32> to vector<8x1xf32>
    %177 = vector.broadcast %176 : vector<8x1xf32> to vector<8x128xf32>
    %178 = vector.broadcast %0 : vector<1x128xf32> to vector<8x128xf32>
    %179 = arith.mulf %177, %178 : vector<8x128xf32>
    %cst_56 = arith.constant dense<0.000000e+00> : vector<8x128xf32>
    %180 = tpu.matmul %169, %4, %cst_56 {dimension_numbers = #tpu.dot_dimension_numbers<[1], [0], [0], [1], [0, 0, 1, 1], [], []>} : vector<8x32xf32>, vector<32x128xf32>, vector<8x128xf32> -> vector<8x128xf32>
    %181 = vector.broadcast %5 : vector<1x128xf32> to vector<8x128xf32>
    %182 = arith.addf %180, %181 : vector<8x128xf32>
    %cst_57 = arith.constant dense<0.000000e+00> : vector<8x128xf32>
    %183 = tpu.matmul %149, %1, %cst_57 {dimension_numbers = #tpu.dot_dimension_numbers<[1], [0], [0], [1], [0, 0, 1, 1], [], []>} : vector<8x32xf32>, vector<32x128xf32>, vector<8x128xf32> -> vector<8x128xf32>
    %184 = arith.addf %179, %183 : vector<8x128xf32>
    %185 = vector.broadcast %2 : vector<1x128xf32> to vector<8x128xf32>
    %186 = arith.addf %184, %185 : vector<8x128xf32>
    %187 = vector.extract_strided_slice %186 {offsets = [0, 0], sizes = [8, 96], strides = [1, 1]} : vector<8x128xf32> to vector<8x96xf32>
    %cst_58 = arith.constant 5.000000e-01 : f32
    %188 = vector.broadcast %cst_58 : f32 to vector<8x96xf32>
    %189 = arith.mulf %188, %187 : vector<8x96xf32>
    %190 = math.tanh %189 : vector<8x96xf32>
    %cst_59 = arith.constant 5.000000e-01 : f32
    %191 = vector.broadcast %cst_59 : f32 to vector<8x96xf32>
    %192 = arith.mulf %191, %190 : vector<8x96xf32>
    %cst_60 = arith.constant 5.000000e-01 : f32
    %193 = vector.broadcast %cst_60 : f32 to vector<8x96xf32>
    %194 = arith.addf %192, %193 : vector<8x96xf32>
    %195 = vector.extract_strided_slice %186 {offsets = [0, 96], sizes = [8, 32], strides = [1, 1]} : vector<8x128xf32> to vector<8x32xf32>
    %196 = math.tanh %195 : vector<8x32xf32>
    %197 = vector.extract_strided_slice %194 {offsets = [0, 32], sizes = [8, 32], strides = [1, 1]} : vector<8x96xf32> to vector<8x32xf32>
    %198 = arith.mulf %197, %146 : vector<8x32xf32>
    %199 = vector.extract_strided_slice %194 {offsets = [0, 0], sizes = [8, 32], strides = [1, 1]} : vector<8x96xf32> to vector<8x32xf32>
    %200 = arith.mulf %199, %196 : vector<8x32xf32>
    %201 = arith.addf %198, %200 : vector<8x32xf32>
    %202 = vector.extract_strided_slice %194 {offsets = [0, 64], sizes = [8, 32], strides = [1, 1]} : vector<8x96xf32> to vector<8x32xf32>
    %203 = math.tanh %201 : vector<8x32xf32>
    %204 = arith.mulf %202, %203 : vector<8x32xf32>
    %cst_61 = arith.constant dense<0.000000e+00> : vector<8x128xf32>
    %205 = tpu.matmul %204, %3, %cst_61 {dimension_numbers = #tpu.dot_dimension_numbers<[1], [0], [0], [1], [0, 0, 1, 1], [], []>} : vector<8x32xf32>, vector<32x128xf32>, vector<8x128xf32> -> vector<8x128xf32>
    %206 = arith.addf %182, %205 : vector<8x128xf32>
    %207 = vector.extract_strided_slice %206 {offsets = [0, 0], sizes = [8, 96], strides = [1, 1]} : vector<8x128xf32> to vector<8x96xf32>
    %cst_62 = arith.constant 5.000000e-01 : f32
    %208 = vector.broadcast %cst_62 : f32 to vector<8x96xf32>
    %209 = arith.mulf %208, %207 : vector<8x96xf32>
    %210 = math.tanh %209 : vector<8x96xf32>
    %cst_63 = arith.constant 5.000000e-01 : f32
    %211 = vector.broadcast %cst_63 : f32 to vector<8x96xf32>
    %212 = arith.mulf %211, %210 : vector<8x96xf32>
    %cst_64 = arith.constant 5.000000e-01 : f32
    %213 = vector.broadcast %cst_64 : f32 to vector<8x96xf32>
    %214 = arith.addf %212, %213 : vector<8x96xf32>
    %215 = vector.extract_strided_slice %206 {offsets = [0, 96], sizes = [8, 32], strides = [1, 1]} : vector<8x128xf32> to vector<8x32xf32>
    %216 = math.tanh %215 : vector<8x32xf32>
    %217 = vector.extract_strided_slice %214 {offsets = [0, 32], sizes = [8, 32], strides = [1, 1]} : vector<8x96xf32> to vector<8x32xf32>
    %218 = arith.mulf %217, %166 : vector<8x32xf32>
    %219 = vector.extract_strided_slice %214 {offsets = [0, 0], sizes = [8, 32], strides = [1, 1]} : vector<8x96xf32> to vector<8x32xf32>
    %220 = arith.mulf %219, %216 : vector<8x32xf32>
    %221 = arith.addf %218, %220 : vector<8x32xf32>
    %222 = vector.extract_strided_slice %214 {offsets = [0, 64], sizes = [8, 32], strides = [1, 1]} : vector<8x96xf32> to vector<8x32xf32>
    %223 = math.tanh %221 : vector<8x32xf32>
    %224 = arith.mulf %222, %223 : vector<8x32xf32>
    %225 = arith.index_cast %c3_i32 : i32 to index
    %c0_65 = arith.constant 0 : index
    %c0_66 = arith.constant 0 : index
    %226 = vector.load %arg12[%225, %c0_65, %c0_66] : memref<16x8x32xf32, #tpu.memory_space<vmem>>, vector<1x8x32xf32>
    %227 = vector.shape_cast %226 : vector<1x8x32xf32> to vector<8x32xf32>
    %228 = vector.shape_cast %224 : vector<8x32xf32> to vector<1x8x32xf32>
    tpu.vector_store %arg12[%225, %c0_65, %c0_66], %228 {strides = array<i32>} : memref<16x8x32xf32, #tpu.memory_space<vmem>>, vector<1x8x32xf32>,
    %c4_i32 = arith.constant 4 : i32
    %229 = arith.index_cast %c4_i32 : i32 to index
    %c0_67 = arith.constant 0 : index
    %c0_68 = arith.constant 0 : index
    %230 = vector.load %arg0[%229, %c0_67, %c0_68] : memref<16x8x1xf32, #tpu.memory_space<vmem>>, vector<1x8x1xf32>
    %231 = vector.shape_cast %230 : vector<1x8x1xf32> to vector<8x1xf32>
    %232 = vector.broadcast %231 : vector<8x1xf32> to vector<8x128xf32>
    %233 = vector.broadcast %0 : vector<1x128xf32> to vector<8x128xf32>
    %234 = arith.mulf %232, %233 : vector<8x128xf32>
    %cst_69 = arith.constant dense<0.000000e+00> : vector<8x128xf32>
    %235 = tpu.matmul %224, %4, %cst_69 {dimension_numbers = #tpu.dot_dimension_numbers<[1], [0], [0], [1], [0, 0, 1, 1], [], []>} : vector<8x32xf32>, vector<32x128xf32>, vector<8x128xf32> -> vector<8x128xf32>
    %236 = vector.broadcast %5 : vector<1x128xf32> to vector<8x128xf32>
    %237 = arith.addf %235, %236 : vector<8x128xf32>
    %cst_70 = arith.constant dense<0.000000e+00> : vector<8x128xf32>
    %238 = tpu.matmul %204, %1, %cst_70 {dimension_numbers = #tpu.dot_dimension_numbers<[1], [0], [0], [1], [0, 0, 1, 1], [], []>} : vector<8x32xf32>, vector<32x128xf32>, vector<8x128xf32> -> vector<8x128xf32>
    %239 = arith.addf %234, %238 : vector<8x128xf32>
    %240 = vector.broadcast %2 : vector<1x128xf32> to vector<8x128xf32>
    %241 = arith.addf %239, %240 : vector<8x128xf32>
    %242 = vector.extract_strided_slice %241 {offsets = [0, 0], sizes = [8, 96], strides = [1, 1]} : vector<8x128xf32> to vector<8x96xf32>
    %cst_71 = arith.constant 5.000000e-01 : f32
    %243 = vector.broadcast %cst_71 : f32 to vector<8x96xf32>
    %244 = arith.mulf %243, %242 : vector<8x96xf32>
    %245 = math.tanh %244 : vector<8x96xf32>
    %cst_72 = arith.constant 5.000000e-01 : f32
    %246 = vector.broadcast %cst_72 : f32 to vector<8x96xf32>
    %247 = arith.mulf %246, %245 : vector<8x96xf32>
    %cst_73 = arith.constant 5.000000e-01 : f32
    %248 = vector.broadcast %cst_73 : f32 to vector<8x96xf32>
    %249 = arith.addf %247, %248 : vector<8x96xf32>
    %250 = vector.extract_strided_slice %241 {offsets = [0, 96], sizes = [8, 32], strides = [1, 1]} : vector<8x128xf32> to vector<8x32xf32>
    %251 = math.tanh %250 : vector<8x32xf32>
    %252 = vector.extract_strided_slice %249 {offsets = [0, 32], sizes = [8, 32], strides = [1, 1]} : vector<8x96xf32> to vector<8x32xf32>
    %253 = arith.mulf %252, %201 : vector<8x32xf32>
    %254 = vector.extract_strided_slice %249 {offsets = [0, 0], sizes = [8, 32], strides = [1, 1]} : vector<8x96xf32> to vector<8x32xf32>
    %255 = arith.mulf %254, %251 : vector<8x32xf32>
    %256 = arith.addf %253, %255 : vector<8x32xf32>
    %257 = vector.extract_strided_slice %249 {offsets = [0, 64], sizes = [8, 32], strides = [1, 1]} : vector<8x96xf32> to vector<8x32xf32>
    %258 = math.tanh %256 : vector<8x32xf32>
    %259 = arith.mulf %257, %258 : vector<8x32xf32>
    %cst_74 = arith.constant dense<0.000000e+00> : vector<8x128xf32>
    %260 = tpu.matmul %259, %3, %cst_74 {dimension_numbers = #tpu.dot_dimension_numbers<[1], [0], [0], [1], [0, 0, 1, 1], [], []>} : vector<8x32xf32>, vector<32x128xf32>, vector<8x128xf32> -> vector<8x128xf32>
    %261 = arith.addf %237, %260 : vector<8x128xf32>
    %262 = vector.extract_strided_slice %261 {offsets = [0, 0], sizes = [8, 96], strides = [1, 1]} : vector<8x128xf32> to vector<8x96xf32>
    %cst_75 = arith.constant 5.000000e-01 : f32
    %263 = vector.broadcast %cst_75 : f32 to vector<8x96xf32>
    %264 = arith.mulf %263, %262 : vector<8x96xf32>
    %265 = math.tanh %264 : vector<8x96xf32>
    %cst_76 = arith.constant 5.000000e-01 : f32
    %266 = vector.broadcast %cst_76 : f32 to vector<8x96xf32>
    %267 = arith.mulf %266, %265 : vector<8x96xf32>
    %cst_77 = arith.constant 5.000000e-01 : f32
    %268 = vector.broadcast %cst_77 : f32 to vector<8x96xf32>
    %269 = arith.addf %267, %268 : vector<8x96xf32>
    %270 = vector.extract_strided_slice %261 {offsets = [0, 96], sizes = [8, 32], strides = [1, 1]} : vector<8x128xf32> to vector<8x32xf32>
    %271 = math.tanh %270 : vector<8x32xf32>
    %272 = vector.extract_strided_slice %269 {offsets = [0, 32], sizes = [8, 32], strides = [1, 1]} : vector<8x96xf32> to vector<8x32xf32>
    %273 = arith.mulf %272, %221 : vector<8x32xf32>
    %274 = vector.extract_strided_slice %269 {offsets = [0, 0], sizes = [8, 32], strides = [1, 1]} : vector<8x96xf32> to vector<8x32xf32>
    %275 = arith.mulf %274, %271 : vector<8x32xf32>
    %276 = arith.addf %273, %275 : vector<8x32xf32>
    %277 = vector.extract_strided_slice %269 {offsets = [0, 64], sizes = [8, 32], strides = [1, 1]} : vector<8x96xf32> to vector<8x32xf32>
    %278 = math.tanh %276 : vector<8x32xf32>
    %279 = arith.mulf %277, %278 : vector<8x32xf32>
    %280 = arith.index_cast %c4_i32 : i32 to index
    %c0_78 = arith.constant 0 : index
    %c0_79 = arith.constant 0 : index
    %281 = vector.load %arg12[%280, %c0_78, %c0_79] : memref<16x8x32xf32, #tpu.memory_space<vmem>>, vector<1x8x32xf32>
    %282 = vector.shape_cast %281 : vector<1x8x32xf32> to vector<8x32xf32>
    %283 = vector.shape_cast %279 : vector<8x32xf32> to vector<1x8x32xf32>
    tpu.vector_store %arg12[%280, %c0_78, %c0_79], %283 {strides = array<i32>} : memref<16x8x32xf32, #tpu.memory_space<vmem>>, vector<1x8x32xf32>,
    %c5_i32 = arith.constant 5 : i32
    %284 = arith.index_cast %c5_i32 : i32 to index
    %c0_80 = arith.constant 0 : index
    %c0_81 = arith.constant 0 : index
    %285 = vector.load %arg0[%284, %c0_80, %c0_81] : memref<16x8x1xf32, #tpu.memory_space<vmem>>, vector<1x8x1xf32>
    %286 = vector.shape_cast %285 : vector<1x8x1xf32> to vector<8x1xf32>
    %287 = vector.broadcast %286 : vector<8x1xf32> to vector<8x128xf32>
    %288 = vector.broadcast %0 : vector<1x128xf32> to vector<8x128xf32>
    %289 = arith.mulf %287, %288 : vector<8x128xf32>
    %cst_82 = arith.constant dense<0.000000e+00> : vector<8x128xf32>
    %290 = tpu.matmul %279, %4, %cst_82 {dimension_numbers = #tpu.dot_dimension_numbers<[1], [0], [0], [1], [0, 0, 1, 1], [], []>} : vector<8x32xf32>, vector<32x128xf32>, vector<8x128xf32> -> vector<8x128xf32>
    %291 = vector.broadcast %5 : vector<1x128xf32> to vector<8x128xf32>
    %292 = arith.addf %290, %291 : vector<8x128xf32>
    %cst_83 = arith.constant dense<0.000000e+00> : vector<8x128xf32>
    %293 = tpu.matmul %259, %1, %cst_83 {dimension_numbers = #tpu.dot_dimension_numbers<[1], [0], [0], [1], [0, 0, 1, 1], [], []>} : vector<8x32xf32>, vector<32x128xf32>, vector<8x128xf32> -> vector<8x128xf32>
    %294 = arith.addf %289, %293 : vector<8x128xf32>
    %295 = vector.broadcast %2 : vector<1x128xf32> to vector<8x128xf32>
    %296 = arith.addf %294, %295 : vector<8x128xf32>
    %297 = vector.extract_strided_slice %296 {offsets = [0, 0], sizes = [8, 96], strides = [1, 1]} : vector<8x128xf32> to vector<8x96xf32>
    %cst_84 = arith.constant 5.000000e-01 : f32
    %298 = vector.broadcast %cst_84 : f32 to vector<8x96xf32>
    %299 = arith.mulf %298, %297 : vector<8x96xf32>
    %300 = math.tanh %299 : vector<8x96xf32>
    %cst_85 = arith.constant 5.000000e-01 : f32
    %301 = vector.broadcast %cst_85 : f32 to vector<8x96xf32>
    %302 = arith.mulf %301, %300 : vector<8x96xf32>
    %cst_86 = arith.constant 5.000000e-01 : f32
    %303 = vector.broadcast %cst_86 : f32 to vector<8x96xf32>
    %304 = arith.addf %302, %303 : vector<8x96xf32>
    %305 = vector.extract_strided_slice %296 {offsets = [0, 96], sizes = [8, 32], strides = [1, 1]} : vector<8x128xf32> to vector<8x32xf32>
    %306 = math.tanh %305 : vector<8x32xf32>
    %307 = vector.extract_strided_slice %304 {offsets = [0, 32], sizes = [8, 32], strides = [1, 1]} : vector<8x96xf32> to vector<8x32xf32>
    %308 = arith.mulf %307, %256 : vector<8x32xf32>
    %309 = vector.extract_strided_slice %304 {offsets = [0, 0], sizes = [8, 32], strides = [1, 1]} : vector<8x96xf32> to vector<8x32xf32>
    %310 = arith.mulf %309, %306 : vector<8x32xf32>
    %311 = arith.addf %308, %310 : vector<8x32xf32>
    %312 = vector.extract_strided_slice %304 {offsets = [0, 64], sizes = [8, 32], strides = [1, 1]} : vector<8x96xf32> to vector<8x32xf32>
    %313 = math.tanh %311 : vector<8x32xf32>
    %314 = arith.mulf %312, %313 : vector<8x32xf32>
    %cst_87 = arith.constant dense<0.000000e+00> : vector<8x128xf32>
    %315 = tpu.matmul %314, %3, %cst_87 {dimension_numbers = #tpu.dot_dimension_numbers<[1], [0], [0], [1], [0, 0, 1, 1], [], []>} : vector<8x32xf32>, vector<32x128xf32>, vector<8x128xf32> -> vector<8x128xf32>
    %316 = arith.addf %292, %315 : vector<8x128xf32>
    %317 = vector.extract_strided_slice %316 {offsets = [0, 0], sizes = [8, 96], strides = [1, 1]} : vector<8x128xf32> to vector<8x96xf32>
    %cst_88 = arith.constant 5.000000e-01 : f32
    %318 = vector.broadcast %cst_88 : f32 to vector<8x96xf32>
    %319 = arith.mulf %318, %317 : vector<8x96xf32>
    %320 = math.tanh %319 : vector<8x96xf32>
    %cst_89 = arith.constant 5.000000e-01 : f32
    %321 = vector.broadcast %cst_89 : f32 to vector<8x96xf32>
    %322 = arith.mulf %321, %320 : vector<8x96xf32>
    %cst_90 = arith.constant 5.000000e-01 : f32
    %323 = vector.broadcast %cst_90 : f32 to vector<8x96xf32>
    %324 = arith.addf %322, %323 : vector<8x96xf32>
    %325 = vector.extract_strided_slice %316 {offsets = [0, 96], sizes = [8, 32], strides = [1, 1]} : vector<8x128xf32> to vector<8x32xf32>
    %326 = math.tanh %325 : vector<8x32xf32>
    %327 = vector.extract_strided_slice %324 {offsets = [0, 32], sizes = [8, 32], strides = [1, 1]} : vector<8x96xf32> to vector<8x32xf32>
    %328 = arith.mulf %327, %276 : vector<8x32xf32>
    %329 = vector.extract_strided_slice %324 {offsets = [0, 0], sizes = [8, 32], strides = [1, 1]} : vector<8x96xf32> to vector<8x32xf32>
    %330 = arith.mulf %329, %326 : vector<8x32xf32>
    %331 = arith.addf %328, %330 : vector<8x32xf32>
    %332 = vector.extract_strided_slice %324 {offsets = [0, 64], sizes = [8, 32], strides = [1, 1]} : vector<8x96xf32> to vector<8x32xf32>
    %333 = math.tanh %331 : vector<8x32xf32>
    %334 = arith.mulf %332, %333 : vector<8x32xf32>
    %335 = arith.index_cast %c5_i32 : i32 to index
    %c0_91 = arith.constant 0 : index
    %c0_92 = arith.constant 0 : index
    %336 = vector.load %arg12[%335, %c0_91, %c0_92] : memref<16x8x32xf32, #tpu.memory_space<vmem>>, vector<1x8x32xf32>
    %337 = vector.shape_cast %336 : vector<1x8x32xf32> to vector<8x32xf32>
    %338 = vector.shape_cast %334 : vector<8x32xf32> to vector<1x8x32xf32>
    tpu.vector_store %arg12[%335, %c0_91, %c0_92], %338 {strides = array<i32>} : memref<16x8x32xf32, #tpu.memory_space<vmem>>, vector<1x8x32xf32>,
    %c6_i32 = arith.constant 6 : i32
    %339 = arith.index_cast %c6_i32 : i32 to index
    %c0_93 = arith.constant 0 : index
    %c0_94 = arith.constant 0 : index
    %340 = vector.load %arg0[%339, %c0_93, %c0_94] : memref<16x8x1xf32, #tpu.memory_space<vmem>>, vector<1x8x1xf32>
    %341 = vector.shape_cast %340 : vector<1x8x1xf32> to vector<8x1xf32>
    %342 = vector.broadcast %341 : vector<8x1xf32> to vector<8x128xf32>
    %343 = vector.broadcast %0 : vector<1x128xf32> to vector<8x128xf32>
    %344 = arith.mulf %342, %343 : vector<8x128xf32>
    %cst_95 = arith.constant dense<0.000000e+00> : vector<8x128xf32>
    %345 = tpu.matmul %334, %4, %cst_95 {dimension_numbers = #tpu.dot_dimension_numbers<[1], [0], [0], [1], [0, 0, 1, 1], [], []>} : vector<8x32xf32>, vector<32x128xf32>, vector<8x128xf32> -> vector<8x128xf32>
    %346 = vector.broadcast %5 : vector<1x128xf32> to vector<8x128xf32>
    %347 = arith.addf %345, %346 : vector<8x128xf32>
    %cst_96 = arith.constant dense<0.000000e+00> : vector<8x128xf32>
    %348 = tpu.matmul %314, %1, %cst_96 {dimension_numbers = #tpu.dot_dimension_numbers<[1], [0], [0], [1], [0, 0, 1, 1], [], []>} : vector<8x32xf32>, vector<32x128xf32>, vector<8x128xf32> -> vector<8x128xf32>
    %349 = arith.addf %344, %348 : vector<8x128xf32>
    %350 = vector.broadcast %2 : vector<1x128xf32> to vector<8x128xf32>
    %351 = arith.addf %349, %350 : vector<8x128xf32>
    %352 = vector.extract_strided_slice %351 {offsets = [0, 0], sizes = [8, 96], strides = [1, 1]} : vector<8x128xf32> to vector<8x96xf32>
    %cst_97 = arith.constant 5.000000e-01 : f32
    %353 = vector.broadcast %cst_97 : f32 to vector<8x96xf32>
    %354 = arith.mulf %353, %352 : vector<8x96xf32>
    %355 = math.tanh %354 : vector<8x96xf32>
    %cst_98 = arith.constant 5.000000e-01 : f32
    %356 = vector.broadcast %cst_98 : f32 to vector<8x96xf32>
    %357 = arith.mulf %356, %355 : vector<8x96xf32>
    %cst_99 = arith.constant 5.000000e-01 : f32
    %358 = vector.broadcast %cst_99 : f32 to vector<8x96xf32>
    %359 = arith.addf %357, %358 : vector<8x96xf32>
    %360 = vector.extract_strided_slice %351 {offsets = [0, 96], sizes = [8, 32], strides = [1, 1]} : vector<8x128xf32> to vector<8x32xf32>
    %361 = math.tanh %360 : vector<8x32xf32>
    %362 = vector.extract_strided_slice %359 {offsets = [0, 32], sizes = [8, 32], strides = [1, 1]} : vector<8x96xf32> to vector<8x32xf32>
    %363 = arith.mulf %362, %311 : vector<8x32xf32>
    %364 = vector.extract_strided_slice %359 {offsets = [0, 0], sizes = [8, 32], strides = [1, 1]} : vector<8x96xf32> to vector<8x32xf32>
    %365 = arith.mulf %364, %361 : vector<8x32xf32>
    %366 = arith.addf %363, %365 : vector<8x32xf32>
    %367 = vector.extract_strided_slice %359 {offsets = [0, 64], sizes = [8, 32], strides = [1, 1]} : vector<8x96xf32> to vector<8x32xf32>
    %368 = math.tanh %366 : vector<8x32xf32>
    %369 = arith.mulf %367, %368 : vector<8x32xf32>
    %cst_100 = arith.constant dense<0.000000e+00> : vector<8x128xf32>
    %370 = tpu.matmul %369, %3, %cst_100 {dimension_numbers = #tpu.dot_dimension_numbers<[1], [0], [0], [1], [0, 0, 1, 1], [], []>} : vector<8x32xf32>, vector<32x128xf32>, vector<8x128xf32> -> vector<8x128xf32>
    %371 = arith.addf %347, %370 : vector<8x128xf32>
    %372 = vector.extract_strided_slice %371 {offsets = [0, 0], sizes = [8, 96], strides = [1, 1]} : vector<8x128xf32> to vector<8x96xf32>
    %cst_101 = arith.constant 5.000000e-01 : f32
    %373 = vector.broadcast %cst_101 : f32 to vector<8x96xf32>
    %374 = arith.mulf %373, %372 : vector<8x96xf32>
    %375 = math.tanh %374 : vector<8x96xf32>
    %cst_102 = arith.constant 5.000000e-01 : f32
    %376 = vector.broadcast %cst_102 : f32 to vector<8x96xf32>
    %377 = arith.mulf %376, %375 : vector<8x96xf32>
    %cst_103 = arith.constant 5.000000e-01 : f32
    %378 = vector.broadcast %cst_103 : f32 to vector<8x96xf32>
    %379 = arith.addf %377, %378 : vector<8x96xf32>
    %380 = vector.extract_strided_slice %371 {offsets = [0, 96], sizes = [8, 32], strides = [1, 1]} : vector<8x128xf32> to vector<8x32xf32>
    %381 = math.tanh %380 : vector<8x32xf32>
    %382 = vector.extract_strided_slice %379 {offsets = [0, 32], sizes = [8, 32], strides = [1, 1]} : vector<8x96xf32> to vector<8x32xf32>
    %383 = arith.mulf %382, %331 : vector<8x32xf32>
    %384 = vector.extract_strided_slice %379 {offsets = [0, 0], sizes = [8, 32], strides = [1, 1]} : vector<8x96xf32> to vector<8x32xf32>
    %385 = arith.mulf %384, %381 : vector<8x32xf32>
    %386 = arith.addf %383, %385 : vector<8x32xf32>
    %387 = vector.extract_strided_slice %379 {offsets = [0, 64], sizes = [8, 32], strides = [1, 1]} : vector<8x96xf32> to vector<8x32xf32>
    %388 = math.tanh %386 : vector<8x32xf32>
    %389 = arith.mulf %387, %388 : vector<8x32xf32>
    %390 = arith.index_cast %c6_i32 : i32 to index
    %c0_104 = arith.constant 0 : index
    %c0_105 = arith.constant 0 : index
    %391 = vector.load %arg12[%390, %c0_104, %c0_105] : memref<16x8x32xf32, #tpu.memory_space<vmem>>, vector<1x8x32xf32>
    %392 = vector.shape_cast %391 : vector<1x8x32xf32> to vector<8x32xf32>
    %393 = vector.shape_cast %389 : vector<8x32xf32> to vector<1x8x32xf32>
    tpu.vector_store %arg12[%390, %c0_104, %c0_105], %393 {strides = array<i32>} : memref<16x8x32xf32, #tpu.memory_space<vmem>>, vector<1x8x32xf32>,
    %c7_i32 = arith.constant 7 : i32
    %394 = arith.index_cast %c7_i32 : i32 to index
    %c0_106 = arith.constant 0 : index
    %c0_107 = arith.constant 0 : index
    %395 = vector.load %arg0[%394, %c0_106, %c0_107] : memref<16x8x1xf32, #tpu.memory_space<vmem>>, vector<1x8x1xf32>
    %396 = vector.shape_cast %395 : vector<1x8x1xf32> to vector<8x1xf32>
    %397 = vector.broadcast %396 : vector<8x1xf32> to vector<8x128xf32>
    %398 = vector.broadcast %0 : vector<1x128xf32> to vector<8x128xf32>
    %399 = arith.mulf %397, %398 : vector<8x128xf32>
    %cst_108 = arith.constant dense<0.000000e+00> : vector<8x128xf32>
    %400 = tpu.matmul %389, %4, %cst_108 {dimension_numbers = #tpu.dot_dimension_numbers<[1], [0], [0], [1], [0, 0, 1, 1], [], []>} : vector<8x32xf32>, vector<32x128xf32>, vector<8x128xf32> -> vector<8x128xf32>
    %401 = vector.broadcast %5 : vector<1x128xf32> to vector<8x128xf32>
    %402 = arith.addf %400, %401 : vector<8x128xf32>
    %cst_109 = arith.constant dense<0.000000e+00> : vector<8x128xf32>
    %403 = tpu.matmul %369, %1, %cst_109 {dimension_numbers = #tpu.dot_dimension_numbers<[1], [0], [0], [1], [0, 0, 1, 1], [], []>} : vector<8x32xf32>, vector<32x128xf32>, vector<8x128xf32> -> vector<8x128xf32>
    %404 = arith.addf %399, %403 : vector<8x128xf32>
    %405 = vector.broadcast %2 : vector<1x128xf32> to vector<8x128xf32>
    %406 = arith.addf %404, %405 : vector<8x128xf32>
    %407 = vector.extract_strided_slice %406 {offsets = [0, 0], sizes = [8, 96], strides = [1, 1]} : vector<8x128xf32> to vector<8x96xf32>
    %cst_110 = arith.constant 5.000000e-01 : f32
    %408 = vector.broadcast %cst_110 : f32 to vector<8x96xf32>
    %409 = arith.mulf %408, %407 : vector<8x96xf32>
    %410 = math.tanh %409 : vector<8x96xf32>
    %cst_111 = arith.constant 5.000000e-01 : f32
    %411 = vector.broadcast %cst_111 : f32 to vector<8x96xf32>
    %412 = arith.mulf %411, %410 : vector<8x96xf32>
    %cst_112 = arith.constant 5.000000e-01 : f32
    %413 = vector.broadcast %cst_112 : f32 to vector<8x96xf32>
    %414 = arith.addf %412, %413 : vector<8x96xf32>
    %415 = vector.extract_strided_slice %406 {offsets = [0, 96], sizes = [8, 32], strides = [1, 1]} : vector<8x128xf32> to vector<8x32xf32>
    %416 = math.tanh %415 : vector<8x32xf32>
    %417 = vector.extract_strided_slice %414 {offsets = [0, 32], sizes = [8, 32], strides = [1, 1]} : vector<8x96xf32> to vector<8x32xf32>
    %418 = arith.mulf %417, %366 : vector<8x32xf32>
    %419 = vector.extract_strided_slice %414 {offsets = [0, 0], sizes = [8, 32], strides = [1, 1]} : vector<8x96xf32> to vector<8x32xf32>
    %420 = arith.mulf %419, %416 : vector<8x32xf32>
    %421 = arith.addf %418, %420 : vector<8x32xf32>
    %422 = vector.extract_strided_slice %414 {offsets = [0, 64], sizes = [8, 32], strides = [1, 1]} : vector<8x96xf32> to vector<8x32xf32>
    %423 = math.tanh %421 : vector<8x32xf32>
    %424 = arith.mulf %422, %423 : vector<8x32xf32>
    %cst_113 = arith.constant dense<0.000000e+00> : vector<8x128xf32>
    %425 = tpu.matmul %424, %3, %cst_113 {dimension_numbers = #tpu.dot_dimension_numbers<[1], [0], [0], [1], [0, 0, 1, 1], [], []>} : vector<8x32xf32>, vector<32x128xf32>, vector<8x128xf32> -> vector<8x128xf32>
    %426 = arith.addf %402, %425 : vector<8x128xf32>
    %427 = vector.extract_strided_slice %426 {offsets = [0, 0], sizes = [8, 96], strides = [1, 1]} : vector<8x128xf32> to vector<8x96xf32>
    %cst_114 = arith.constant 5.000000e-01 : f32
    %428 = vector.broadcast %cst_114 : f32 to vector<8x96xf32>
    %429 = arith.mulf %428, %427 : vector<8x96xf32>
    %430 = math.tanh %429 : vector<8x96xf32>
    %cst_115 = arith.constant 5.000000e-01 : f32
    %431 = vector.broadcast %cst_115 : f32 to vector<8x96xf32>
    %432 = arith.mulf %431, %430 : vector<8x96xf32>
    %cst_116 = arith.constant 5.000000e-01 : f32
    %433 = vector.broadcast %cst_116 : f32 to vector<8x96xf32>
    %434 = arith.addf %432, %433 : vector<8x96xf32>
    %435 = vector.extract_strided_slice %426 {offsets = [0, 96], sizes = [8, 32], strides = [1, 1]} : vector<8x128xf32> to vector<8x32xf32>
    %436 = math.tanh %435 : vector<8x32xf32>
    %437 = vector.extract_strided_slice %434 {offsets = [0, 32], sizes = [8, 32], strides = [1, 1]} : vector<8x96xf32> to vector<8x32xf32>
    %438 = arith.mulf %437, %386 : vector<8x32xf32>
    %439 = vector.extract_strided_slice %434 {offsets = [0, 0], sizes = [8, 32], strides = [1, 1]} : vector<8x96xf32> to vector<8x32xf32>
    %440 = arith.mulf %439, %436 : vector<8x32xf32>
    %441 = arith.addf %438, %440 : vector<8x32xf32>
    %442 = vector.extract_strided_slice %434 {offsets = [0, 64], sizes = [8, 32], strides = [1, 1]} : vector<8x96xf32> to vector<8x32xf32>
    %443 = math.tanh %441 : vector<8x32xf32>
    %444 = arith.mulf %442, %443 : vector<8x32xf32>
    %445 = arith.index_cast %c7_i32 : i32 to index
    %c0_117 = arith.constant 0 : index
    %c0_118 = arith.constant 0 : index
    %446 = vector.load %arg12[%445, %c0_117, %c0_118] : memref<16x8x32xf32, #tpu.memory_space<vmem>>, vector<1x8x32xf32>
    %447 = vector.shape_cast %446 : vector<1x8x32xf32> to vector<8x32xf32>
    %448 = vector.shape_cast %444 : vector<8x32xf32> to vector<1x8x32xf32>
    tpu.vector_store %arg12[%445, %c0_117, %c0_118], %448 {strides = array<i32>} : memref<16x8x32xf32, #tpu.memory_space<vmem>>, vector<1x8x32xf32>,
    %c8_i32 = arith.constant 8 : i32
    %449 = arith.index_cast %c8_i32 : i32 to index
    %c0_119 = arith.constant 0 : index
    %c0_120 = arith.constant 0 : index
    %450 = vector.load %arg0[%449, %c0_119, %c0_120] : memref<16x8x1xf32, #tpu.memory_space<vmem>>, vector<1x8x1xf32>
    %451 = vector.shape_cast %450 : vector<1x8x1xf32> to vector<8x1xf32>
    %452 = vector.broadcast %451 : vector<8x1xf32> to vector<8x128xf32>
    %453 = vector.broadcast %0 : vector<1x128xf32> to vector<8x128xf32>
    %454 = arith.mulf %452, %453 : vector<8x128xf32>
    %cst_121 = arith.constant dense<0.000000e+00> : vector<8x128xf32>
    %455 = tpu.matmul %444, %4, %cst_121 {dimension_numbers = #tpu.dot_dimension_numbers<[1], [0], [0], [1], [0, 0, 1, 1], [], []>} : vector<8x32xf32>, vector<32x128xf32>, vector<8x128xf32> -> vector<8x128xf32>
    %456 = vector.broadcast %5 : vector<1x128xf32> to vector<8x128xf32>
    %457 = arith.addf %455, %456 : vector<8x128xf32>
    %cst_122 = arith.constant dense<0.000000e+00> : vector<8x128xf32>
    %458 = tpu.matmul %424, %1, %cst_122 {dimension_numbers = #tpu.dot_dimension_numbers<[1], [0], [0], [1], [0, 0, 1, 1], [], []>} : vector<8x32xf32>, vector<32x128xf32>, vector<8x128xf32> -> vector<8x128xf32>
    %459 = arith.addf %454, %458 : vector<8x128xf32>
    %460 = vector.broadcast %2 : vector<1x128xf32> to vector<8x128xf32>
    %461 = arith.addf %459, %460 : vector<8x128xf32>
    %462 = vector.extract_strided_slice %461 {offsets = [0, 0], sizes = [8, 96], strides = [1, 1]} : vector<8x128xf32> to vector<8x96xf32>
    %cst_123 = arith.constant 5.000000e-01 : f32
    %463 = vector.broadcast %cst_123 : f32 to vector<8x96xf32>
    %464 = arith.mulf %463, %462 : vector<8x96xf32>
    %465 = math.tanh %464 : vector<8x96xf32>
    %cst_124 = arith.constant 5.000000e-01 : f32
    %466 = vector.broadcast %cst_124 : f32 to vector<8x96xf32>
    %467 = arith.mulf %466, %465 : vector<8x96xf32>
    %cst_125 = arith.constant 5.000000e-01 : f32
    %468 = vector.broadcast %cst_125 : f32 to vector<8x96xf32>
    %469 = arith.addf %467, %468 : vector<8x96xf32>
    %470 = vector.extract_strided_slice %461 {offsets = [0, 96], sizes = [8, 32], strides = [1, 1]} : vector<8x128xf32> to vector<8x32xf32>
    %471 = math.tanh %470 : vector<8x32xf32>
    %472 = vector.extract_strided_slice %469 {offsets = [0, 32], sizes = [8, 32], strides = [1, 1]} : vector<8x96xf32> to vector<8x32xf32>
    %473 = arith.mulf %472, %421 : vector<8x32xf32>
    %474 = vector.extract_strided_slice %469 {offsets = [0, 0], sizes = [8, 32], strides = [1, 1]} : vector<8x96xf32> to vector<8x32xf32>
    %475 = arith.mulf %474, %471 : vector<8x32xf32>
    %476 = arith.addf %473, %475 : vector<8x32xf32>
    %477 = vector.extract_strided_slice %469 {offsets = [0, 64], sizes = [8, 32], strides = [1, 1]} : vector<8x96xf32> to vector<8x32xf32>
    %478 = math.tanh %476 : vector<8x32xf32>
    %479 = arith.mulf %477, %478 : vector<8x32xf32>
    %cst_126 = arith.constant dense<0.000000e+00> : vector<8x128xf32>
    %480 = tpu.matmul %479, %3, %cst_126 {dimension_numbers = #tpu.dot_dimension_numbers<[1], [0], [0], [1], [0, 0, 1, 1], [], []>} : vector<8x32xf32>, vector<32x128xf32>, vector<8x128xf32> -> vector<8x128xf32>
    %481 = arith.addf %457, %480 : vector<8x128xf32>
    %482 = vector.extract_strided_slice %481 {offsets = [0, 0], sizes = [8, 96], strides = [1, 1]} : vector<8x128xf32> to vector<8x96xf32>
    %cst_127 = arith.constant 5.000000e-01 : f32
    %483 = vector.broadcast %cst_127 : f32 to vector<8x96xf32>
    %484 = arith.mulf %483, %482 : vector<8x96xf32>
    %485 = math.tanh %484 : vector<8x96xf32>
    %cst_128 = arith.constant 5.000000e-01 : f32
    %486 = vector.broadcast %cst_128 : f32 to vector<8x96xf32>
    %487 = arith.mulf %486, %485 : vector<8x96xf32>
    %cst_129 = arith.constant 5.000000e-01 : f32
    %488 = vector.broadcast %cst_129 : f32 to vector<8x96xf32>
    %489 = arith.addf %487, %488 : vector<8x96xf32>
    %490 = vector.extract_strided_slice %481 {offsets = [0, 96], sizes = [8, 32], strides = [1, 1]} : vector<8x128xf32> to vector<8x32xf32>
    %491 = math.tanh %490 : vector<8x32xf32>
    %492 = vector.extract_strided_slice %489 {offsets = [0, 32], sizes = [8, 32], strides = [1, 1]} : vector<8x96xf32> to vector<8x32xf32>
    %493 = arith.mulf %492, %441 : vector<8x32xf32>
    %494 = vector.extract_strided_slice %489 {offsets = [0, 0], sizes = [8, 32], strides = [1, 1]} : vector<8x96xf32> to vector<8x32xf32>
    %495 = arith.mulf %494, %491 : vector<8x32xf32>
    %496 = arith.addf %493, %495 : vector<8x32xf32>
    %497 = vector.extract_strided_slice %489 {offsets = [0, 64], sizes = [8, 32], strides = [1, 1]} : vector<8x96xf32> to vector<8x32xf32>
    %498 = math.tanh %496 : vector<8x32xf32>
    %499 = arith.mulf %497, %498 : vector<8x32xf32>
    %500 = arith.index_cast %c8_i32 : i32 to index
    %c0_130 = arith.constant 0 : index
    %c0_131 = arith.constant 0 : index
    %501 = vector.load %arg12[%500, %c0_130, %c0_131] : memref<16x8x32xf32, #tpu.memory_space<vmem>>, vector<1x8x32xf32>
    %502 = vector.shape_cast %501 : vector<1x8x32xf32> to vector<8x32xf32>
    %503 = vector.shape_cast %499 : vector<8x32xf32> to vector<1x8x32xf32>
    tpu.vector_store %arg12[%500, %c0_130, %c0_131], %503 {strides = array<i32>} : memref<16x8x32xf32, #tpu.memory_space<vmem>>, vector<1x8x32xf32>,
    %c9_i32 = arith.constant 9 : i32
    %504 = arith.index_cast %c9_i32 : i32 to index
    %c0_132 = arith.constant 0 : index
    %c0_133 = arith.constant 0 : index
    %505 = vector.load %arg0[%504, %c0_132, %c0_133] : memref<16x8x1xf32, #tpu.memory_space<vmem>>, vector<1x8x1xf32>
    %506 = vector.shape_cast %505 : vector<1x8x1xf32> to vector<8x1xf32>
    %507 = vector.broadcast %506 : vector<8x1xf32> to vector<8x128xf32>
    %508 = vector.broadcast %0 : vector<1x128xf32> to vector<8x128xf32>
    %509 = arith.mulf %507, %508 : vector<8x128xf32>
    %cst_134 = arith.constant dense<0.000000e+00> : vector<8x128xf32>
    %510 = tpu.matmul %499, %4, %cst_134 {dimension_numbers = #tpu.dot_dimension_numbers<[1], [0], [0], [1], [0, 0, 1, 1], [], []>} : vector<8x32xf32>, vector<32x128xf32>, vector<8x128xf32> -> vector<8x128xf32>
    %511 = vector.broadcast %5 : vector<1x128xf32> to vector<8x128xf32>
    %512 = arith.addf %510, %511 : vector<8x128xf32>
    %cst_135 = arith.constant dense<0.000000e+00> : vector<8x128xf32>
    %513 = tpu.matmul %479, %1, %cst_135 {dimension_numbers = #tpu.dot_dimension_numbers<[1], [0], [0], [1], [0, 0, 1, 1], [], []>} : vector<8x32xf32>, vector<32x128xf32>, vector<8x128xf32> -> vector<8x128xf32>
    %514 = arith.addf %509, %513 : vector<8x128xf32>
    %515 = vector.broadcast %2 : vector<1x128xf32> to vector<8x128xf32>
    %516 = arith.addf %514, %515 : vector<8x128xf32>
    %517 = vector.extract_strided_slice %516 {offsets = [0, 0], sizes = [8, 96], strides = [1, 1]} : vector<8x128xf32> to vector<8x96xf32>
    %cst_136 = arith.constant 5.000000e-01 : f32
    %518 = vector.broadcast %cst_136 : f32 to vector<8x96xf32>
    %519 = arith.mulf %518, %517 : vector<8x96xf32>
    %520 = math.tanh %519 : vector<8x96xf32>
    %cst_137 = arith.constant 5.000000e-01 : f32
    %521 = vector.broadcast %cst_137 : f32 to vector<8x96xf32>
    %522 = arith.mulf %521, %520 : vector<8x96xf32>
    %cst_138 = arith.constant 5.000000e-01 : f32
    %523 = vector.broadcast %cst_138 : f32 to vector<8x96xf32>
    %524 = arith.addf %522, %523 : vector<8x96xf32>
    %525 = vector.extract_strided_slice %516 {offsets = [0, 96], sizes = [8, 32], strides = [1, 1]} : vector<8x128xf32> to vector<8x32xf32>
    %526 = math.tanh %525 : vector<8x32xf32>
    %527 = vector.extract_strided_slice %524 {offsets = [0, 32], sizes = [8, 32], strides = [1, 1]} : vector<8x96xf32> to vector<8x32xf32>
    %528 = arith.mulf %527, %476 : vector<8x32xf32>
    %529 = vector.extract_strided_slice %524 {offsets = [0, 0], sizes = [8, 32], strides = [1, 1]} : vector<8x96xf32> to vector<8x32xf32>
    %530 = arith.mulf %529, %526 : vector<8x32xf32>
    %531 = arith.addf %528, %530 : vector<8x32xf32>
    %532 = vector.extract_strided_slice %524 {offsets = [0, 64], sizes = [8, 32], strides = [1, 1]} : vector<8x96xf32> to vector<8x32xf32>
    %533 = math.tanh %531 : vector<8x32xf32>
    %534 = arith.mulf %532, %533 : vector<8x32xf32>
    %cst_139 = arith.constant dense<0.000000e+00> : vector<8x128xf32>
    %535 = tpu.matmul %534, %3, %cst_139 {dimension_numbers = #tpu.dot_dimension_numbers<[1], [0], [0], [1], [0, 0, 1, 1], [], []>} : vector<8x32xf32>, vector<32x128xf32>, vector<8x128xf32> -> vector<8x128xf32>
    %536 = arith.addf %512, %535 : vector<8x128xf32>
    %537 = vector.extract_strided_slice %536 {offsets = [0, 0], sizes = [8, 96], strides = [1, 1]} : vector<8x128xf32> to vector<8x96xf32>
    %cst_140 = arith.constant 5.000000e-01 : f32
    %538 = vector.broadcast %cst_140 : f32 to vector<8x96xf32>
    %539 = arith.mulf %538, %537 : vector<8x96xf32>
    %540 = math.tanh %539 : vector<8x96xf32>
    %cst_141 = arith.constant 5.000000e-01 : f32
    %541 = vector.broadcast %cst_141 : f32 to vector<8x96xf32>
    %542 = arith.mulf %541, %540 : vector<8x96xf32>
    %cst_142 = arith.constant 5.000000e-01 : f32
    %543 = vector.broadcast %cst_142 : f32 to vector<8x96xf32>
    %544 = arith.addf %542, %543 : vector<8x96xf32>
    %545 = vector.extract_strided_slice %536 {offsets = [0, 96], sizes = [8, 32], strides = [1, 1]} : vector<8x128xf32> to vector<8x32xf32>
    %546 = math.tanh %545 : vector<8x32xf32>
    %547 = vector.extract_strided_slice %544 {offsets = [0, 32], sizes = [8, 32], strides = [1, 1]} : vector<8x96xf32> to vector<8x32xf32>
    %548 = arith.mulf %547, %496 : vector<8x32xf32>
    %549 = vector.extract_strided_slice %544 {offsets = [0, 0], sizes = [8, 32], strides = [1, 1]} : vector<8x96xf32> to vector<8x32xf32>
    %550 = arith.mulf %549, %546 : vector<8x32xf32>
    %551 = arith.addf %548, %550 : vector<8x32xf32>
    %552 = vector.extract_strided_slice %544 {offsets = [0, 64], sizes = [8, 32], strides = [1, 1]} : vector<8x96xf32> to vector<8x32xf32>
    %553 = math.tanh %551 : vector<8x32xf32>
    %554 = arith.mulf %552, %553 : vector<8x32xf32>
    %555 = arith.index_cast %c9_i32 : i32 to index
    %c0_143 = arith.constant 0 : index
    %c0_144 = arith.constant 0 : index
    %556 = vector.load %arg12[%555, %c0_143, %c0_144] : memref<16x8x32xf32, #tpu.memory_space<vmem>>, vector<1x8x32xf32>
    %557 = vector.shape_cast %556 : vector<1x8x32xf32> to vector<8x32xf32>
    %558 = vector.shape_cast %554 : vector<8x32xf32> to vector<1x8x32xf32>
    tpu.vector_store %arg12[%555, %c0_143, %c0_144], %558 {strides = array<i32>} : memref<16x8x32xf32, #tpu.memory_space<vmem>>, vector<1x8x32xf32>,
    %c10_i32 = arith.constant 10 : i32
    %559 = arith.index_cast %c10_i32 : i32 to index
    %c0_145 = arith.constant 0 : index
    %c0_146 = arith.constant 0 : index
    %560 = vector.load %arg0[%559, %c0_145, %c0_146] : memref<16x8x1xf32, #tpu.memory_space<vmem>>, vector<1x8x1xf32>
    %561 = vector.shape_cast %560 : vector<1x8x1xf32> to vector<8x1xf32>
    %562 = vector.broadcast %561 : vector<8x1xf32> to vector<8x128xf32>
    %563 = vector.broadcast %0 : vector<1x128xf32> to vector<8x128xf32>
    %564 = arith.mulf %562, %563 : vector<8x128xf32>
    %cst_147 = arith.constant dense<0.000000e+00> : vector<8x128xf32>
    %565 = tpu.matmul %554, %4, %cst_147 {dimension_numbers = #tpu.dot_dimension_numbers<[1], [0], [0], [1], [0, 0, 1, 1], [], []>} : vector<8x32xf32>, vector<32x128xf32>, vector<8x128xf32> -> vector<8x128xf32>
    %566 = vector.broadcast %5 : vector<1x128xf32> to vector<8x128xf32>
    %567 = arith.addf %565, %566 : vector<8x128xf32>
    %cst_148 = arith.constant dense<0.000000e+00> : vector<8x128xf32>
    %568 = tpu.matmul %534, %1, %cst_148 {dimension_numbers = #tpu.dot_dimension_numbers<[1], [0], [0], [1], [0, 0, 1, 1], [], []>} : vector<8x32xf32>, vector<32x128xf32>, vector<8x128xf32> -> vector<8x128xf32>
    %569 = arith.addf %564, %568 : vector<8x128xf32>
    %570 = vector.broadcast %2 : vector<1x128xf32> to vector<8x128xf32>
    %571 = arith.addf %569, %570 : vector<8x128xf32>
    %572 = vector.extract_strided_slice %571 {offsets = [0, 0], sizes = [8, 96], strides = [1, 1]} : vector<8x128xf32> to vector<8x96xf32>
    %cst_149 = arith.constant 5.000000e-01 : f32
    %573 = vector.broadcast %cst_149 : f32 to vector<8x96xf32>
    %574 = arith.mulf %573, %572 : vector<8x96xf32>
    %575 = math.tanh %574 : vector<8x96xf32>
    %cst_150 = arith.constant 5.000000e-01 : f32
    %576 = vector.broadcast %cst_150 : f32 to vector<8x96xf32>
    %577 = arith.mulf %576, %575 : vector<8x96xf32>
    %cst_151 = arith.constant 5.000000e-01 : f32
    %578 = vector.broadcast %cst_151 : f32 to vector<8x96xf32>
    %579 = arith.addf %577, %578 : vector<8x96xf32>
    %580 = vector.extract_strided_slice %571 {offsets = [0, 96], sizes = [8, 32], strides = [1, 1]} : vector<8x128xf32> to vector<8x32xf32>
    %581 = math.tanh %580 : vector<8x32xf32>
    %582 = vector.extract_strided_slice %579 {offsets = [0, 32], sizes = [8, 32], strides = [1, 1]} : vector<8x96xf32> to vector<8x32xf32>
    %583 = arith.mulf %582, %531 : vector<8x32xf32>
    %584 = vector.extract_strided_slice %579 {offsets = [0, 0], sizes = [8, 32], strides = [1, 1]} : vector<8x96xf32> to vector<8x32xf32>
    %585 = arith.mulf %584, %581 : vector<8x32xf32>
    %586 = arith.addf %583, %585 : vector<8x32xf32>
    %587 = vector.extract_strided_slice %579 {offsets = [0, 64], sizes = [8, 32], strides = [1, 1]} : vector<8x96xf32> to vector<8x32xf32>
    %588 = math.tanh %586 : vector<8x32xf32>
    %589 = arith.mulf %587, %588 : vector<8x32xf32>
    %cst_152 = arith.constant dense<0.000000e+00> : vector<8x128xf32>
    %590 = tpu.matmul %589, %3, %cst_152 {dimension_numbers = #tpu.dot_dimension_numbers<[1], [0], [0], [1], [0, 0, 1, 1], [], []>} : vector<8x32xf32>, vector<32x128xf32>, vector<8x128xf32> -> vector<8x128xf32>
    %591 = arith.addf %567, %590 : vector<8x128xf32>
    %592 = vector.extract_strided_slice %591 {offsets = [0, 0], sizes = [8, 96], strides = [1, 1]} : vector<8x128xf32> to vector<8x96xf32>
    %cst_153 = arith.constant 5.000000e-01 : f32
    %593 = vector.broadcast %cst_153 : f32 to vector<8x96xf32>
    %594 = arith.mulf %593, %592 : vector<8x96xf32>
    %595 = math.tanh %594 : vector<8x96xf32>
    %cst_154 = arith.constant 5.000000e-01 : f32
    %596 = vector.broadcast %cst_154 : f32 to vector<8x96xf32>
    %597 = arith.mulf %596, %595 : vector<8x96xf32>
    %cst_155 = arith.constant 5.000000e-01 : f32
    %598 = vector.broadcast %cst_155 : f32 to vector<8x96xf32>
    %599 = arith.addf %597, %598 : vector<8x96xf32>
    %600 = vector.extract_strided_slice %591 {offsets = [0, 96], sizes = [8, 32], strides = [1, 1]} : vector<8x128xf32> to vector<8x32xf32>
    %601 = math.tanh %600 : vector<8x32xf32>
    %602 = vector.extract_strided_slice %599 {offsets = [0, 32], sizes = [8, 32], strides = [1, 1]} : vector<8x96xf32> to vector<8x32xf32>
    %603 = arith.mulf %602, %551 : vector<8x32xf32>
    %604 = vector.extract_strided_slice %599 {offsets = [0, 0], sizes = [8, 32], strides = [1, 1]} : vector<8x96xf32> to vector<8x32xf32>
    %605 = arith.mulf %604, %601 : vector<8x32xf32>
    %606 = arith.addf %603, %605 : vector<8x32xf32>
    %607 = vector.extract_strided_slice %599 {offsets = [0, 64], sizes = [8, 32], strides = [1, 1]} : vector<8x96xf32> to vector<8x32xf32>
    %608 = math.tanh %606 : vector<8x32xf32>
    %609 = arith.mulf %607, %608 : vector<8x32xf32>
    %610 = arith.index_cast %c10_i32 : i32 to index
    %c0_156 = arith.constant 0 : index
    %c0_157 = arith.constant 0 : index
    %611 = vector.load %arg12[%610, %c0_156, %c0_157] : memref<16x8x32xf32, #tpu.memory_space<vmem>>, vector<1x8x32xf32>
    %612 = vector.shape_cast %611 : vector<1x8x32xf32> to vector<8x32xf32>
    %613 = vector.shape_cast %609 : vector<8x32xf32> to vector<1x8x32xf32>
    tpu.vector_store %arg12[%610, %c0_156, %c0_157], %613 {strides = array<i32>} : memref<16x8x32xf32, #tpu.memory_space<vmem>>, vector<1x8x32xf32>,
    %c11_i32 = arith.constant 11 : i32
    %614 = arith.index_cast %c11_i32 : i32 to index
    %c0_158 = arith.constant 0 : index
    %c0_159 = arith.constant 0 : index
    %615 = vector.load %arg0[%614, %c0_158, %c0_159] : memref<16x8x1xf32, #tpu.memory_space<vmem>>, vector<1x8x1xf32>
    %616 = vector.shape_cast %615 : vector<1x8x1xf32> to vector<8x1xf32>
    %617 = vector.broadcast %616 : vector<8x1xf32> to vector<8x128xf32>
    %618 = vector.broadcast %0 : vector<1x128xf32> to vector<8x128xf32>
    %619 = arith.mulf %617, %618 : vector<8x128xf32>
    %cst_160 = arith.constant dense<0.000000e+00> : vector<8x128xf32>
    %620 = tpu.matmul %609, %4, %cst_160 {dimension_numbers = #tpu.dot_dimension_numbers<[1], [0], [0], [1], [0, 0, 1, 1], [], []>} : vector<8x32xf32>, vector<32x128xf32>, vector<8x128xf32> -> vector<8x128xf32>
    %621 = vector.broadcast %5 : vector<1x128xf32> to vector<8x128xf32>
    %622 = arith.addf %620, %621 : vector<8x128xf32>
    %cst_161 = arith.constant dense<0.000000e+00> : vector<8x128xf32>
    %623 = tpu.matmul %589, %1, %cst_161 {dimension_numbers = #tpu.dot_dimension_numbers<[1], [0], [0], [1], [0, 0, 1, 1], [], []>} : vector<8x32xf32>, vector<32x128xf32>, vector<8x128xf32> -> vector<8x128xf32>
    %624 = arith.addf %619, %623 : vector<8x128xf32>
    %625 = vector.broadcast %2 : vector<1x128xf32> to vector<8x128xf32>
    %626 = arith.addf %624, %625 : vector<8x128xf32>
    %627 = vector.extract_strided_slice %626 {offsets = [0, 0], sizes = [8, 96], strides = [1, 1]} : vector<8x128xf32> to vector<8x96xf32>
    %cst_162 = arith.constant 5.000000e-01 : f32
    %628 = vector.broadcast %cst_162 : f32 to vector<8x96xf32>
    %629 = arith.mulf %628, %627 : vector<8x96xf32>
    %630 = math.tanh %629 : vector<8x96xf32>
    %cst_163 = arith.constant 5.000000e-01 : f32
    %631 = vector.broadcast %cst_163 : f32 to vector<8x96xf32>
    %632 = arith.mulf %631, %630 : vector<8x96xf32>
    %cst_164 = arith.constant 5.000000e-01 : f32
    %633 = vector.broadcast %cst_164 : f32 to vector<8x96xf32>
    %634 = arith.addf %632, %633 : vector<8x96xf32>
    %635 = vector.extract_strided_slice %626 {offsets = [0, 96], sizes = [8, 32], strides = [1, 1]} : vector<8x128xf32> to vector<8x32xf32>
    %636 = math.tanh %635 : vector<8x32xf32>
    %637 = vector.extract_strided_slice %634 {offsets = [0, 32], sizes = [8, 32], strides = [1, 1]} : vector<8x96xf32> to vector<8x32xf32>
    %638 = arith.mulf %637, %586 : vector<8x32xf32>
    %639 = vector.extract_strided_slice %634 {offsets = [0, 0], sizes = [8, 32], strides = [1, 1]} : vector<8x96xf32> to vector<8x32xf32>
    %640 = arith.mulf %639, %636 : vector<8x32xf32>
    %641 = arith.addf %638, %640 : vector<8x32xf32>
    %642 = vector.extract_strided_slice %634 {offsets = [0, 64], sizes = [8, 32], strides = [1, 1]} : vector<8x96xf32> to vector<8x32xf32>
    %643 = math.tanh %641 : vector<8x32xf32>
    %644 = arith.mulf %642, %643 : vector<8x32xf32>
    %cst_165 = arith.constant dense<0.000000e+00> : vector<8x128xf32>
    %645 = tpu.matmul %644, %3, %cst_165 {dimension_numbers = #tpu.dot_dimension_numbers<[1], [0], [0], [1], [0, 0, 1, 1], [], []>} : vector<8x32xf32>, vector<32x128xf32>, vector<8x128xf32> -> vector<8x128xf32>
    %646 = arith.addf %622, %645 : vector<8x128xf32>
    %647 = vector.extract_strided_slice %646 {offsets = [0, 0], sizes = [8, 96], strides = [1, 1]} : vector<8x128xf32> to vector<8x96xf32>
    %cst_166 = arith.constant 5.000000e-01 : f32
    %648 = vector.broadcast %cst_166 : f32 to vector<8x96xf32>
    %649 = arith.mulf %648, %647 : vector<8x96xf32>
    %650 = math.tanh %649 : vector<8x96xf32>
    %cst_167 = arith.constant 5.000000e-01 : f32
    %651 = vector.broadcast %cst_167 : f32 to vector<8x96xf32>
    %652 = arith.mulf %651, %650 : vector<8x96xf32>
    %cst_168 = arith.constant 5.000000e-01 : f32
    %653 = vector.broadcast %cst_168 : f32 to vector<8x96xf32>
    %654 = arith.addf %652, %653 : vector<8x96xf32>
    %655 = vector.extract_strided_slice %646 {offsets = [0, 96], sizes = [8, 32], strides = [1, 1]} : vector<8x128xf32> to vector<8x32xf32>
    %656 = math.tanh %655 : vector<8x32xf32>
    %657 = vector.extract_strided_slice %654 {offsets = [0, 32], sizes = [8, 32], strides = [1, 1]} : vector<8x96xf32> to vector<8x32xf32>
    %658 = arith.mulf %657, %606 : vector<8x32xf32>
    %659 = vector.extract_strided_slice %654 {offsets = [0, 0], sizes = [8, 32], strides = [1, 1]} : vector<8x96xf32> to vector<8x32xf32>
    %660 = arith.mulf %659, %656 : vector<8x32xf32>
    %661 = arith.addf %658, %660 : vector<8x32xf32>
    %662 = vector.extract_strided_slice %654 {offsets = [0, 64], sizes = [8, 32], strides = [1, 1]} : vector<8x96xf32> to vector<8x32xf32>
    %663 = math.tanh %661 : vector<8x32xf32>
    %664 = arith.mulf %662, %663 : vector<8x32xf32>
    %665 = arith.index_cast %c11_i32 : i32 to index
    %c0_169 = arith.constant 0 : index
    %c0_170 = arith.constant 0 : index
    %666 = vector.load %arg12[%665, %c0_169, %c0_170] : memref<16x8x32xf32, #tpu.memory_space<vmem>>, vector<1x8x32xf32>
    %667 = vector.shape_cast %666 : vector<1x8x32xf32> to vector<8x32xf32>
    %668 = vector.shape_cast %664 : vector<8x32xf32> to vector<1x8x32xf32>
    tpu.vector_store %arg12[%665, %c0_169, %c0_170], %668 {strides = array<i32>} : memref<16x8x32xf32, #tpu.memory_space<vmem>>, vector<1x8x32xf32>,
    %c12_i32 = arith.constant 12 : i32
    %669 = arith.index_cast %c12_i32 : i32 to index
    %c0_171 = arith.constant 0 : index
    %c0_172 = arith.constant 0 : index
    %670 = vector.load %arg0[%669, %c0_171, %c0_172] : memref<16x8x1xf32, #tpu.memory_space<vmem>>, vector<1x8x1xf32>
    %671 = vector.shape_cast %670 : vector<1x8x1xf32> to vector<8x1xf32>
    %672 = vector.broadcast %671 : vector<8x1xf32> to vector<8x128xf32>
    %673 = vector.broadcast %0 : vector<1x128xf32> to vector<8x128xf32>
    %674 = arith.mulf %672, %673 : vector<8x128xf32>
    %cst_173 = arith.constant dense<0.000000e+00> : vector<8x128xf32>
    %675 = tpu.matmul %664, %4, %cst_173 {dimension_numbers = #tpu.dot_dimension_numbers<[1], [0], [0], [1], [0, 0, 1, 1], [], []>} : vector<8x32xf32>, vector<32x128xf32>, vector<8x128xf32> -> vector<8x128xf32>
    %676 = vector.broadcast %5 : vector<1x128xf32> to vector<8x128xf32>
    %677 = arith.addf %675, %676 : vector<8x128xf32>
    %cst_174 = arith.constant dense<0.000000e+00> : vector<8x128xf32>
    %678 = tpu.matmul %644, %1, %cst_174 {dimension_numbers = #tpu.dot_dimension_numbers<[1], [0], [0], [1], [0, 0, 1, 1], [], []>} : vector<8x32xf32>, vector<32x128xf32>, vector<8x128xf32> -> vector<8x128xf32>
    %679 = arith.addf %674, %678 : vector<8x128xf32>
    %680 = vector.broadcast %2 : vector<1x128xf32> to vector<8x128xf32>
    %681 = arith.addf %679, %680 : vector<8x128xf32>
    %682 = vector.extract_strided_slice %681 {offsets = [0, 0], sizes = [8, 96], strides = [1, 1]} : vector<8x128xf32> to vector<8x96xf32>
    %cst_175 = arith.constant 5.000000e-01 : f32
    %683 = vector.broadcast %cst_175 : f32 to vector<8x96xf32>
    %684 = arith.mulf %683, %682 : vector<8x96xf32>
    %685 = math.tanh %684 : vector<8x96xf32>
    %cst_176 = arith.constant 5.000000e-01 : f32
    %686 = vector.broadcast %cst_176 : f32 to vector<8x96xf32>
    %687 = arith.mulf %686, %685 : vector<8x96xf32>
    %cst_177 = arith.constant 5.000000e-01 : f32
    %688 = vector.broadcast %cst_177 : f32 to vector<8x96xf32>
    %689 = arith.addf %687, %688 : vector<8x96xf32>
    %690 = vector.extract_strided_slice %681 {offsets = [0, 96], sizes = [8, 32], strides = [1, 1]} : vector<8x128xf32> to vector<8x32xf32>
    %691 = math.tanh %690 : vector<8x32xf32>
    %692 = vector.extract_strided_slice %689 {offsets = [0, 32], sizes = [8, 32], strides = [1, 1]} : vector<8x96xf32> to vector<8x32xf32>
    %693 = arith.mulf %692, %641 : vector<8x32xf32>
    %694 = vector.extract_strided_slice %689 {offsets = [0, 0], sizes = [8, 32], strides = [1, 1]} : vector<8x96xf32> to vector<8x32xf32>
    %695 = arith.mulf %694, %691 : vector<8x32xf32>
    %696 = arith.addf %693, %695 : vector<8x32xf32>
    %697 = vector.extract_strided_slice %689 {offsets = [0, 64], sizes = [8, 32], strides = [1, 1]} : vector<8x96xf32> to vector<8x32xf32>
    %698 = math.tanh %696 : vector<8x32xf32>
    %699 = arith.mulf %697, %698 : vector<8x32xf32>
    %cst_178 = arith.constant dense<0.000000e+00> : vector<8x128xf32>
    %700 = tpu.matmul %699, %3, %cst_178 {dimension_numbers = #tpu.dot_dimension_numbers<[1], [0], [0], [1], [0, 0, 1, 1], [], []>} : vector<8x32xf32>, vector<32x128xf32>, vector<8x128xf32> -> vector<8x128xf32>
    %701 = arith.addf %677, %700 : vector<8x128xf32>
    %702 = vector.extract_strided_slice %701 {offsets = [0, 0], sizes = [8, 96], strides = [1, 1]} : vector<8x128xf32> to vector<8x96xf32>
    %cst_179 = arith.constant 5.000000e-01 : f32
    %703 = vector.broadcast %cst_179 : f32 to vector<8x96xf32>
    %704 = arith.mulf %703, %702 : vector<8x96xf32>
    %705 = math.tanh %704 : vector<8x96xf32>
    %cst_180 = arith.constant 5.000000e-01 : f32
    %706 = vector.broadcast %cst_180 : f32 to vector<8x96xf32>
    %707 = arith.mulf %706, %705 : vector<8x96xf32>
    %cst_181 = arith.constant 5.000000e-01 : f32
    %708 = vector.broadcast %cst_181 : f32 to vector<8x96xf32>
    %709 = arith.addf %707, %708 : vector<8x96xf32>
    %710 = vector.extract_strided_slice %701 {offsets = [0, 96], sizes = [8, 32], strides = [1, 1]} : vector<8x128xf32> to vector<8x32xf32>
    %711 = math.tanh %710 : vector<8x32xf32>
    %712 = vector.extract_strided_slice %709 {offsets = [0, 32], sizes = [8, 32], strides = [1, 1]} : vector<8x96xf32> to vector<8x32xf32>
    %713 = arith.mulf %712, %661 : vector<8x32xf32>
    %714 = vector.extract_strided_slice %709 {offsets = [0, 0], sizes = [8, 32], strides = [1, 1]} : vector<8x96xf32> to vector<8x32xf32>
    %715 = arith.mulf %714, %711 : vector<8x32xf32>
    %716 = arith.addf %713, %715 : vector<8x32xf32>
    %717 = vector.extract_strided_slice %709 {offsets = [0, 64], sizes = [8, 32], strides = [1, 1]} : vector<8x96xf32> to vector<8x32xf32>
    %718 = math.tanh %716 : vector<8x32xf32>
    %719 = arith.mulf %717, %718 : vector<8x32xf32>
    %720 = arith.index_cast %c12_i32 : i32 to index
    %c0_182 = arith.constant 0 : index
    %c0_183 = arith.constant 0 : index
    %721 = vector.load %arg12[%720, %c0_182, %c0_183] : memref<16x8x32xf32, #tpu.memory_space<vmem>>, vector<1x8x32xf32>
    %722 = vector.shape_cast %721 : vector<1x8x32xf32> to vector<8x32xf32>
    %723 = vector.shape_cast %719 : vector<8x32xf32> to vector<1x8x32xf32>
    tpu.vector_store %arg12[%720, %c0_182, %c0_183], %723 {strides = array<i32>} : memref<16x8x32xf32, #tpu.memory_space<vmem>>, vector<1x8x32xf32>,
    %c13_i32 = arith.constant 13 : i32
    %724 = arith.index_cast %c13_i32 : i32 to index
    %c0_184 = arith.constant 0 : index
    %c0_185 = arith.constant 0 : index
    %725 = vector.load %arg0[%724, %c0_184, %c0_185] : memref<16x8x1xf32, #tpu.memory_space<vmem>>, vector<1x8x1xf32>
    %726 = vector.shape_cast %725 : vector<1x8x1xf32> to vector<8x1xf32>
    %727 = vector.broadcast %726 : vector<8x1xf32> to vector<8x128xf32>
    %728 = vector.broadcast %0 : vector<1x128xf32> to vector<8x128xf32>
    %729 = arith.mulf %727, %728 : vector<8x128xf32>
    %cst_186 = arith.constant dense<0.000000e+00> : vector<8x128xf32>
    %730 = tpu.matmul %719, %4, %cst_186 {dimension_numbers = #tpu.dot_dimension_numbers<[1], [0], [0], [1], [0, 0, 1, 1], [], []>} : vector<8x32xf32>, vector<32x128xf32>, vector<8x128xf32> -> vector<8x128xf32>
    %731 = vector.broadcast %5 : vector<1x128xf32> to vector<8x128xf32>
    %732 = arith.addf %730, %731 : vector<8x128xf32>
    %cst_187 = arith.constant dense<0.000000e+00> : vector<8x128xf32>
    %733 = tpu.matmul %699, %1, %cst_187 {dimension_numbers = #tpu.dot_dimension_numbers<[1], [0], [0], [1], [0, 0, 1, 1], [], []>} : vector<8x32xf32>, vector<32x128xf32>, vector<8x128xf32> -> vector<8x128xf32>
    %734 = arith.addf %729, %733 : vector<8x128xf32>
    %735 = vector.broadcast %2 : vector<1x128xf32> to vector<8x128xf32>
    %736 = arith.addf %734, %735 : vector<8x128xf32>
    %737 = vector.extract_strided_slice %736 {offsets = [0, 0], sizes = [8, 96], strides = [1, 1]} : vector<8x128xf32> to vector<8x96xf32>
    %cst_188 = arith.constant 5.000000e-01 : f32
    %738 = vector.broadcast %cst_188 : f32 to vector<8x96xf32>
    %739 = arith.mulf %738, %737 : vector<8x96xf32>
    %740 = math.tanh %739 : vector<8x96xf32>
    %cst_189 = arith.constant 5.000000e-01 : f32
    %741 = vector.broadcast %cst_189 : f32 to vector<8x96xf32>
    %742 = arith.mulf %741, %740 : vector<8x96xf32>
    %cst_190 = arith.constant 5.000000e-01 : f32
    %743 = vector.broadcast %cst_190 : f32 to vector<8x96xf32>
    %744 = arith.addf %742, %743 : vector<8x96xf32>
    %745 = vector.extract_strided_slice %736 {offsets = [0, 96], sizes = [8, 32], strides = [1, 1]} : vector<8x128xf32> to vector<8x32xf32>
    %746 = math.tanh %745 : vector<8x32xf32>
    %747 = vector.extract_strided_slice %744 {offsets = [0, 32], sizes = [8, 32], strides = [1, 1]} : vector<8x96xf32> to vector<8x32xf32>
    %748 = arith.mulf %747, %696 : vector<8x32xf32>
    %749 = vector.extract_strided_slice %744 {offsets = [0, 0], sizes = [8, 32], strides = [1, 1]} : vector<8x96xf32> to vector<8x32xf32>
    %750 = arith.mulf %749, %746 : vector<8x32xf32>
    %751 = arith.addf %748, %750 : vector<8x32xf32>
    %752 = vector.extract_strided_slice %744 {offsets = [0, 64], sizes = [8, 32], strides = [1, 1]} : vector<8x96xf32> to vector<8x32xf32>
    %753 = math.tanh %751 : vector<8x32xf32>
    %754 = arith.mulf %752, %753 : vector<8x32xf32>
    %cst_191 = arith.constant dense<0.000000e+00> : vector<8x128xf32>
    %755 = tpu.matmul %754, %3, %cst_191 {dimension_numbers = #tpu.dot_dimension_numbers<[1], [0], [0], [1], [0, 0, 1, 1], [], []>} : vector<8x32xf32>, vector<32x128xf32>, vector<8x128xf32> -> vector<8x128xf32>
    %756 = arith.addf %732, %755 : vector<8x128xf32>
    %757 = vector.extract_strided_slice %756 {offsets = [0, 0], sizes = [8, 96], strides = [1, 1]} : vector<8x128xf32> to vector<8x96xf32>
    %cst_192 = arith.constant 5.000000e-01 : f32
    %758 = vector.broadcast %cst_192 : f32 to vector<8x96xf32>
    %759 = arith.mulf %758, %757 : vector<8x96xf32>
    %760 = math.tanh %759 : vector<8x96xf32>
    %cst_193 = arith.constant 5.000000e-01 : f32
    %761 = vector.broadcast %cst_193 : f32 to vector<8x96xf32>
    %762 = arith.mulf %761, %760 : vector<8x96xf32>
    %cst_194 = arith.constant 5.000000e-01 : f32
    %763 = vector.broadcast %cst_194 : f32 to vector<8x96xf32>
    %764 = arith.addf %762, %763 : vector<8x96xf32>
    %765 = vector.extract_strided_slice %756 {offsets = [0, 96], sizes = [8, 32], strides = [1, 1]} : vector<8x128xf32> to vector<8x32xf32>
    %766 = math.tanh %765 : vector<8x32xf32>
    %767 = vector.extract_strided_slice %764 {offsets = [0, 32], sizes = [8, 32], strides = [1, 1]} : vector<8x96xf32> to vector<8x32xf32>
    %768 = arith.mulf %767, %716 : vector<8x32xf32>
    %769 = vector.extract_strided_slice %764 {offsets = [0, 0], sizes = [8, 32], strides = [1, 1]} : vector<8x96xf32> to vector<8x32xf32>
    %770 = arith.mulf %769, %766 : vector<8x32xf32>
    %771 = arith.addf %768, %770 : vector<8x32xf32>
    %772 = vector.extract_strided_slice %764 {offsets = [0, 64], sizes = [8, 32], strides = [1, 1]} : vector<8x96xf32> to vector<8x32xf32>
    %773 = math.tanh %771 : vector<8x32xf32>
    %774 = arith.mulf %772, %773 : vector<8x32xf32>
    %775 = arith.index_cast %c13_i32 : i32 to index
    %c0_195 = arith.constant 0 : index
    %c0_196 = arith.constant 0 : index
    %776 = vector.load %arg12[%775, %c0_195, %c0_196] : memref<16x8x32xf32, #tpu.memory_space<vmem>>, vector<1x8x32xf32>
    %777 = vector.shape_cast %776 : vector<1x8x32xf32> to vector<8x32xf32>
    %778 = vector.shape_cast %774 : vector<8x32xf32> to vector<1x8x32xf32>
    tpu.vector_store %arg12[%775, %c0_195, %c0_196], %778 {strides = array<i32>} : memref<16x8x32xf32, #tpu.memory_space<vmem>>, vector<1x8x32xf32>,
    %c14_i32 = arith.constant 14 : i32
    %779 = arith.index_cast %c14_i32 : i32 to index
    %c0_197 = arith.constant 0 : index
    %c0_198 = arith.constant 0 : index
    %780 = vector.load %arg0[%779, %c0_197, %c0_198] : memref<16x8x1xf32, #tpu.memory_space<vmem>>, vector<1x8x1xf32>
    %781 = vector.shape_cast %780 : vector<1x8x1xf32> to vector<8x1xf32>
    %782 = vector.broadcast %781 : vector<8x1xf32> to vector<8x128xf32>
    %783 = vector.broadcast %0 : vector<1x128xf32> to vector<8x128xf32>
    %784 = arith.mulf %782, %783 : vector<8x128xf32>
    %cst_199 = arith.constant dense<0.000000e+00> : vector<8x128xf32>
    %785 = tpu.matmul %774, %4, %cst_199 {dimension_numbers = #tpu.dot_dimension_numbers<[1], [0], [0], [1], [0, 0, 1, 1], [], []>} : vector<8x32xf32>, vector<32x128xf32>, vector<8x128xf32> -> vector<8x128xf32>
    %786 = vector.broadcast %5 : vector<1x128xf32> to vector<8x128xf32>
    %787 = arith.addf %785, %786 : vector<8x128xf32>
    %cst_200 = arith.constant dense<0.000000e+00> : vector<8x128xf32>
    %788 = tpu.matmul %754, %1, %cst_200 {dimension_numbers = #tpu.dot_dimension_numbers<[1], [0], [0], [1], [0, 0, 1, 1], [], []>} : vector<8x32xf32>, vector<32x128xf32>, vector<8x128xf32> -> vector<8x128xf32>
    %789 = arith.addf %784, %788 : vector<8x128xf32>
    %790 = vector.broadcast %2 : vector<1x128xf32> to vector<8x128xf32>
    %791 = arith.addf %789, %790 : vector<8x128xf32>
    %792 = vector.extract_strided_slice %791 {offsets = [0, 0], sizes = [8, 96], strides = [1, 1]} : vector<8x128xf32> to vector<8x96xf32>
    %cst_201 = arith.constant 5.000000e-01 : f32
    %793 = vector.broadcast %cst_201 : f32 to vector<8x96xf32>
    %794 = arith.mulf %793, %792 : vector<8x96xf32>
    %795 = math.tanh %794 : vector<8x96xf32>
    %cst_202 = arith.constant 5.000000e-01 : f32
    %796 = vector.broadcast %cst_202 : f32 to vector<8x96xf32>
    %797 = arith.mulf %796, %795 : vector<8x96xf32>
    %cst_203 = arith.constant 5.000000e-01 : f32
    %798 = vector.broadcast %cst_203 : f32 to vector<8x96xf32>
    %799 = arith.addf %797, %798 : vector<8x96xf32>
    %800 = vector.extract_strided_slice %791 {offsets = [0, 96], sizes = [8, 32], strides = [1, 1]} : vector<8x128xf32> to vector<8x32xf32>
    %801 = math.tanh %800 : vector<8x32xf32>
    %802 = vector.extract_strided_slice %799 {offsets = [0, 32], sizes = [8, 32], strides = [1, 1]} : vector<8x96xf32> to vector<8x32xf32>
    %803 = arith.mulf %802, %751 : vector<8x32xf32>
    %804 = vector.extract_strided_slice %799 {offsets = [0, 0], sizes = [8, 32], strides = [1, 1]} : vector<8x96xf32> to vector<8x32xf32>
    %805 = arith.mulf %804, %801 : vector<8x32xf32>
    %806 = arith.addf %803, %805 : vector<8x32xf32>
    %807 = vector.extract_strided_slice %799 {offsets = [0, 64], sizes = [8, 32], strides = [1, 1]} : vector<8x96xf32> to vector<8x32xf32>
    %808 = math.tanh %806 : vector<8x32xf32>
    %809 = arith.mulf %807, %808 : vector<8x32xf32>
    %cst_204 = arith.constant dense<0.000000e+00> : vector<8x128xf32>
    %810 = tpu.matmul %809, %3, %cst_204 {dimension_numbers = #tpu.dot_dimension_numbers<[1], [0], [0], [1], [0, 0, 1, 1], [], []>} : vector<8x32xf32>, vector<32x128xf32>, vector<8x128xf32> -> vector<8x128xf32>
    %811 = arith.addf %787, %810 : vector<8x128xf32>
    %812 = vector.extract_strided_slice %811 {offsets = [0, 0], sizes = [8, 96], strides = [1, 1]} : vector<8x128xf32> to vector<8x96xf32>
    %cst_205 = arith.constant 5.000000e-01 : f32
    %813 = vector.broadcast %cst_205 : f32 to vector<8x96xf32>
    %814 = arith.mulf %813, %812 : vector<8x96xf32>
    %815 = math.tanh %814 : vector<8x96xf32>
    %cst_206 = arith.constant 5.000000e-01 : f32
    %816 = vector.broadcast %cst_206 : f32 to vector<8x96xf32>
    %817 = arith.mulf %816, %815 : vector<8x96xf32>
    %cst_207 = arith.constant 5.000000e-01 : f32
    %818 = vector.broadcast %cst_207 : f32 to vector<8x96xf32>
    %819 = arith.addf %817, %818 : vector<8x96xf32>
    %820 = vector.extract_strided_slice %811 {offsets = [0, 96], sizes = [8, 32], strides = [1, 1]} : vector<8x128xf32> to vector<8x32xf32>
    %821 = math.tanh %820 : vector<8x32xf32>
    %822 = vector.extract_strided_slice %819 {offsets = [0, 32], sizes = [8, 32], strides = [1, 1]} : vector<8x96xf32> to vector<8x32xf32>
    %823 = arith.mulf %822, %771 : vector<8x32xf32>
    %824 = vector.extract_strided_slice %819 {offsets = [0, 0], sizes = [8, 32], strides = [1, 1]} : vector<8x96xf32> to vector<8x32xf32>
    %825 = arith.mulf %824, %821 : vector<8x32xf32>
    %826 = arith.addf %823, %825 : vector<8x32xf32>
    %827 = vector.extract_strided_slice %819 {offsets = [0, 64], sizes = [8, 32], strides = [1, 1]} : vector<8x96xf32> to vector<8x32xf32>
    %828 = math.tanh %826 : vector<8x32xf32>
    %829 = arith.mulf %827, %828 : vector<8x32xf32>
    %830 = arith.index_cast %c14_i32 : i32 to index
    %c0_208 = arith.constant 0 : index
    %c0_209 = arith.constant 0 : index
    %831 = vector.load %arg12[%830, %c0_208, %c0_209] : memref<16x8x32xf32, #tpu.memory_space<vmem>>, vector<1x8x32xf32>
    %832 = vector.shape_cast %831 : vector<1x8x32xf32> to vector<8x32xf32>
    %833 = vector.shape_cast %829 : vector<8x32xf32> to vector<1x8x32xf32>
    tpu.vector_store %arg12[%830, %c0_208, %c0_209], %833 {strides = array<i32>} : memref<16x8x32xf32, #tpu.memory_space<vmem>>, vector<1x8x32xf32>,
    %c15_i32 = arith.constant 15 : i32
    %834 = arith.index_cast %c15_i32 : i32 to index
    %c0_210 = arith.constant 0 : index
    %c0_211 = arith.constant 0 : index
    %835 = vector.load %arg0[%834, %c0_210, %c0_211] : memref<16x8x1xf32, #tpu.memory_space<vmem>>, vector<1x8x1xf32>
    %836 = vector.shape_cast %835 : vector<1x8x1xf32> to vector<8x1xf32>
    %837 = vector.broadcast %836 : vector<8x1xf32> to vector<8x128xf32>
    %838 = vector.broadcast %0 : vector<1x128xf32> to vector<8x128xf32>
    %839 = arith.mulf %837, %838 : vector<8x128xf32>
    %cst_212 = arith.constant dense<0.000000e+00> : vector<8x128xf32>
    %840 = tpu.matmul %829, %4, %cst_212 {dimension_numbers = #tpu.dot_dimension_numbers<[1], [0], [0], [1], [0, 0, 1, 1], [], []>} : vector<8x32xf32>, vector<32x128xf32>, vector<8x128xf32> -> vector<8x128xf32>
    %841 = vector.broadcast %5 : vector<1x128xf32> to vector<8x128xf32>
    %842 = arith.addf %840, %841 : vector<8x128xf32>
    %cst_213 = arith.constant dense<0.000000e+00> : vector<8x128xf32>
    %843 = tpu.matmul %809, %1, %cst_213 {dimension_numbers = #tpu.dot_dimension_numbers<[1], [0], [0], [1], [0, 0, 1, 1], [], []>} : vector<8x32xf32>, vector<32x128xf32>, vector<8x128xf32> -> vector<8x128xf32>
    %844 = arith.addf %839, %843 : vector<8x128xf32>
    %845 = vector.broadcast %2 : vector<1x128xf32> to vector<8x128xf32>
    %846 = arith.addf %844, %845 : vector<8x128xf32>
    %847 = vector.extract_strided_slice %846 {offsets = [0, 0], sizes = [8, 96], strides = [1, 1]} : vector<8x128xf32> to vector<8x96xf32>
    %cst_214 = arith.constant 5.000000e-01 : f32
    %848 = vector.broadcast %cst_214 : f32 to vector<8x96xf32>
    %849 = arith.mulf %848, %847 : vector<8x96xf32>
    %850 = math.tanh %849 : vector<8x96xf32>
    %cst_215 = arith.constant 5.000000e-01 : f32
    %851 = vector.broadcast %cst_215 : f32 to vector<8x96xf32>
    %852 = arith.mulf %851, %850 : vector<8x96xf32>
    %cst_216 = arith.constant 5.000000e-01 : f32
    %853 = vector.broadcast %cst_216 : f32 to vector<8x96xf32>
    %854 = arith.addf %852, %853 : vector<8x96xf32>
    %855 = vector.extract_strided_slice %846 {offsets = [0, 96], sizes = [8, 32], strides = [1, 1]} : vector<8x128xf32> to vector<8x32xf32>
    %856 = math.tanh %855 : vector<8x32xf32>
    %857 = vector.extract_strided_slice %854 {offsets = [0, 32], sizes = [8, 32], strides = [1, 1]} : vector<8x96xf32> to vector<8x32xf32>
    %858 = arith.mulf %857, %806 : vector<8x32xf32>
    %859 = vector.extract_strided_slice %854 {offsets = [0, 0], sizes = [8, 32], strides = [1, 1]} : vector<8x96xf32> to vector<8x32xf32>
    %860 = arith.mulf %859, %856 : vector<8x32xf32>
    %861 = arith.addf %858, %860 : vector<8x32xf32>
    %862 = vector.extract_strided_slice %854 {offsets = [0, 64], sizes = [8, 32], strides = [1, 1]} : vector<8x96xf32> to vector<8x32xf32>
    %863 = math.tanh %861 : vector<8x32xf32>
    %864 = arith.mulf %862, %863 : vector<8x32xf32>
    %cst_217 = arith.constant dense<0.000000e+00> : vector<8x128xf32>
    %865 = tpu.matmul %864, %3, %cst_217 {dimension_numbers = #tpu.dot_dimension_numbers<[1], [0], [0], [1], [0, 0, 1, 1], [], []>} : vector<8x32xf32>, vector<32x128xf32>, vector<8x128xf32> -> vector<8x128xf32>
    %866 = arith.addf %842, %865 : vector<8x128xf32>
    %867 = vector.extract_strided_slice %866 {offsets = [0, 0], sizes = [8, 96], strides = [1, 1]} : vector<8x128xf32> to vector<8x96xf32>
    %cst_218 = arith.constant 5.000000e-01 : f32
    %868 = vector.broadcast %cst_218 : f32 to vector<8x96xf32>
    %869 = arith.mulf %868, %867 : vector<8x96xf32>
    %870 = math.tanh %869 : vector<8x96xf32>
    %cst_219 = arith.constant 5.000000e-01 : f32
    %871 = vector.broadcast %cst_219 : f32 to vector<8x96xf32>
    %872 = arith.mulf %871, %870 : vector<8x96xf32>
    %cst_220 = arith.constant 5.000000e-01 : f32
    %873 = vector.broadcast %cst_220 : f32 to vector<8x96xf32>
    %874 = arith.addf %872, %873 : vector<8x96xf32>
    %875 = vector.extract_strided_slice %866 {offsets = [0, 96], sizes = [8, 32], strides = [1, 1]} : vector<8x128xf32> to vector<8x32xf32>
    %876 = math.tanh %875 : vector<8x32xf32>
    %877 = vector.extract_strided_slice %874 {offsets = [0, 32], sizes = [8, 32], strides = [1, 1]} : vector<8x96xf32> to vector<8x32xf32>
    %878 = arith.mulf %877, %826 : vector<8x32xf32>
    %879 = vector.extract_strided_slice %874 {offsets = [0, 0], sizes = [8, 32], strides = [1, 1]} : vector<8x96xf32> to vector<8x32xf32>
    %880 = arith.mulf %879, %876 : vector<8x32xf32>
    %881 = arith.addf %878, %880 : vector<8x32xf32>
    %882 = vector.extract_strided_slice %874 {offsets = [0, 64], sizes = [8, 32], strides = [1, 1]} : vector<8x96xf32> to vector<8x32xf32>
    %883 = math.tanh %881 : vector<8x32xf32>
    %884 = arith.mulf %882, %883 : vector<8x32xf32>
    %885 = arith.index_cast %c15_i32 : i32 to index
    %c0_221 = arith.constant 0 : index
    %c0_222 = arith.constant 0 : index
    %886 = vector.load %arg12[%885, %c0_221, %c0_222] : memref<16x8x32xf32, #tpu.memory_space<vmem>>, vector<1x8x32xf32>
    %887 = vector.shape_cast %886 : vector<1x8x32xf32> to vector<8x32xf32>
    %888 = vector.shape_cast %884 : vector<8x32xf32> to vector<1x8x32xf32>
    tpu.vector_store %arg12[%885, %c0_221, %c0_222], %888 {strides = array<i32>} : memref<16x8x32xf32, #tpu.memory_space<vmem>>, vector<1x8x32xf32>,
    %c16_i32 = arith.constant 16 : i32
    %c0_223 = arith.constant 0 : index
    %c0_224 = arith.constant 0 : index
    %c0_225 = arith.constant 0 : index
    %889 = vector.load %arg12[%c0_223, %c0_224, %c0_225] : memref<16x8x32xf32, #tpu.memory_space<vmem>>, vector<16x8x32xf32>
    %890 = vector.shape_cast %6 : vector<1x32xf32> to vector<1x1x32xf32>
    %891 = vector.broadcast %890 : vector<1x1x32xf32> to vector<16x8x32xf32>
    %892 = arith.mulf %889, %891 : vector<16x8x32xf32>
    %cst_226 = arith.constant dense<0.000000e+00> : vector<16x8xf32>
    %893 = vector.multi_reduction <add>, %892, %cst_226 [2] : vector<16x8x32xf32> to vector<16x8xf32>
    %894 = vector.broadcast %7 : vector<1x1xf32> to vector<16x8xf32>
    %895 = arith.addf %893, %894 : vector<16x8xf32>
    %c0_227 = arith.constant 0 : index
    %c0_228 = arith.constant 0 : index
    %896 = vector.load %arg11[%c0_227, %c0_228] : memref<16x8xf32, #tpu.memory_space<vmem>>, vector<16x8xf32>
    tpu.vector_store %arg11[%c0_227, %c0_228], %895 {strides = array<i32>} : memref<16x8xf32, #tpu.memory_space<vmem>>, vector<16x8xf32>,
    return
  }
}

</mosaic_0001>

<bundles_post_ra>
// kernel: tpu_custom_call.1
= control target key start
LH: loop header
LB: loop body
LE: loop exit
PB: predicated region body
PF: predicated region fallthrough
CT: control target
= control target key end

     0   :  { %v5809_v0 = vmov 0.0   ;;  %vm5810_vm0 = vmmov 0   ;;  %v5811_v3 = vmov 0   ;;  %s5812_s29 = smov 32   ;;  %s5813_s27 = smov 64   ;;  %vm76_vm1 = vcmask 261120   ;;  %s7063_s2 = inlined_call_operand.vmem [shape: f32[32,128], index: 2, kind: input, shape index: {}]   ;;  %s7064_s0 = inlined_call_operand.vmem [shape: f32[16,8,1], index: 0, kind: input, shape index: {}]   ;;  %s7065_s7 = inlined_call_operand.vmem [shape: f32[32,128], index: 7, kind: input, shape index: {}]   ;;  %s7066_s8 = inlined_call_operand.vmem [shape: f32[1,128], index: 8, kind: input, shape index: {}]   ;;  %s7067_s1 = inlined_call_operand.vmem [shape: f32[1,128], index: 1, kind: input, shape index: {}]   ;;  %s7068_s3 = inlined_call_operand.vmem [shape: f32[1,128], index: 3, kind: input, shape index: {}]   ;;  %s7069_s5 = inlined_call_operand.vmem [shape: f32[32,128], index: 5, kind: input, shape index: {}]   ;;  %s7070_s4 = inlined_call_operand.vmem [shape: f32[32,128], index: 4, kind: input, shape index: {}]   ;;  %s7071_s6 = inlined_call_operand.vmem [shape: f32[1,128], index: 6, kind: input, shape index: {}]   ;;  %s7072_s9 = inlined_call_operand.vmem [shape: f32[1,32], index: 9, kind: input, shape index: {}]   ;;  %s7073_s10 = inlined_call_operand.<no memory space> [shape: f32[1,1], index: 10, kind: input, shape index: {}]   ;;  %s7074_s11 = inlined_call_operand.vmem [shape: f32[16,8], index: 11, kind: output, shape index: {}]  }
   0x1   :  { %5063 = vmatprep.subr.mxu1 %v5809_v0  ;;  %v5878_v1 = vld [vmem:[%s7063_s2 + $0x18] sm:$0xff]  ;;  %v5883_v2 = vld [vmem:[%s7063_s2 + $0x10] sm:$0xff]  ;;  %5071 = vmatprep.mubr.msk.f32.mxu1 %vm5810_vm0, %v5809_v0  ;;  %v57_v4 = vld [vmem:[%s7064_s0] sm:$0xff]  ;;  %vm4716_vm2 = vcmask 1041409   ;;  %vm4718_vm3 = vcmask 1042434   ;;  %vm4720_vm4 = vcmask 1043459  }
   0x2   :  { %5064 = vmatpush3.msra.mxu1 %v5878_v1  ;;  %5585 = vset.pattern.permute.xlu0 %v5811_v3  ;;  %v5895_v5 = vld [vmem:[%s7063_s2 + $0x8] sm:$0xff]  ;;  %v5903_v6 = vld [vmem:[%s7063_s2] sm:$0xff]  ;;  %v5934_v25 = vld [vmem:[%s7069_s5 + $0x18] sm:$0xff]  ;;  %vm4722_vm5 = vcmask 1044484   ;;  %vm4724_vm6 = vcmask 1045509   ;;  %vm4726_vm7 = vcmask 1046534  }
   0x3   :  { %5065 = vmatprep.subr.mxu1 %v5809_v0  ;;  %60 = vperm.xlu0 %5585, %v57_v4   ;;  %v5917_v7 = vld [vmem:[%s7067_s1] ss:$0 sm:$0xff]  ;;  %v5939_v26 = vld [vmem:[%s7069_s5 + $0x10] sm:$0xff]  ;;  %v5947_v27 = vld [vmem:[%s7069_s5 + $0x8] sm:$0xff]  ;;  %vm4728_vm8 = vcmask 1047559   ;;  %vm4739_vm9 = vcmask 64512  }
   0x4   :  { %5066 = vmatpush3.msra.mxu1 %v5883_v2  ;;  %5052 = vmatprep.subr.mxu0 %v5809_v0  ;;  %v5923_v10 = vld [vmem:[%s7068_s3] ss:$0 sm:$0xff]  ;;  %v5965_v29 = vld [vmem:[%s7070_s4 + $0x18] sm:$0xff]  ;;  %v5975_v30 = vld [vmem:[%s7070_s4 + $0x10] sm:$0xff] }
   0x5   :  { %5067 = vmatprep.subr.mxu1 %v5809_v0  ;;  %5060 = vmatprep.mubr.msk.f32.mxu0 %vm5810_vm0, %v5809_v0  ;;  %v5956_v28 = vld [vmem:[%s7069_s5] sm:$0xff]  ;;  %v5985_v32 = vld [vmem:[%s7070_s4 + $0x8] sm:$0xff] }
   0x6   :  { %5068 = vmatpush3.msra.mxu1 %v5895_v5  ;;  %5586 = vset.pattern.permute.xlu1 %v5811_v3  ;;  %v5993_v33 = vld [vmem:[%s7070_s4] sm:$0xff]  ;;  %v4750_v34 = vld [vmem:[%s7064_s0 + $0x8] sm:$0xff] }
   0x7   :  { %5069 = vmatprep.subr.mxu1 %v5809_v0  ;;  %5053 = vmatpush3.msra.mxu0 %v5934_v25  ;;  %v6028_v40 = vld [vmem:[%s7071_s6] ss:$0 sm:$0xff] }
   0x8   :  { %5070 = vmatpush3.msra.mxu1 %v5903_v6  ;;  %5054 = vmatprep.subr.mxu0 %v5809_v0 }
   0x9   :  { %5072 = vmatmul.mubr.f32.vlgmr.msra.gmra.mxu1 %v5809_v0  ;;  %5085 = vmatprep.subr.mxu1 %v5809_v0 }
   0xa   :  { %5093 = vmatprep.mubr.msk.f32.mxu1 %vm5810_vm0, %v5809_v0  ;;  %5086 = vmatpush3.msra.mxu1 %v5934_v25 }
   0xb   :  { %5087 = vmatprep.subr.mxu1 %v5809_v0  ;;  %5055 = vmatpush3.msra.mxu0 %v5939_v26 }
   0xc   :  { %5088 = vmatpush3.msra.mxu1 %v5939_v26  ;;  %5056 = vmatprep.subr.mxu0 %v5809_v0 }
   0xd   :  { %5089 = vmatprep.subr.mxu1 %v5809_v0  ;;  %5057 = vmatpush3.msra.mxu0 %v5947_v27 }
   0xe   :  { %5090 = vmatpush3.msra.mxu1 %v5947_v27  ;;  %5058 = vmatprep.subr.mxu0 %v5809_v0 }
   0xf   :  { %5091 = vmatprep.subr.mxu1 %v5809_v0  ;;  %5059 = vmatpush3.msra.mxu0 %v5956_v28 }
  0x10   :  { %5092 = vmatpush3.msra.mxu1 %v5956_v28  ;;  %5061 = vmatmul.mubr.f32.vlgmr.msra.gmra.mxu0 %v5809_v0 }
  0x11   :  { %5074 = vmatprep.subr.mxu0 %v5809_v0  ;;  %5082 = vmatprep.mubr.msk.f32.mxu0 %vm5810_vm0, %v5809_v0 }
  0x12   :  { %5075 = vmatpush3.msra.mxu0 %v5965_v29  ;;  %5107 = vmatprep.subr.mxu1 %v5809_v0 }
  0x13   :  { %5076 = vmatprep.subr.mxu0 %v5809_v0 }
  0x14   :  { %5077 = vmatpush3.msra.mxu0 %v5975_v30 }
  0x15   :  { %5078 = vmatprep.subr.mxu0 %v5809_v0 }
  0x16   :  { %5079 = vmatpush3.msra.mxu0 %v5985_v32 }
  0x17   :  { %5080 = vmatprep.subr.mxu0 %v5809_v0 }
  0x18   :  { %5081 = vmatpush3.msra.mxu0 %v5993_v33 }
  0x19   :  { %5096 = vmatprep.subr.mxu0 %v5809_v0 }
  0x7e   :  { %v61_v8 = vpop.permute.xlu0 %60 }
  0x7f   :  { %v69_v9 = vmul.f32 %v5917_v7, %v61_v8 }
  0xc9   :  { %v216_v11 = vpop.f32.mrf.mxu1 }
  0xca   :  { %v220_v12 = vadd.f32 %v216_v11, %v69_v9 }
  0xcb   :  { %v5073_v13 = vpop.f32.mrf.mxu1 }
  0xcc   :  { %v227_v14 = vadd.f32 %v5923_v10, %v220_v12 }
  0xce   :  { %5587 = vtanh.f32 %v227_v14  ;;  %v228_v16 = vmul.f32 0.5, %v227_v14 }
  0xd0   :  { %5589 = vtanh.f32 %v228_v16  ;;  %v146_v37 = vpop.f32.mrf.mxu0 }
  0xd1   :  { %v147_v41 = vadd.f32 %v6028_v40, %v146_v37 }
  0xd2   :  { %v5062_v38 = vpop.f32.mrf.mxu0 }
  0xdb   :  { %v5588_v15 = vpop.eup %5587 }
  0xdc   :  { %235 = vrot.lane.b32.xlu0 %v5588_v15, %s5812_s29 }
  0xdd   :  { %v5590_v17 = vpop.eup %5589 }
  0xde   :  { %v230_v18 = vmul.f32 0.5, %v5590_v17 }
  0xe0   :  { %v231_v19 = vadd.f32 0.5, %v230_v18  ;;  %v4754_v18 = vld [vmem:[%s7064_s0 + $0x10] sm:$0xff] }
  0xe2   :  { %v233_v22 = vmul.f32 0.0, %v231_v19 }
 0x14e   :  { %v236_v20 = vpop.permute.xlu0 %235 }
 0x14f   :  { %v238_v21 = vmul.f32 %v236_v20, %v231_v19 }
 0x151   :  { %240 = vrot.lane.b32.xlu1 %v238_v21, %s5812_s29 }
 0x1c3   :  { %v241_v23 = vpop.permute.xlu1 %240 }
 0x1c4   :  { %v5928_v24 = vadd.f32 %v241_v23, %v233_v22 }
 0x1c6   :  { %5591 = vtanh.f32 %v5928_v24 }
 0x1d3   :  { %v5592_v31 = vpop.eup %5591 }
 0x1d4   :  { %246 = vrot.lane.b32.xlu1 %v5592_v31, %s5812_s29 }
 0x1d8   :  { %357 = vperm.xlu1 %5586, %v4750_v34  }
 0x246   :  { %v247_v35 = vpop.permute.xlu1 %246 }
 0x247   :  { %v249_v36 = vmul.f32 %v247_v35, %v231_v19 }
 0x249   :  { %251 = vrot.lane.b32.xlu0 %v249_v36, %s5813_s27 }
 0x253   :  { %v358_v45 = vpop.permute.xlu1 %357 }
 0x254   :  { %v360_v46 = vmul.f32 %v5917_v7, %v358_v45 }
 0x2bb   :  { %v252_v39 = vpop.permute.xlu0 %251 }
 0x2bc   :  { %5083 = vmatmul.mubr.msk.f32.vlgmr.msra.gmra.mxu0 %vm76_vm1, %v252_v39 }
 0x2bd   :  { %5097 = vmatpush3.msra.mxu0 %v5878_v1  ;;  %5104 = vmatprep.mubr.msk.f32.mxu0 %vm5810_vm0, %v5809_v0 }
 0x2be   :  { %5098 = vmatprep.subr.mxu0 %v5809_v0 }
 0x2bf   :  { %5099 = vmatpush3.msra.mxu0 %v5883_v2 }
 0x2c0   :  { %5100 = vmatprep.subr.mxu0 %v5809_v0 }
 0x2c1   :  { %5101 = vmatpush3.msra.mxu0 %v5895_v5 }
 0x2c2   :  { %5102 = vmatprep.subr.mxu0 %v5809_v0 }
 0x2c3   :  { %5103 = vmatpush3.msra.mxu0 %v5903_v6 }
 0x2c4   :  { %5105 = vmatmul.mubr.msk.f32.vlgmr.msra.gmra.mxu0 %vm76_vm1, %v252_v39  ;;  %5118 = vmatprep.subr.mxu0 %v5809_v0 }
 0x2c5   :  { %5119 = vmatpush3.msra.mxu0 %v5934_v25  ;;  %5126 = vmatprep.mubr.msk.f32.mxu0 %vm5810_vm0, %v5809_v0 }
 0x2c6   :  { %5120 = vmatprep.subr.mxu0 %v5809_v0 }
 0x2c7   :  { %5121 = vmatpush3.msra.mxu0 %v5939_v26 }
 0x2c8   :  { %5122 = vmatprep.subr.mxu0 %v5809_v0 }
 0x2c9   :  { %5123 = vmatpush3.msra.mxu0 %v5947_v27 }
 0x2ca   :  { %5124 = vmatprep.subr.mxu0 %v5809_v0 }
 0x2cb   :  { %5125 = vmatpush3.msra.mxu0 %v5956_v28 }
 0x2cc   :  { %5140 = vmatprep.subr.mxu0 %v5809_v0 }
 0x37c   :  { %v321_v42 = vpop.f32.mrf.mxu0 }
 0x37d   :  { %v325_v43 = vadd.f32 %v321_v42, %v147_v41 }
 0x37e   :  { %v5084_v44 = vpop.f32.mrf.mxu0 }
 0x37f   :  { %5593 = vtanh.f32 %v325_v43  ;;  %v326_v53 = vmul.f32 0.5, %v325_v43 }
 0x384   :  { %v499_v47 = vpop.f32.mrf.mxu0 }
 0x385   :  { %v503_v48 = vadd.f32 %v499_v47, %v360_v46 }
 0x386   :  { %v5106_v49 = vpop.f32.mrf.mxu0 }
 0x387   :  { %v504_v50 = vadd.f32 %v5923_v10, %v503_v48 }
 0x389   :  { %5595 = vtanh.f32 %v504_v50  ;;  %v505_v54 = vmul.f32 0.5, %v504_v50 }
 0x38a   :  { %5597 = vtanh.f32 %v326_v53 }
 0x38b   :  { %5599 = vtanh.f32 %v505_v54 }
 0x38c   :  { %v5594_v51 = vpop.eup %5593 }
 0x38d   :  { %333 = vrot.lane.b32.xlu0 %v5594_v51, %s5812_s29 }
 0x396   :  { %v5596_v52 = vpop.eup %5595 }
 0x397   :  { %512 = vrot.lane.b32.xlu1 %v5596_v52, %s5812_s29  ;;  %v5598_v55 = vpop.eup %5597 }
 0x398   :  { %v328_v56 = vmul.f32 0.5, %v5598_v55  ;;  %v5600_v60 = vpop.eup %5599 }
 0x399   :  { %v507_v61 = vmul.f32 0.5, %v5600_v60 }
 0x39a   :  { %v329_v57 = vadd.f32 0.5, %v328_v56 }
 0x39b   :  { %v508_v62 = vadd.f32 0.5, %v507_v61 }
 0x39c   :  { %v331_v4 = vmul.f32 0.0, %v329_v57 }
 0x39d   :  { %v510_v11 = vmul.f32 %v508_v62, %v5928_v24 }
 0x3ff   :  { %v334_v58 = vpop.permute.xlu0 %333 }
 0x400   :  { %v336_v59 = vmul.f32 %v334_v58, %v329_v57 }
 0x402   :  { %338 = vrot.lane.b32.xlu0 %v336_v59, %s5812_s29 }
 0x409   :  { %v513_v63 = vpop.permute.xlu1 %512 }
 0x40a   :  { %v515_v3 = vmul.f32 %v513_v63, %v508_v62 }
 0x40c   :  { %517 = vrot.lane.b32.xlu1 %v515_v3, %s5812_s29 }
 0x474   :  { %v339_v8 = vpop.permute.xlu0 %338 }
 0x475   :  { %v6037_v9 = vadd.f32 %v339_v8, %v331_v4 }
 0x477   :  { %5601 = vtanh.f32 %v6037_v9 }
 0x47e   :  { %v518_v12 = vpop.permute.xlu1 %517 }
 0x47f   :  { %v6041_v13 = vadd.f32 %v518_v12, %v510_v11  ;;  %v4758_v11 = vld [vmem:[%s7064_s0 + $0x18] sm:$0xff] }
 0x481   :  { %5603 = vtanh.f32 %v6041_v13 }
 0x484   :  { %v5602_v14 = vpop.eup %5601 }
 0x485   :  { %344 = vrot.lane.b32.xlu0 %v5602_v14, %s5812_s29 }
 0x48e   :  { %v5604_v15 = vpop.eup %5603 }
 0x48f   :  { %523 = vrot.lane.b32.xlu1 %v5604_v15, %s5812_s29 }
 0x4f7   :  { %v345_v16 = vpop.permute.xlu0 %344 }
 0x4f8   :  { %v347_v17 = vmul.f32 %v345_v16, %v329_v57 }
 0x4fa   :  { %349 = vrot.lane.b32.xlu0 %v347_v17, %s5813_s27 }
 0x4fe   :  { %635 = vperm.xlu0 %5585, %v4754_v18  }
 0x501   :  { %v524_v19 = vpop.permute.xlu1 %523 }
 0x502   :  { %v526_v20 = vmul.f32 %v524_v19, %v508_v62 }
 0x504   :  { %528 = vrot.lane.b32.xlu1 %v526_v20, %s5813_s27 }
 0x56c   :  { %v350_v21 = vpop.permute.xlu0 %349 }
 0x56d   :  { %352 = vst.msk [vmem:[#allocation2] sm:$0xff] %vm76_vm1, %v350_v21  ;;  %5094 = vmatmul.mubr.msk.f32.vlgmr.msra.gmra.mxu1 %vm76_vm1, %v350_v21 }
 0x56e   :  { %5108 = vmatpush3.msra.mxu1 %v5965_v29  ;;  %5115 = vmatprep.mubr.msk.f32.mxu1 %vm5810_vm0, %v5809_v0 }
 0x56f   :  { %5109 = vmatprep.subr.mxu1 %v5809_v0 }
 0x570   :  { %5110 = vmatpush3.msra.mxu1 %v5975_v30 }
 0x571   :  { %5111 = vmatprep.subr.mxu1 %v5809_v0 }
 0x572   :  { %5112 = vmatpush3.msra.mxu1 %v5985_v32 }
 0x573   :  { %5113 = vmatprep.subr.mxu1 %v5809_v0 }
 0x574   :  { %5114 = vmatpush3.msra.mxu1 %v5993_v33 }
 0x575   :  { %5129 = vmatprep.subr.mxu1 %v5809_v0 }
 0x576   :  { %v529_v22 = vpop.permute.xlu1 %528 }
 0x577   :  { %5116 = vmatmul.mubr.msk.f32.vlgmr.msra.gmra.mxu1 %vm76_vm1, %v529_v22 }
 0x578   :  { %5130 = vmatpush3.msra.mxu1 %v5878_v1  ;;  %5137 = vmatprep.mubr.msk.f32.mxu1 %vm5810_vm0, %v5809_v0 }
 0x579   :  { %5131 = vmatprep.subr.mxu1 %v5809_v0  ;;  %v636_v37 = vpop.permute.xlu0 %635 }
 0x57a   :  { %5132 = vmatpush3.msra.mxu1 %v5883_v2  ;;  %v638_v38 = vmul.f32 %v5917_v7, %v636_v37 }
 0x57b   :  { %5133 = vmatprep.subr.mxu1 %v5809_v0 }
 0x57c   :  { %5134 = vmatpush3.msra.mxu1 %v5895_v5 }
 0x57d   :  { %5135 = vmatprep.subr.mxu1 %v5809_v0 }
 0x57e   :  { %5136 = vmatpush3.msra.mxu1 %v5903_v6 }
 0x57f   :  { %5138 = vmatmul.mubr.msk.f32.vlgmr.msra.gmra.mxu1 %vm76_vm1, %v529_v22  ;;  %5151 = vmatprep.subr.mxu1 %v5809_v0 }
 0x580   :  { %5152 = vmatpush3.msra.mxu1 %v5934_v25  ;;  %5159 = vmatprep.mubr.msk.f32.mxu1 %vm5810_vm0, %v5809_v0 }
 0x581   :  { %5153 = vmatprep.subr.mxu1 %v5809_v0 }
 0x582   :  { %5154 = vmatpush3.msra.mxu1 %v5939_v26 }
 0x583   :  { %5155 = vmatprep.subr.mxu1 %v5809_v0 }
 0x584   :  { %5156 = vmatpush3.msra.mxu1 %v5947_v27 }
 0x585   :  { %5157 = vmatprep.subr.mxu1 %v5809_v0 }
 0x586   :  { %5158 = vmatpush3.msra.mxu1 %v5956_v28 }
 0x587   :  { %5173 = vmatprep.subr.mxu1 %v5809_v0 }
 0x62d   :  { %v429_v23 = vpop.f32.mrf.mxu1 }
 0x62e   :  { %v430_v31 = vadd.f32 %v6028_v40, %v429_v23 }
 0x62f   :  { %v5095_v24 = vpop.f32.mrf.mxu1 }
 0x637   :  { %v598_v34 = vpop.f32.mrf.mxu1 }
 0x638   :  { %v602_v35 = vadd.f32 %v598_v34, %v430_v31 }
 0x639   :  { %v5117_v36 = vpop.f32.mrf.mxu1 }
 0x63a   :  { %5605 = vtanh.f32 %v602_v35  ;;  %v603_v46 = vmul.f32 0.5, %v602_v35 }
 0x63f   :  { %v777_v39 = vpop.f32.mrf.mxu1 }
 0x640   :  { %v781_v41 = vadd.f32 %v777_v39, %v638_v38 }
 0x641   :  { %v5139_v42 = vpop.f32.mrf.mxu1 }
 0x642   :  { %v782_v43 = vadd.f32 %v5923_v10, %v781_v41 }
 0x644   :  { %5607 = vtanh.f32 %v782_v43  ;;  %v783_v47 = vmul.f32 0.5, %v782_v43 }
 0x645   :  { %5609 = vtanh.f32 %v603_v46 }
 0x646   :  { %5611 = vtanh.f32 %v783_v47 }
 0x647   :  { %v5606_v44 = vpop.eup %5605 }
 0x648   :  { %610 = vrot.lane.b32.xlu1 %v5606_v44, %s5812_s29 }
 0x651   :  { %v5608_v45 = vpop.eup %5607 }
 0x652   :  { %790 = vrot.lane.b32.xlu0 %v5608_v45, %s5812_s29  ;;  %v5610_v48 = vpop.eup %5609 }
 0x653   :  { %v605_v49 = vmul.f32 0.5, %v5610_v48  ;;  %v5612_v53 = vpop.eup %5611 }
 0x654   :  { %v785_v54 = vmul.f32 0.5, %v5612_v53 }
 0x655   :  { %v606_v50 = vadd.f32 0.5, %v605_v49 }
 0x656   :  { %v786_v55 = vadd.f32 0.5, %v785_v54 }
 0x657   :  { %v608_v58 = vmul.f32 %v606_v50, %v6037_v9 }
 0x658   :  { %v788_v61 = vmul.f32 %v786_v55, %v6041_v13 }
 0x6ba   :  { %v611_v51 = vpop.permute.xlu1 %610 }
 0x6bb   :  { %v613_v52 = vmul.f32 %v611_v51, %v606_v50 }
 0x6bd   :  { %615 = vrot.lane.b32.xlu1 %v613_v52, %s5812_s29 }
 0x6c4   :  { %v791_v56 = vpop.permute.xlu0 %790 }
 0x6c5   :  { %v793_v57 = vmul.f32 %v791_v56, %v786_v55 }
 0x6c7   :  { %795 = vrot.lane.b32.xlu0 %v793_v57, %s5812_s29 }
 0x72f   :  { %v616_v59 = vpop.permute.xlu1 %615 }
 0x730   :  { %v6093_v60 = vadd.f32 %v616_v59, %v608_v58 }
 0x732   :  { %5613 = vtanh.f32 %v6093_v60 }
 0x739   :  { %v796_v62 = vpop.permute.xlu0 %795 }
 0x73a   :  { %v6097_v63 = vadd.f32 %v796_v62, %v788_v61  ;;  %v4762_v61 = vld [vmem:[%s7064_s0 + $0x20] sm:$0xff] }
 0x73c   :  { %5615 = vtanh.f32 %v6097_v63 }
 0x73f   :  { %v5614_v3 = vpop.eup %5613 }
 0x740   :  { %621 = vrot.lane.b32.xlu1 %v5614_v3, %s5812_s29 }
 0x749   :  { %v5616_v4 = vpop.eup %5615 }
 0x74a   :  { %801 = vrot.lane.b32.xlu0 %v5616_v4, %s5812_s29 }
 0x7b2   :  { %v622_v8 = vpop.permute.xlu1 %621 }
 0x7b3   :  { %v624_v9 = vmul.f32 %v622_v8, %v606_v50 }
 0x7b5   :  { %626 = vrot.lane.b32.xlu1 %v624_v9, %s5813_s27 }
 0x7b9   :  { %913 = vperm.xlu1 %5586, %v4758_v11  }
 0x7bc   :  { %v802_v12 = vpop.permute.xlu0 %801 }
 0x7bd   :  { %v804_v13 = vmul.f32 %v802_v12, %v786_v55 }
 0x7bf   :  { %806 = vrot.lane.b32.xlu0 %v804_v13, %s5813_s27 }
 0x827   :  { %v627_v14 = vpop.permute.xlu1 %626 }
 0x828   :  { %630 = vst.msk [vmem:[#allocation2 + $0x8] sm:$0xff] %vm76_vm1, %v627_v14  ;;  %5127 = vmatmul.mubr.msk.f32.vlgmr.msra.gmra.mxu0 %vm76_vm1, %v627_v14 }
 0x829   :  { %5141 = vmatpush3.msra.mxu0 %v5965_v29  ;;  %5148 = vmatprep.mubr.msk.f32.mxu0 %vm5810_vm0, %v5809_v0 }
 0x82a   :  { %5142 = vmatprep.subr.mxu0 %v5809_v0 }
 0x82b   :  { %5143 = vmatpush3.msra.mxu0 %v5975_v30 }
 0x82c   :  { %5144 = vmatprep.subr.mxu0 %v5809_v0 }
 0x82d   :  { %5145 = vmatpush3.msra.mxu0 %v5985_v32 }
 0x82e   :  { %5146 = vmatprep.subr.mxu0 %v5809_v0 }
 0x82f   :  { %5147 = vmatpush3.msra.mxu0 %v5993_v33 }
 0x830   :  { %5162 = vmatprep.subr.mxu0 %v5809_v0 }
 0x831   :  { %v807_v15 = vpop.permute.xlu0 %806 }
 0x832   :  { %5149 = vmatmul.mubr.msk.f32.vlgmr.msra.gmra.mxu0 %vm76_vm1, %v807_v15 }
 0x833   :  { %5163 = vmatpush3.msra.mxu0 %v5878_v1  ;;  %5170 = vmatprep.mubr.msk.f32.mxu0 %vm5810_vm0, %v5809_v0 }
 0x834   :  { %5164 = vmatprep.subr.mxu0 %v5809_v0  ;;  %v914_v22 = vpop.permute.xlu1 %913 }
 0x835   :  { %5165 = vmatpush3.msra.mxu0 %v5883_v2  ;;  %v916_v23 = vmul.f32 %v5917_v7, %v914_v22 }
 0x836   :  { %5166 = vmatprep.subr.mxu0 %v5809_v0 }
 0x837   :  { %5167 = vmatpush3.msra.mxu0 %v5895_v5 }
 0x838   :  { %5168 = vmatprep.subr.mxu0 %v5809_v0 }
 0x839   :  { %5169 = vmatpush3.msra.mxu0 %v5903_v6 }
 0x83a   :  { %5171 = vmatmul.mubr.msk.f32.vlgmr.msra.gmra.mxu0 %vm76_vm1, %v807_v15  ;;  %5184 = vmatprep.subr.mxu0 %v5809_v0 }
 0x83b   :  { %5185 = vmatpush3.msra.mxu0 %v5934_v25  ;;  %5192 = vmatprep.mubr.msk.f32.mxu0 %vm5810_vm0, %v5809_v0 }
 0x83c   :  { %5186 = vmatprep.subr.mxu0 %v5809_v0 }
 0x83d   :  { %5187 = vmatpush3.msra.mxu0 %v5939_v26 }
 0x83e   :  { %5188 = vmatprep.subr.mxu0 %v5809_v0 }
 0x83f   :  { %5189 = vmatpush3.msra.mxu0 %v5947_v27 }
 0x840   :  { %5190 = vmatprep.subr.mxu0 %v5809_v0 }
 0x841   :  { %5191 = vmatpush3.msra.mxu0 %v5956_v28 }
 0x842   :  { %5206 = vmatprep.subr.mxu0 %v5809_v0 }
 0x8e8   :  { %v707_v16 = vpop.f32.mrf.mxu0 }
 0x8e9   :  { %v708_v18 = vadd.f32 %v6028_v40, %v707_v16 }
 0x8ea   :  { %v5128_v17 = vpop.f32.mrf.mxu0 }
 0x8f2   :  { %v876_v19 = vpop.f32.mrf.mxu0 }
 0x8f3   :  { %v880_v20 = vadd.f32 %v876_v19, %v708_v18 }
 0x8f4   :  { %v5150_v21 = vpop.f32.mrf.mxu0 }
 0x8f5   :  { %5617 = vtanh.f32 %v880_v20  ;;  %v881_v38 = vmul.f32 0.5, %v880_v20 }
 0x8fa   :  { %v1055_v24 = vpop.f32.mrf.mxu0 }
 0x8fb   :  { %v1059_v31 = vadd.f32 %v1055_v24, %v916_v23 }
 0x8fc   :  { %v5172_v34 = vpop.f32.mrf.mxu0 }
 0x8fd   :  { %v1060_v35 = vadd.f32 %v5923_v10, %v1059_v31 }
 0x8ff   :  { %5619 = vtanh.f32 %v1060_v35  ;;  %v1061_v39 = vmul.f32 0.5, %v1060_v35 }
 0x900   :  { %5621 = vtanh.f32 %v881_v38 }
 0x901   :  { %5623 = vtanh.f32 %v1061_v39 }
 0x902   :  { %v5618_v36 = vpop.eup %5617 }
 0x903   :  { %888 = vrot.lane.b32.xlu0 %v5618_v36, %s5812_s29 }
 0x90c   :  { %v5620_v37 = vpop.eup %5619 }
 0x90d   :  { %1068 = vrot.lane.b32.xlu1 %v5620_v37, %s5812_s29  ;;  %v5622_v41 = vpop.eup %5621 }
 0x90e   :  { %v883_v42 = vmul.f32 0.5, %v5622_v41  ;;  %v5624_v46 = vpop.eup %5623 }
 0x90f   :  { %v1063_v47 = vmul.f32 0.5, %v5624_v46 }
 0x910   :  { %v884_v43 = vadd.f32 0.5, %v883_v42 }
 0x911   :  { %v1064_v48 = vadd.f32 0.5, %v1063_v47 }
 0x912   :  { %v886_v51 = vmul.f32 %v884_v43, %v6093_v60 }
 0x913   :  { %v1066_v54 = vmul.f32 %v1064_v48, %v6097_v63 }
 0x975   :  { %v889_v44 = vpop.permute.xlu0 %888 }
 0x976   :  { %v891_v45 = vmul.f32 %v889_v44, %v884_v43 }
 0x978   :  { %893 = vrot.lane.b32.xlu0 %v891_v45, %s5812_s29 }
 0x97f   :  { %v1069_v49 = vpop.permute.xlu1 %1068 }
 0x980   :  { %v1071_v50 = vmul.f32 %v1069_v49, %v1064_v48 }
 0x982   :  { %1073 = vrot.lane.b32.xlu1 %v1071_v50, %s5812_s29 }
 0x9ea   :  { %v894_v52 = vpop.permute.xlu0 %893 }
 0x9eb   :  { %v6149_v53 = vadd.f32 %v894_v52, %v886_v51 }
 0x9ed   :  { %5625 = vtanh.f32 %v6149_v53 }
 0x9f4   :  { %v1074_v55 = vpop.permute.xlu1 %1073 }
 0x9f5   :  { %v6153_v56 = vadd.f32 %v1074_v55, %v1066_v54  ;;  %v4766_v54 = vld [vmem:[%s7064_s0 + $0x28] sm:$0xff] }
 0x9f7   :  { %5627 = vtanh.f32 %v6153_v56 }
 0x9fa   :  { %v5626_v57 = vpop.eup %5625 }
 0x9fb   :  { %899 = vrot.lane.b32.xlu0 %v5626_v57, %s5812_s29 }
 0xa04   :  { %v5628_v58 = vpop.eup %5627 }
 0xa05   :  { %1079 = vrot.lane.b32.xlu1 %v5628_v58, %s5812_s29 }
 0xa6d   :  { %v900_v59 = vpop.permute.xlu0 %899 }
 0xa6e   :  { %v902_v60 = vmul.f32 %v900_v59, %v884_v43 }
 0xa70   :  { %904 = vrot.lane.b32.xlu0 %v902_v60, %s5813_s27 }
 0xa74   :  { %1191 = vperm.xlu0 %5585, %v4762_v61  }
 0xa77   :  { %v1080_v62 = vpop.permute.xlu1 %1079 }
 0xa78   :  { %v1082_v63 = vmul.f32 %v1080_v62, %v1064_v48 }
 0xa7a   :  { %1084 = vrot.lane.b32.xlu1 %v1082_v63, %s5813_s27 }
 0xae2   :  { %v905_v3 = vpop.permute.xlu0 %904 }
 0xae3   :  { %908 = vst.msk [vmem:[#allocation2 + $0x10] sm:$0xff] %vm76_vm1, %v905_v3  ;;  %5160 = vmatmul.mubr.msk.f32.vlgmr.msra.gmra.mxu1 %vm76_vm1, %v905_v3 }
 0xae4   :  { %5174 = vmatpush3.msra.mxu1 %v5965_v29  ;;  %5181 = vmatprep.mubr.msk.f32.mxu1 %vm5810_vm0, %v5809_v0 }
 0xae5   :  { %5175 = vmatprep.subr.mxu1 %v5809_v0 }
 0xae6   :  { %5176 = vmatpush3.msra.mxu1 %v5975_v30 }
 0xae7   :  { %5177 = vmatprep.subr.mxu1 %v5809_v0 }
 0xae8   :  { %5178 = vmatpush3.msra.mxu1 %v5985_v32 }
 0xae9   :  { %5179 = vmatprep.subr.mxu1 %v5809_v0 }
 0xaea   :  { %5180 = vmatpush3.msra.mxu1 %v5993_v33 }
 0xaeb   :  { %5195 = vmatprep.subr.mxu1 %v5809_v0 }
 0xaec   :  { %v1085_v4 = vpop.permute.xlu1 %1084 }
 0xaed   :  { %5182 = vmatmul.mubr.msk.f32.vlgmr.msra.gmra.mxu1 %vm76_vm1, %v1085_v4 }
 0xaee   :  { %5196 = vmatpush3.msra.mxu1 %v5878_v1  ;;  %5203 = vmatprep.mubr.msk.f32.mxu1 %vm5810_vm0, %v5809_v0 }
 0xaef   :  { %5197 = vmatprep.subr.mxu1 %v5809_v0  ;;  %v1192_v15 = vpop.permute.xlu0 %1191 }
 0xaf0   :  { %5198 = vmatpush3.msra.mxu1 %v5883_v2  ;;  %v1194_v16 = vmul.f32 %v5917_v7, %v1192_v15 }
 0xaf1   :  { %5199 = vmatprep.subr.mxu1 %v5809_v0 }
 0xaf2   :  { %5200 = vmatpush3.msra.mxu1 %v5895_v5 }
 0xaf3   :  { %5201 = vmatprep.subr.mxu1 %v5809_v0 }
 0xaf4   :  { %5202 = vmatpush3.msra.mxu1 %v5903_v6 }
 0xaf5   :  { %5204 = vmatmul.mubr.msk.f32.vlgmr.msra.gmra.mxu1 %vm76_vm1, %v1085_v4  ;;  %5217 = vmatprep.subr.mxu1 %v5809_v0 }
 0xaf6   :  { %5218 = vmatpush3.msra.mxu1 %v5934_v25  ;;  %5225 = vmatprep.mubr.msk.f32.mxu1 %vm5810_vm0, %v5809_v0 }
 0xaf7   :  { %5219 = vmatprep.subr.mxu1 %v5809_v0 }
 0xaf8   :  { %5220 = vmatpush3.msra.mxu1 %v5939_v26 }
 0xaf9   :  { %5221 = vmatprep.subr.mxu1 %v5809_v0 }
 0xafa   :  { %5222 = vmatpush3.msra.mxu1 %v5947_v27 }
 0xafb   :  { %5223 = vmatprep.subr.mxu1 %v5809_v0 }
 0xafc   :  { %5224 = vmatpush3.msra.mxu1 %v5956_v28 }
 0xafd   :  { %5239 = vmatprep.subr.mxu1 %v5809_v0 }
 0xba3   :  { %v985_v8 = vpop.f32.mrf.mxu1 }
 0xba4   :  { %v986_v11 = vadd.f32 %v6028_v40, %v985_v8 }
 0xba5   :  { %v5161_v9 = vpop.f32.mrf.mxu1 }
 0xbad   :  { %v1154_v12 = vpop.f32.mrf.mxu1 }
 0xbae   :  { %v1158_v13 = vadd.f32 %v1154_v12, %v986_v11 }
 0xbaf   :  { %v5183_v14 = vpop.f32.mrf.mxu1 }
 0xbb0   :  { %5629 = vtanh.f32 %v1158_v13  ;;  %v1159_v23 = vmul.f32 0.5, %v1158_v13 }
 0xbb5   :  { %v1333_v17 = vpop.f32.mrf.mxu1 }
 0xbb6   :  { %v1337_v18 = vadd.f32 %v1333_v17, %v1194_v16 }
 0xbb7   :  { %v5205_v19 = vpop.f32.mrf.mxu1 }
 0xbb8   :  { %v1338_v20 = vadd.f32 %v5923_v10, %v1337_v18 }
 0xbba   :  { %5631 = vtanh.f32 %v1338_v20  ;;  %v1339_v24 = vmul.f32 0.5, %v1338_v20 }
 0xbbb   :  { %5633 = vtanh.f32 %v1159_v23 }
 0xbbc   :  { %5635 = vtanh.f32 %v1339_v24 }
 0xbbd   :  { %v5630_v21 = vpop.eup %5629 }
 0xbbe   :  { %1166 = vrot.lane.b32.xlu1 %v5630_v21, %s5812_s29 }
 0xbc7   :  { %v5632_v22 = vpop.eup %5631 }
 0xbc8   :  { %1346 = vrot.lane.b32.xlu0 %v5632_v22, %s5812_s29  ;;  %v5634_v31 = vpop.eup %5633 }
 0xbc9   :  { %v1161_v34 = vmul.f32 0.5, %v5634_v31  ;;  %v5636_v38 = vpop.eup %5635 }
 0xbca   :  { %v1341_v39 = vmul.f32 0.5, %v5636_v38 }
 0xbcb   :  { %v1162_v35 = vadd.f32 0.5, %v1161_v34 }
 0xbcc   :  { %v1342_v41 = vadd.f32 0.5, %v1341_v39 }
 0xbcd   :  { %v1164_v44 = vmul.f32 %v1162_v35, %v6149_v53 }
 0xbce   :  { %v1344_v47 = vmul.f32 %v1342_v41, %v6153_v56 }
 0xc30   :  { %v1167_v36 = vpop.permute.xlu1 %1166 }
 0xc31   :  { %v1169_v37 = vmul.f32 %v1167_v36, %v1162_v35 }
 0xc33   :  { %1171 = vrot.lane.b32.xlu1 %v1169_v37, %s5812_s29 }
 0xc3a   :  { %v1347_v42 = vpop.permute.xlu0 %1346 }
 0xc3b   :  { %v1349_v43 = vmul.f32 %v1347_v42, %v1342_v41 }
 0xc3d   :  { %1351 = vrot.lane.b32.xlu0 %v1349_v43, %s5812_s29 }
 0xca5   :  { %v1172_v45 = vpop.permute.xlu1 %1171 }
 0xca6   :  { %v6205_v46 = vadd.f32 %v1172_v45, %v1164_v44 }
 0xca8   :  { %5637 = vtanh.f32 %v6205_v46 }
 0xcaf   :  { %v1352_v48 = vpop.permute.xlu0 %1351 }
 0xcb0   :  { %v6209_v49 = vadd.f32 %v1352_v48, %v1344_v47 }
 0xcb2   :  { %5639 = vtanh.f32 %v6209_v49 }
 0xcb5   :  { %v5638_v50 = vpop.eup %5637 }
 0xcb6   :  { %1177 = vrot.lane.b32.xlu1 %v5638_v50, %s5812_s29 }
 0xcbf   :  { %v5640_v51 = vpop.eup %5639 }
 0xcc0   :  { %1357 = vrot.lane.b32.xlu0 %v5640_v51, %s5812_s29 }
 0xd28   :  { %v1178_v52 = vpop.permute.xlu1 %1177 }
 0xd29   :  { %v1180_v53 = vmul.f32 %v1178_v52, %v1162_v35 }
 0xd2b   :  { %1182 = vrot.lane.b32.xlu1 %v1180_v53, %s5813_s27 }
 0xd2f   :  { %1469 = vperm.xlu1 %5586, %v4766_v54   ;;  %v6339_v54 = vld [vmem:[%s7068_s3] ss:$0 sm:$0xff] }
 0xd32   :  { %v1358_v55 = vpop.permute.xlu0 %1357 }
 0xd33   :  { %v1360_v56 = vmul.f32 %v1358_v55, %v1342_v41  ;;  %v4770_v41 = vld [vmem:[%s7064_s0 + $0x30] sm:$0xff] }
 0xd35   :  { %1362 = vrot.lane.b32.xlu0 %v1360_v56, %s5813_s27 }
 0xd9d   :  { %v1183_v57 = vpop.permute.xlu1 %1182 }
 0xd9e   :  { %1186 = vst.msk [vmem:[#allocation2 + $0x18] sm:$0xff] %vm76_vm1, %v1183_v57  ;;  %5193 = vmatmul.mubr.msk.f32.vlgmr.msra.gmra.mxu0 %vm76_vm1, %v1183_v57 }
 0xd9f   :  { %5207 = vmatpush3.msra.mxu0 %v5965_v29  ;;  %5214 = vmatprep.mubr.msk.f32.mxu0 %vm5810_vm0, %v5809_v0 }
 0xda0   :  { %5208 = vmatprep.subr.mxu0 %v5809_v0 }
 0xda1   :  { %5209 = vmatpush3.msra.mxu0 %v5975_v30 }
 0xda2   :  { %5210 = vmatprep.subr.mxu0 %v5809_v0 }
 0xda3   :  { %5211 = vmatpush3.msra.mxu0 %v5985_v32 }
 0xda4   :  { %5212 = vmatprep.subr.mxu0 %v5809_v0 }
 0xda5   :  { %5213 = vmatpush3.msra.mxu0 %v5993_v33 }
 0xda6   :  { %5228 = vmatprep.subr.mxu0 %v5809_v0 }
 0xda7   :  { %v1363_v58 = vpop.permute.xlu0 %1362 }
 0xda8   :  { %5215 = vmatmul.mubr.msk.f32.vlgmr.msra.gmra.mxu0 %vm76_vm1, %v1363_v58 }
 0xda9   :  { %5229 = vmatpush3.msra.mxu0 %v5878_v1  ;;  %5236 = vmatprep.mubr.msk.f32.mxu0 %vm5810_vm0, %v5809_v0 }
 0xdaa   :  { %5230 = vmatprep.subr.mxu0 %v5809_v0  ;;  %v1470_v61 = vpop.permute.xlu1 %1469 }
 0xdab   :  { %5231 = vmatpush3.msra.mxu0 %v5883_v2  ;;  %v1472_v62 = vmul.f32 %v5917_v7, %v1470_v61 }
 0xdac   :  { %5232 = vmatprep.subr.mxu0 %v5809_v0 }
 0xdad   :  { %5233 = vmatpush3.msra.mxu0 %v5895_v5 }
 0xdae   :  { %5234 = vmatprep.subr.mxu0 %v5809_v0 }
 0xdaf   :  { %5235 = vmatpush3.msra.mxu0 %v5903_v6 }
 0xdb0   :  { %5237 = vmatmul.mubr.msk.f32.vlgmr.msra.gmra.mxu0 %vm76_vm1, %v1363_v58  ;;  %5250 = vmatprep.subr.mxu0 %v5809_v0 }
 0xdb1   :  { %5251 = vmatpush3.msra.mxu0 %v5934_v25  ;;  %5258 = vmatprep.mubr.msk.f32.mxu0 %vm5810_vm0, %v5809_v0 }
 0xdb2   :  { %5252 = vmatprep.subr.mxu0 %v5809_v0 }
 0xdb3   :  { %5253 = vmatpush3.msra.mxu0 %v5939_v26 }
 0xdb4   :  { %5254 = vmatprep.subr.mxu0 %v5809_v0 }
 0xdb5   :  { %5255 = vmatpush3.msra.mxu0 %v5947_v27 }
 0xdb6   :  { %5256 = vmatprep.subr.mxu0 %v5809_v0 }
 0xdb7   :  { %5257 = vmatpush3.msra.mxu0 %v5956_v28 }
 0xdb8   :  { %5272 = vmatprep.subr.mxu0 %v5809_v0 }
 0xe5e   :  { %v1263_v1 = vpop.f32.mrf.mxu0 }
 0xe5f   :  { %v1264_v5 = vadd.f32 %v6028_v40, %v1263_v1 }
 0xe60   :  { %v5194_v2 = vpop.f32.mrf.mxu0 }
 0xe68   :  { %v1432_v6 = vpop.f32.mrf.mxu0 }
 0xe69   :  { %v1436_v59 = vadd.f32 %v1432_v6, %v1264_v5 }
 0xe6a   :  { %v5216_v60 = vpop.f32.mrf.mxu0 }
 0xe6b   :  { %5641 = vtanh.f32 %v1436_v59  ;;  %v1437_v12 = vmul.f32 0.5, %v1436_v59 }
 0xe70   :  { %v1611_v63 = vpop.f32.mrf.mxu0 }
 0xe71   :  { %v1615_v3 = vadd.f32 %v1611_v63, %v1472_v62 }
 0xe72   :  { %v5238_v4 = vpop.f32.mrf.mxu0 }
 0xe73   :  { %v1616_v8 = vadd.f32 %v5923_v10, %v1615_v3 }
 0xe75   :  { %5643 = vtanh.f32 %v1616_v8  ;;  %v1617_v13 = vmul.f32 0.5, %v1616_v8 }
 0xe76   :  { %5645 = vtanh.f32 %v1437_v12 }
 0xe77   :  { %5647 = vtanh.f32 %v1617_v13 }
 0xe78   :  { %v5642_v9 = vpop.eup %5641 }
 0xe79   :  { %1444 = vrot.lane.b32.xlu0 %v5642_v9, %s5812_s29 }
 0xe82   :  { %v5644_v11 = vpop.eup %5643 }
 0xe83   :  { %1624 = vrot.lane.b32.xlu1 %v5644_v11, %s5812_s29  ;;  %v5646_v14 = vpop.eup %5645 }
 0xe84   :  { %v1439_v15 = vmul.f32 0.5, %v5646_v14  ;;  %v5648_v18 = vpop.eup %5647 }
 0xe85   :  { %v1619_v10 = vmul.f32 0.5, %v5648_v18 }
 0xe86   :  { %v1440_v16 = vadd.f32 0.5, %v1439_v15 }
 0xe87   :  { %v1620_v19 = vadd.f32 0.5, %v1619_v10 }
 0xe88   :  { %v1442_v22 = vmul.f32 %v1440_v16, %v6205_v46 }
 0xe89   :  { %v1622_v31 = vmul.f32 %v1620_v19, %v6209_v49 }
 0xeeb   :  { %v1445_v7 = vpop.permute.xlu0 %1444 }
 0xeec   :  { %v1447_v17 = vmul.f32 %v1445_v7, %v1440_v16 }
 0xeee   :  { %1449 = vrot.lane.b32.xlu0 %v1447_v17, %s5812_s29  ;;  %v4774_v17 = vld [vmem:[%s7064_s0 + $0x38] sm:$0xff] }
 0xef5   :  { %v1625_v20 = vpop.permute.xlu1 %1624 }
 0xef6   :  { %v1627_v21 = vmul.f32 %v1625_v20, %v1620_v19  ;;  %v6366_v20 = vld [vmem:[%s7070_s4 + $0x18] sm:$0xff] }
 0xef8   :  { %1629 = vrot.lane.b32.xlu1 %v1627_v21, %s5812_s29  ;;  %v6375_v21 = vld [vmem:[%s7070_s4 + $0x10] sm:$0xff] }
 0xf60   :  { %v1450_v23 = vpop.permute.xlu0 %1449 }
 0xf61   :  { %v6261_v24 = vadd.f32 %v1450_v23, %v1442_v22  ;;  %v6382_v22 = vld [vmem:[%s7070_s4 + $0x8] sm:$0xff]  ;;  %v6389_v23 = vld [vmem:[%s7070_s4] sm:$0xff] }
 0xf63   :  { %5649 = vtanh.f32 %v6261_v24 }
 0xf6a   :  { %v1630_v34 = vpop.permute.xlu1 %1629 }
 0xf6b   :  { %v6265_v35 = vadd.f32 %v1630_v34, %v1622_v31  ;;  %v6408_v31 = vld [vmem:[%s7069_s5 + $0x18] sm:$0xff]  ;;  %v6417_v34 = vld [vmem:[%s7069_s5 + $0x10] sm:$0xff] }
 0xf6d   :  { %5651 = vtanh.f32 %v6265_v35 }
 0xf70   :  { %v5650_v36 = vpop.eup %5649 }
 0xf71   :  { %1455 = vrot.lane.b32.xlu0 %v5650_v36, %s5812_s29  ;;  %v6431_v36 = vld [vmem:[%s7069_s5] sm:$0xff] }
 0xf7a   :  { %v5652_v37 = vpop.eup %5651 }
 0xf7b   :  { %1635 = vrot.lane.b32.xlu1 %v5652_v37, %s5812_s29 }
 0xfe3   :  { %v1456_v38 = vpop.permute.xlu0 %1455 }
 0xfe4   :  { %v1458_v39 = vmul.f32 %v1456_v38, %v1440_v16 }
 0xfe6   :  { %1460 = vrot.lane.b32.xlu0 %v1458_v39, %s5813_s27  ;;  %v6438_v39 = vld [vmem:[%s7071_s6] ss:$0 sm:$0xff] }
 0xfea   :  { %1747 = vperm.xlu0 %5585, %v4770_v41  }
 0xfed   :  { %v1636_v42 = vpop.permute.xlu1 %1635 }
 0xfee   :  { %v1638_v43 = vmul.f32 %v1636_v42, %v1620_v19 }
 0xff0   :  { %1640 = vrot.lane.b32.xlu1 %v1638_v43, %s5813_s27 }
0x1058   :  { %v1461_v44 = vpop.permute.xlu0 %1460 }
0x1059   :  { %1464 = vst.msk [vmem:[#allocation2 + $0x20] sm:$0xff] %vm76_vm1, %v1461_v44  ;;  %5226 = vmatmul.mubr.msk.f32.vlgmr.msra.gmra.mxu1 %vm76_vm1, %v1461_v44 }
0x105a   :  { %5240 = vmatpush3.msra.mxu1 %v5965_v29  ;;  %5247 = vmatprep.mubr.msk.f32.mxu1 %vm5810_vm0, %v5809_v0  ;;  %v6291_v29 = vld [vmem:[%s7063_s2 + $0x18] sm:$0xff] }
0x105b   :  { %5241 = vmatprep.subr.mxu1 %v5809_v0 }
0x105c   :  { %5242 = vmatpush3.msra.mxu1 %v5975_v30  ;;  %v6300_v30 = vld [vmem:[%s7063_s2 + $0x10] sm:$0xff] }
0x105d   :  { %5243 = vmatprep.subr.mxu1 %v5809_v0 }
0x105e   :  { %5244 = vmatpush3.msra.mxu1 %v5985_v32  ;;  %v6307_v32 = vld [vmem:[%s7063_s2 + $0x8] sm:$0xff] }
0x105f   :  { %5245 = vmatprep.subr.mxu1 %v5809_v0 }
0x1060   :  { %5246 = vmatpush3.msra.mxu1 %v5993_v33  ;;  %v6314_v33 = vld [vmem:[%s7063_s2] sm:$0xff] }
0x1061   :  { %5261 = vmatprep.subr.mxu1 %v5809_v0 }
0x1062   :  { %v1641_v45 = vpop.permute.xlu1 %1640 }
0x1063   :  { %5248 = vmatmul.mubr.msk.f32.vlgmr.msra.gmra.mxu1 %vm76_vm1, %v1641_v45 }
0x1064   :  { %5262 = vmatpush3.msra.mxu1 %v6291_v29  ;;  %5269 = vmatprep.mubr.msk.f32.mxu1 %vm5810_vm0, %v5809_v0 }
0x1065   :  { %5263 = vmatprep.subr.mxu1 %v5809_v0  ;;  %v1748_v51 = vpop.permute.xlu0 %1747 }
0x1066   :  { %5264 = vmatpush3.msra.mxu1 %v6300_v30 }
0x1067   :  { %5265 = vmatprep.subr.mxu1 %v5809_v0 }
0x1068   :  { %5266 = vmatpush3.msra.mxu1 %v6307_v32 }
0x1069   :  { %5267 = vmatprep.subr.mxu1 %v5809_v0 }
0x106a   :  { %5268 = vmatpush3.msra.mxu1 %v6314_v33 }
0x106b   :  { %5270 = vmatmul.mubr.msk.f32.vlgmr.msra.gmra.mxu1 %vm76_vm1, %v1641_v45  ;;  %5283 = vmatprep.subr.mxu1 %v5809_v0 }
0x106c   :  { %5284 = vmatpush3.msra.mxu1 %v5934_v25  ;;  %5291 = vmatprep.mubr.msk.f32.mxu1 %vm5810_vm0, %v5809_v0 }
0x106d   :  { %5285 = vmatprep.subr.mxu1 %v5809_v0 }
0x106e   :  { %5286 = vmatpush3.msra.mxu1 %v5939_v26  ;;  %v6333_v26 = vld [vmem:[%s7067_s1] ss:$0 sm:$0xff] }
0x106f   :  { %5287 = vmatprep.subr.mxu1 %v5809_v0 }
0x1070   :  { %5288 = vmatpush3.msra.mxu1 %v5947_v27  ;;  %v1750_v27 = vmul.f32 %v6333_v26, %v1748_v51 }
0x1071   :  { %5289 = vmatprep.subr.mxu1 %v5809_v0 }
0x1072   :  { %5290 = vmatpush3.msra.mxu1 %v5956_v28 }
0x1073   :  { %5305 = vmatprep.subr.mxu1 %v5809_v0 }
0x1119   :  { %v1541_v46 = vpop.f32.mrf.mxu1 }
0x111a   :  { %v1542_v25 = vadd.f32 %v6028_v40, %v1541_v46 }
0x111b   :  { %v5227_v47 = vpop.f32.mrf.mxu1 }
0x1123   :  { %v1710_v48 = vpop.f32.mrf.mxu1 }
0x1124   :  { %v1714_v49 = vadd.f32 %v1710_v48, %v1542_v25 }
0x1125   :  { %v5249_v50 = vpop.f32.mrf.mxu1 }
0x1126   :  { %5653 = vtanh.f32 %v1714_v49  ;;  %v1715_v57 = vmul.f32 0.5, %v1714_v49 }
0x112b   :  { %v1889_v52 = vpop.f32.mrf.mxu1 }
0x112c   :  { %v1893_v28 = vadd.f32 %v1889_v52, %v1750_v27 }
0x112d   :  { %v5271_v53 = vpop.f32.mrf.mxu1 }
0x112e   :  { %v1894_v40 = vadd.f32 %v6339_v54, %v1893_v28 }
0x1130   :  { %5655 = vtanh.f32 %v1894_v40  ;;  %v1895_v58 = vmul.f32 0.5, %v1894_v40 }
0x1131   :  { %5657 = vtanh.f32 %v1715_v57 }
0x1132   :  { %5659 = vtanh.f32 %v1895_v58 }
0x1133   :  { %v5654_v55 = vpop.eup %5653 }
0x1134   :  { %1722 = vrot.lane.b32.xlu1 %v5654_v55, %s5812_s29 }
0x113d   :  { %v5656_v56 = vpop.eup %5655 }
0x113e   :  { %1902 = vrot.lane.b32.xlu0 %v5656_v56, %s5812_s29  ;;  %v5658_v1 = vpop.eup %5657 }
0x113f   :  { %v1717_v2 = vmul.f32 0.5, %v5658_v1  ;;  %v5660_v60 = vpop.eup %5659 }
0x1140   :  { %v1897_v61 = vmul.f32 0.5, %v5660_v60 }
0x1141   :  { %v1718_v5 = vadd.f32 0.5, %v1717_v2 }
0x1142   :  { %v1898_v62 = vadd.f32 0.5, %v1897_v61 }
0x1143   :  { %v1720_v4 = vmul.f32 %v1718_v5, %v6261_v24 }
0x1144   :  { %v1900_v11 = vmul.f32 %v1898_v62, %v6265_v35  ;;  %v6424_v35 = vld [vmem:[%s7069_s5 + $0x8] sm:$0xff] }
0x11a6   :  { %v1723_v6 = vpop.permute.xlu1 %1722 }
0x11a7   :  { %v1725_v59 = vmul.f32 %v1723_v6, %v1718_v5 }
0x11a9   :  { %1727 = vrot.lane.b32.xlu1 %v1725_v59, %s5812_s29 }
0x11b0   :  { %v1903_v63 = vpop.permute.xlu0 %1902 }
0x11b1   :  { %v1905_v3 = vmul.f32 %v1903_v63, %v1898_v62 }
0x11b3   :  { %1907 = vrot.lane.b32.xlu0 %v1905_v3, %s5812_s29 }
0x121b   :  { %v1728_v8 = vpop.permute.xlu1 %1727 }
0x121c   :  { %v6347_v9 = vadd.f32 %v1728_v8, %v1720_v4 }
0x121e   :  { %5661 = vtanh.f32 %v6347_v9 }
0x1225   :  { %v1908_v12 = vpop.permute.xlu0 %1907 }
0x1226   :  { %v6351_v13 = vadd.f32 %v1908_v12, %v1900_v11  ;;  %v4778_v11 = vld [vmem:[%s7064_s0 + $0x40] sm:$0xff] }
0x1228   :  { %5663 = vtanh.f32 %v6351_v13 }
0x122b   :  { %v5662_v14 = vpop.eup %5661 }
0x122c   :  { %1733 = vrot.lane.b32.xlu1 %v5662_v14, %s5812_s29 }
0x1235   :  { %v5664_v15 = vpop.eup %5663 }
0x1236   :  { %1913 = vrot.lane.b32.xlu0 %v5664_v15, %s5812_s29 }
0x129e   :  { %v1734_v16 = vpop.permute.xlu1 %1733 }
0x129f   :  { %v1736_v7 = vmul.f32 %v1734_v16, %v1718_v5 }
0x12a1   :  { %1738 = vrot.lane.b32.xlu1 %v1736_v7, %s5813_s27 }
0x12a5   :  { %2025 = vperm.xlu1 %5586, %v4774_v17  }
0x12a8   :  { %v1914_v18 = vpop.permute.xlu0 %1913 }
0x12a9   :  { %v1916_v10 = vmul.f32 %v1914_v18, %v1898_v62 }
0x12ab   :  { %1918 = vrot.lane.b32.xlu0 %v1916_v10, %s5813_s27 }
0x1313   :  { %v1739_v19 = vpop.permute.xlu1 %1738 }
0x1314   :  { %1742 = vst.msk [vmem:[#allocation2 + $0x28] sm:$0xff] %vm76_vm1, %v1739_v19  ;;  %5259 = vmatmul.mubr.msk.f32.vlgmr.msra.gmra.mxu0 %vm76_vm1, %v1739_v19 }
0x1315   :  { %5273 = vmatpush3.msra.mxu0 %v6366_v20  ;;  %5280 = vmatprep.mubr.msk.f32.mxu0 %vm5810_vm0, %v5809_v0 }
0x1316   :  { %5274 = vmatprep.subr.mxu0 %v5809_v0 }
0x1317   :  { %5275 = vmatpush3.msra.mxu0 %v6375_v21 }
0x1318   :  { %5276 = vmatprep.subr.mxu0 %v5809_v0 }
0x1319   :  { %5277 = vmatpush3.msra.mxu0 %v6382_v22 }
0x131a   :  { %5278 = vmatprep.subr.mxu0 %v5809_v0 }
0x131b   :  { %5279 = vmatpush3.msra.mxu0 %v6389_v23 }
0x131c   :  { %5294 = vmatprep.subr.mxu0 %v5809_v0 }
0x131d   :  { %v1919_v24 = vpop.permute.xlu0 %1918 }
0x131e   :  { %5281 = vmatmul.mubr.msk.f32.vlgmr.msra.gmra.mxu0 %vm76_vm1, %v1919_v24 }
0x131f   :  { %5295 = vmatpush3.msra.mxu0 %v6291_v29  ;;  %5302 = vmatprep.mubr.msk.f32.mxu0 %vm5810_vm0, %v5809_v0 }
0x1320   :  { %5296 = vmatprep.subr.mxu0 %v5809_v0  ;;  %v2026_v45 = vpop.permute.xlu1 %2025 }
0x1321   :  { %5297 = vmatpush3.msra.mxu0 %v6300_v30  ;;  %v2028_v46 = vmul.f32 %v6333_v26, %v2026_v45 }
0x1322   :  { %5298 = vmatprep.subr.mxu0 %v5809_v0 }
0x1323   :  { %5299 = vmatpush3.msra.mxu0 %v6307_v32 }
0x1324   :  { %5300 = vmatprep.subr.mxu0 %v5809_v0 }
0x1325   :  { %5301 = vmatpush3.msra.mxu0 %v6314_v33 }
0x1326   :  { %5303 = vmatmul.mubr.msk.f32.vlgmr.msra.gmra.mxu0 %vm76_vm1, %v1919_v24  ;;  %5316 = vmatprep.subr.mxu0 %v5809_v0 }
0x1327   :  { %5317 = vmatpush3.msra.mxu0 %v6408_v31  ;;  %5324 = vmatprep.mubr.msk.f32.mxu0 %vm5810_vm0, %v5809_v0 }
0x1328   :  { %5318 = vmatprep.subr.mxu0 %v5809_v0 }
0x1329   :  { %5319 = vmatpush3.msra.mxu0 %v6417_v34 }
0x132a   :  { %5320 = vmatprep.subr.mxu0 %v5809_v0 }
0x132b   :  { %5321 = vmatpush3.msra.mxu0 %v6424_v35 }
0x132c   :  { %5322 = vmatprep.subr.mxu0 %v5809_v0 }
0x132d   :  { %5323 = vmatpush3.msra.mxu0 %v6431_v36 }
0x132e   :  { %5338 = vmatprep.subr.mxu0 %v5809_v0 }
0x13d4   :  { %v1819_v37 = vpop.f32.mrf.mxu0 }
0x13d5   :  { %v1820_v41 = vadd.f32 %v6438_v39, %v1819_v37 }
0x13d6   :  { %v5260_v38 = vpop.f32.mrf.mxu0 }
0x13de   :  { %v1988_v42 = vpop.f32.mrf.mxu0 }
0x13df   :  { %v1992_v43 = vadd.f32 %v1988_v42, %v1820_v41 }
0x13e0   :  { %v5282_v44 = vpop.f32.mrf.mxu0 }
0x13e1   :  { %5665 = vtanh.f32 %v1992_v43  ;;  %v1993_v27 = vmul.f32 0.5, %v1992_v43 }
0x13e6   :  { %v2167_v47 = vpop.f32.mrf.mxu0 }
0x13e7   :  { %v2171_v25 = vadd.f32 %v2167_v47, %v2028_v46 }
0x13e8   :  { %v5304_v48 = vpop.f32.mrf.mxu0 }
0x13e9   :  { %v2172_v49 = vadd.f32 %v6339_v54, %v2171_v25 }
0x13eb   :  { %5667 = vtanh.f32 %v2172_v49  ;;  %v2173_v52 = vmul.f32 0.5, %v2172_v49 }
0x13ec   :  { %5669 = vtanh.f32 %v1993_v27 }
0x13ed   :  { %5671 = vtanh.f32 %v2173_v52 }
0x13ee   :  { %v5666_v50 = vpop.eup %5665 }
0x13ef   :  { %2000 = vrot.lane.b32.xlu0 %v5666_v50, %s5812_s29 }
0x13f8   :  { %v5668_v51 = vpop.eup %5667 }
0x13f9   :  { %2180 = vrot.lane.b32.xlu1 %v5668_v51, %s5812_s29  ;;  %v5670_v28 = vpop.eup %5669 }
0x13fa   :  { %v1995_v53 = vmul.f32 0.5, %v5670_v28  ;;  %v5672_v57 = vpop.eup %5671 }
0x13fb   :  { %v2175_v58 = vmul.f32 0.5, %v5672_v57 }
0x13fc   :  { %v1996_v40 = vadd.f32 0.5, %v1995_v53 }
0x13fd   :  { %v2176_v1 = vadd.f32 0.5, %v2175_v58 }
0x13fe   :  { %v1998_v6 = vmul.f32 %v1996_v40, %v6347_v9 }
0x13ff   :  { %v2178_v61 = vmul.f32 %v2176_v1, %v6351_v13 }
0x1461   :  { %v2001_v55 = vpop.permute.xlu0 %2000 }
0x1462   :  { %v2003_v56 = vmul.f32 %v2001_v55, %v1996_v40 }
0x1464   :  { %2005 = vrot.lane.b32.xlu0 %v2003_v56, %s5812_s29 }
0x146b   :  { %v2181_v2 = vpop.permute.xlu1 %2180 }
0x146c   :  { %v2183_v5 = vmul.f32 %v2181_v2, %v2176_v1 }
0x146e   :  { %2185 = vrot.lane.b32.xlu1 %v2183_v5, %s5812_s29 }
0x14d6   :  { %v2006_v59 = vpop.permute.xlu0 %2005 }
0x14d7   :  { %v6448_v60 = vadd.f32 %v2006_v59, %v1998_v6 }
0x14d9   :  { %5673 = vtanh.f32 %v6448_v60 }
0x14e0   :  { %v2186_v62 = vpop.permute.xlu1 %2185 }
0x14e1   :  { %v6452_v63 = vadd.f32 %v2186_v62, %v2178_v61  ;;  %v4782_v61 = vld [vmem:[%s7064_s0 + $0x48] sm:$0xff] }
0x14e3   :  { %5675 = vtanh.f32 %v6452_v63 }
0x14e6   :  { %v5674_v3 = vpop.eup %5673 }
0x14e7   :  { %2011 = vrot.lane.b32.xlu0 %v5674_v3, %s5812_s29 }
0x14f0   :  { %v5676_v4 = vpop.eup %5675 }
0x14f1   :  { %2191 = vrot.lane.b32.xlu1 %v5676_v4, %s5812_s29 }
0x1559   :  { %v2012_v8 = vpop.permute.xlu0 %2011 }
0x155a   :  { %v2014_v9 = vmul.f32 %v2012_v8, %v1996_v40 }
0x155c   :  { %2016 = vrot.lane.b32.xlu0 %v2014_v9, %s5813_s27 }
0x1560   :  { %2303 = vperm.xlu0 %5585, %v4778_v11  }
0x1563   :  { %v2192_v12 = vpop.permute.xlu1 %2191 }
0x1564   :  { %v2194_v13 = vmul.f32 %v2192_v12, %v2176_v1 }
0x1566   :  { %2196 = vrot.lane.b32.xlu1 %v2194_v13, %s5813_s27 }
0x15ce   :  { %v2017_v14 = vpop.permute.xlu0 %2016 }
0x15cf   :  { %2020 = vst.msk [vmem:[#allocation2 + $0x30] sm:$0xff] %vm76_vm1, %v2017_v14  ;;  %5292 = vmatmul.mubr.msk.f32.vlgmr.msra.gmra.mxu1 %vm76_vm1, %v2017_v14 }
0x15d0   :  { %5306 = vmatpush3.msra.mxu1 %v6366_v20  ;;  %5313 = vmatprep.mubr.msk.f32.mxu1 %vm5810_vm0, %v5809_v0 }
0x15d1   :  { %5307 = vmatprep.subr.mxu1 %v5809_v0 }
0x15d2   :  { %5308 = vmatpush3.msra.mxu1 %v6375_v21 }
0x15d3   :  { %5309 = vmatprep.subr.mxu1 %v5809_v0 }
0x15d4   :  { %5310 = vmatpush3.msra.mxu1 %v6382_v22 }
0x15d5   :  { %5311 = vmatprep.subr.mxu1 %v5809_v0 }
0x15d6   :  { %5312 = vmatpush3.msra.mxu1 %v6389_v23 }
0x15d7   :  { %5327 = vmatprep.subr.mxu1 %v5809_v0 }
0x15d8   :  { %v2197_v15 = vpop.permute.xlu1 %2196 }
0x15d9   :  { %5314 = vmatmul.mubr.msk.f32.vlgmr.msra.gmra.mxu1 %vm76_vm1, %v2197_v15 }
0x15da   :  { %5328 = vmatpush3.msra.mxu1 %v6291_v29  ;;  %5335 = vmatprep.mubr.msk.f32.mxu1 %vm5810_vm0, %v5809_v0 }
0x15db   :  { %5329 = vmatprep.subr.mxu1 %v5809_v0  ;;  %v2304_v24 = vpop.permute.xlu0 %2303 }
0x15dc   :  { %5330 = vmatpush3.msra.mxu1 %v6300_v30  ;;  %v2306_v37 = vmul.f32 %v6333_v26, %v2304_v24 }
0x15dd   :  { %5331 = vmatprep.subr.mxu1 %v5809_v0 }
0x15de   :  { %5332 = vmatpush3.msra.mxu1 %v6307_v32 }
0x15df   :  { %5333 = vmatprep.subr.mxu1 %v5809_v0 }
0x15e0   :  { %5334 = vmatpush3.msra.mxu1 %v6314_v33 }
0x15e1   :  { %5336 = vmatmul.mubr.msk.f32.vlgmr.msra.gmra.mxu1 %vm76_vm1, %v2197_v15  ;;  %5349 = vmatprep.subr.mxu1 %v5809_v0 }
0x15e2   :  { %5350 = vmatpush3.msra.mxu1 %v6408_v31  ;;  %5357 = vmatprep.mubr.msk.f32.mxu1 %vm5810_vm0, %v5809_v0 }
0x15e3   :  { %5351 = vmatprep.subr.mxu1 %v5809_v0 }
0x15e4   :  { %5352 = vmatpush3.msra.mxu1 %v6417_v34 }
0x15e5   :  { %5353 = vmatprep.subr.mxu1 %v5809_v0 }
0x15e6   :  { %5354 = vmatpush3.msra.mxu1 %v6424_v35 }
0x15e7   :  { %5355 = vmatprep.subr.mxu1 %v5809_v0 }
0x15e8   :  { %5356 = vmatpush3.msra.mxu1 %v6431_v36 }
0x15e9   :  { %5371 = vmatprep.subr.mxu1 %v5809_v0 }
0x168f   :  { %v2097_v16 = vpop.f32.mrf.mxu1 }
0x1690   :  { %v2098_v17 = vadd.f32 %v6438_v39, %v2097_v16 }
0x1691   :  { %v5293_v7 = vpop.f32.mrf.mxu1 }
0x1699   :  { %v2266_v18 = vpop.f32.mrf.mxu1 }
0x169a   :  { %v2270_v10 = vadd.f32 %v2266_v18, %v2098_v17 }
0x169b   :  { %v5315_v19 = vpop.f32.mrf.mxu1 }
0x169c   :  { %5677 = vtanh.f32 %v2270_v10  ;;  %v2271_v46 = vmul.f32 0.5, %v2270_v10 }
0x16a1   :  { %v2445_v38 = vpop.f32.mrf.mxu1 }
0x16a2   :  { %v2449_v41 = vadd.f32 %v2445_v38, %v2306_v37 }
0x16a3   :  { %v5337_v42 = vpop.f32.mrf.mxu1 }
0x16a4   :  { %v2450_v43 = vadd.f32 %v6339_v54, %v2449_v41 }
0x16a6   :  { %5679 = vtanh.f32 %v2450_v43  ;;  %v2451_v47 = vmul.f32 0.5, %v2450_v43 }
0x16a7   :  { %5681 = vtanh.f32 %v2271_v46 }
0x16a8   :  { %5683 = vtanh.f32 %v2451_v47 }
0x16a9   :  { %v5678_v44 = vpop.eup %5677 }
0x16aa   :  { %2278 = vrot.lane.b32.xlu1 %v5678_v44, %s5812_s29 }
0x16b3   :  { %v5680_v45 = vpop.eup %5679 }
0x16b4   :  { %2458 = vrot.lane.b32.xlu0 %v5680_v45, %s5812_s29  ;;  %v5682_v25 = vpop.eup %5681 }
0x16b5   :  { %v2273_v48 = vmul.f32 0.5, %v5682_v25  ;;  %v5684_v27 = vpop.eup %5683 }
0x16b6   :  { %v2453_v52 = vmul.f32 0.5, %v5684_v27 }
0x16b7   :  { %v2274_v49 = vadd.f32 0.5, %v2273_v48 }
0x16b8   :  { %v2454_v28 = vadd.f32 0.5, %v2453_v52 }
0x16b9   :  { %v2276_v55 = vmul.f32 %v2274_v49, %v6448_v60 }
0x16ba   :  { %v2456_v58 = vmul.f32 %v2454_v28, %v6452_v63 }
0x171c   :  { %v2279_v50 = vpop.permute.xlu1 %2278 }
0x171d   :  { %v2281_v51 = vmul.f32 %v2279_v50, %v2274_v49 }
0x171f   :  { %2283 = vrot.lane.b32.xlu1 %v2281_v51, %s5812_s29 }
0x1726   :  { %v2459_v53 = vpop.permute.xlu0 %2458 }
0x1727   :  { %v2461_v40 = vmul.f32 %v2459_v53, %v2454_v28 }
0x1729   :  { %2463 = vrot.lane.b32.xlu0 %v2461_v40, %s5812_s29 }
0x1791   :  { %v2284_v56 = vpop.permute.xlu1 %2283 }
0x1792   :  { %v6504_v57 = vadd.f32 %v2284_v56, %v2276_v55 }
0x1794   :  { %5685 = vtanh.f32 %v6504_v57 }
0x179b   :  { %v2464_v1 = vpop.permute.xlu0 %2463 }
0x179c   :  { %v6508_v2 = vadd.f32 %v2464_v1, %v2456_v58  ;;  %v4786_v58 = vld [vmem:[%s7064_s0 + $0x50] sm:$0xff] }
0x179e   :  { %5687 = vtanh.f32 %v6508_v2 }
0x17a1   :  { %v5686_v5 = vpop.eup %5685 }
0x17a2   :  { %2289 = vrot.lane.b32.xlu1 %v5686_v5, %s5812_s29 }
0x17ab   :  { %v5688_v6 = vpop.eup %5687 }
0x17ac   :  { %2469 = vrot.lane.b32.xlu0 %v5688_v6, %s5812_s29 }
0x1814   :  { %v2290_v59 = vpop.permute.xlu1 %2289 }
0x1815   :  { %v2292_v60 = vmul.f32 %v2290_v59, %v2274_v49 }
0x1817   :  { %2294 = vrot.lane.b32.xlu1 %v2292_v60, %s5813_s27 }
0x181b   :  { %2581 = vperm.xlu1 %5586, %v4782_v61  }
0x181e   :  { %v2470_v62 = vpop.permute.xlu0 %2469 }
0x181f   :  { %v2472_v63 = vmul.f32 %v2470_v62, %v2454_v28 }
0x1821   :  { %2474 = vrot.lane.b32.xlu0 %v2472_v63, %s5813_s27 }
0x1889   :  { %v2295_v3 = vpop.permute.xlu1 %2294 }
0x188a   :  { %2298 = vst.msk [vmem:[#allocation2 + $0x38] sm:$0xff] %vm76_vm1, %v2295_v3  ;;  %5325 = vmatmul.mubr.msk.f32.vlgmr.msra.gmra.mxu0 %vm76_vm1, %v2295_v3 }
0x188b   :  { %5339 = vmatpush3.msra.mxu0 %v6366_v20  ;;  %5346 = vmatprep.mubr.msk.f32.mxu0 %vm5810_vm0, %v5809_v0 }
0x188c   :  { %5340 = vmatprep.subr.mxu0 %v5809_v0 }
0x188d   :  { %5341 = vmatpush3.msra.mxu0 %v6375_v21 }
0x188e   :  { %5342 = vmatprep.subr.mxu0 %v5809_v0 }
0x188f   :  { %5343 = vmatpush3.msra.mxu0 %v6382_v22 }
0x1890   :  { %5344 = vmatprep.subr.mxu0 %v5809_v0 }
0x1891   :  { %5345 = vmatpush3.msra.mxu0 %v6389_v23 }
0x1892   :  { %5360 = vmatprep.subr.mxu0 %v5809_v0 }
0x1893   :  { %v2475_v4 = vpop.permute.xlu0 %2474 }
0x1894   :  { %5347 = vmatmul.mubr.msk.f32.vlgmr.msra.gmra.mxu0 %vm76_vm1, %v2475_v4 }
0x1895   :  { %5361 = vmatpush3.msra.mxu0 %v6291_v29  ;;  %5368 = vmatprep.mubr.msk.f32.mxu0 %vm5810_vm0, %v5809_v0 }
0x1896   :  { %5362 = vmatprep.subr.mxu0 %v5809_v0  ;;  %v2582_v15 = vpop.permute.xlu1 %2581 }
0x1897   :  { %5363 = vmatpush3.msra.mxu0 %v6300_v30  ;;  %v2584_v16 = vmul.f32 %v6333_v26, %v2582_v15 }
0x1898   :  { %5364 = vmatprep.subr.mxu0 %v5809_v0 }
0x1899   :  { %5365 = vmatpush3.msra.mxu0 %v6307_v32 }
0x189a   :  { %5366 = vmatprep.subr.mxu0 %v5809_v0 }
0x189b   :  { %5367 = vmatpush3.msra.mxu0 %v6314_v33 }
0x189c   :  { %5369 = vmatmul.mubr.msk.f32.vlgmr.msra.gmra.mxu0 %vm76_vm1, %v2475_v4  ;;  %5382 = vmatprep.subr.mxu0 %v5809_v0 }
0x189d   :  { %5383 = vmatpush3.msra.mxu0 %v6408_v31  ;;  %5390 = vmatprep.mubr.msk.f32.mxu0 %vm5810_vm0, %v5809_v0 }
0x189e   :  { %5384 = vmatprep.subr.mxu0 %v5809_v0 }
0x189f   :  { %5385 = vmatpush3.msra.mxu0 %v6417_v34 }
0x18a0   :  { %5386 = vmatprep.subr.mxu0 %v5809_v0 }
0x18a1   :  { %5387 = vmatpush3.msra.mxu0 %v6424_v35 }
0x18a2   :  { %5388 = vmatprep.subr.mxu0 %v5809_v0 }
0x18a3   :  { %5389 = vmatpush3.msra.mxu0 %v6431_v36 }
0x18a4   :  { %5404 = vmatprep.subr.mxu0 %v5809_v0 }
0x194a   :  { %v2375_v8 = vpop.f32.mrf.mxu0 }
0x194b   :  { %v2376_v11 = vadd.f32 %v6438_v39, %v2375_v8 }
0x194c   :  { %v5326_v9 = vpop.f32.mrf.mxu0 }
0x1954   :  { %v2544_v12 = vpop.f32.mrf.mxu0 }
0x1955   :  { %v2548_v13 = vadd.f32 %v2544_v12, %v2376_v11 }
0x1956   :  { %v5348_v14 = vpop.f32.mrf.mxu0 }
0x1957   :  { %5689 = vtanh.f32 %v2548_v13  ;;  %v2549_v37 = vmul.f32 0.5, %v2548_v13 }
0x195c   :  { %v2723_v7 = vpop.f32.mrf.mxu0 }
0x195d   :  { %v2727_v17 = vadd.f32 %v2723_v7, %v2584_v16 }
0x195e   :  { %v5370_v18 = vpop.f32.mrf.mxu0 }
0x195f   :  { %v2728_v10 = vadd.f32 %v6339_v54, %v2727_v17 }
0x1961   :  { %5691 = vtanh.f32 %v2728_v10  ;;  %v2729_v38 = vmul.f32 0.5, %v2728_v10 }
0x1962   :  { %5693 = vtanh.f32 %v2549_v37 }
0x1963   :  { %5695 = vtanh.f32 %v2729_v38 }
0x1964   :  { %v5690_v19 = vpop.eup %5689 }
0x1965   :  { %2556 = vrot.lane.b32.xlu0 %v5690_v19, %s5812_s29 }
0x196e   :  { %v5692_v24 = vpop.eup %5691 }
0x196f   :  { %2736 = vrot.lane.b32.xlu1 %v5692_v24, %s5812_s29  ;;  %v5694_v41 = vpop.eup %5693 }
0x1970   :  { %v2551_v42 = vmul.f32 0.5, %v5694_v41  ;;  %v5696_v46 = vpop.eup %5695 }
0x1971   :  { %v2731_v47 = vmul.f32 0.5, %v5696_v46 }
0x1972   :  { %v2552_v43 = vadd.f32 0.5, %v2551_v42 }
0x1973   :  { %v2732_v25 = vadd.f32 0.5, %v2731_v47 }
0x1974   :  { %v2554_v50 = vmul.f32 %v2552_v43, %v6504_v57 }
0x1975   :  { %v2734_v52 = vmul.f32 %v2732_v25, %v6508_v2 }
0x19d7   :  { %v2557_v44 = vpop.permute.xlu0 %2556 }
0x19d8   :  { %v2559_v45 = vmul.f32 %v2557_v44, %v2552_v43 }
0x19da   :  { %2561 = vrot.lane.b32.xlu0 %v2559_v45, %s5812_s29 }
0x19e1   :  { %v2737_v48 = vpop.permute.xlu1 %2736 }
0x19e2   :  { %v2739_v49 = vmul.f32 %v2737_v48, %v2732_v25 }
0x19e4   :  { %2741 = vrot.lane.b32.xlu1 %v2739_v49, %s5812_s29 }
0x1a4c   :  { %v2562_v51 = vpop.permute.xlu0 %2561 }
0x1a4d   :  { %v6560_v27 = vadd.f32 %v2562_v51, %v2554_v50 }
0x1a4f   :  { %5697 = vtanh.f32 %v6560_v27 }
0x1a56   :  { %v2742_v28 = vpop.permute.xlu1 %2741 }
0x1a57   :  { %v6564_v53 = vadd.f32 %v2742_v28, %v2734_v52  ;;  %v4790_v52 = vld [vmem:[%s7064_s0 + $0x58] sm:$0xff] }
0x1a59   :  { %5699 = vtanh.f32 %v6564_v53 }
0x1a5c   :  { %v5698_v40 = vpop.eup %5697 }
0x1a5d   :  { %2567 = vrot.lane.b32.xlu0 %v5698_v40, %s5812_s29 }
0x1a66   :  { %v5700_v55 = vpop.eup %5699 }
0x1a67   :  { %2747 = vrot.lane.b32.xlu1 %v5700_v55, %s5812_s29 }
0x1acf   :  { %v2568_v56 = vpop.permute.xlu0 %2567 }
0x1ad0   :  { %v2570_v57 = vmul.f32 %v2568_v56, %v2552_v43 }
0x1ad2   :  { %2572 = vrot.lane.b32.xlu0 %v2570_v57, %s5813_s27 }
0x1ad6   :  { %2859 = vperm.xlu0 %5585, %v4786_v58  }
0x1ad9   :  { %v2748_v1 = vpop.permute.xlu1 %2747 }
0x1ada   :  { %v2750_v2 = vmul.f32 %v2748_v1, %v2732_v25 }
0x1adc   :  { %2752 = vrot.lane.b32.xlu1 %v2750_v2, %s5813_s27 }
0x1b44   :  { %v2573_v5 = vpop.permute.xlu0 %2572 }
0x1b45   :  { %2576 = vst.msk [vmem:[#allocation2 + $0x40] sm:$0xff] %vm76_vm1, %v2573_v5  ;;  %5358 = vmatmul.mubr.msk.f32.vlgmr.msra.gmra.mxu1 %vm76_vm1, %v2573_v5 }
0x1b46   :  { %5372 = vmatpush3.msra.mxu1 %v6366_v20  ;;  %5379 = vmatprep.mubr.msk.f32.mxu1 %vm5810_vm0, %v5809_v0 }
0x1b47   :  { %5373 = vmatprep.subr.mxu1 %v5809_v0 }
0x1b48   :  { %5374 = vmatpush3.msra.mxu1 %v6375_v21 }
0x1b49   :  { %5375 = vmatprep.subr.mxu1 %v5809_v0 }
0x1b4a   :  { %5376 = vmatpush3.msra.mxu1 %v6382_v22 }
0x1b4b   :  { %5377 = vmatprep.subr.mxu1 %v5809_v0 }
0x1b4c   :  { %5378 = vmatpush3.msra.mxu1 %v6389_v23 }
0x1b4d   :  { %5393 = vmatprep.subr.mxu1 %v5809_v0 }
0x1b4e   :  { %v2753_v6 = vpop.permute.xlu1 %2752 }
0x1b4f   :  { %5380 = vmatmul.mubr.msk.f32.vlgmr.msra.gmra.mxu1 %vm76_vm1, %v2753_v6 }
0x1b50   :  { %5394 = vmatpush3.msra.mxu1 %v6291_v29  ;;  %5401 = vmatprep.mubr.msk.f32.mxu1 %vm5810_vm0, %v5809_v0 }
0x1b51   :  { %5395 = vmatprep.subr.mxu1 %v5809_v0  ;;  %v2860_v4 = vpop.permute.xlu0 %2859 }
0x1b52   :  { %5396 = vmatpush3.msra.mxu1 %v6300_v30  ;;  %v2862_v8 = vmul.f32 %v6333_v26, %v2860_v4 }
0x1b53   :  { %5397 = vmatprep.subr.mxu1 %v5809_v0 }
0x1b54   :  { %5398 = vmatpush3.msra.mxu1 %v6307_v32 }
0x1b55   :  { %5399 = vmatprep.subr.mxu1 %v5809_v0 }
0x1b56   :  { %5400 = vmatpush3.msra.mxu1 %v6314_v33 }
0x1b57   :  { %5402 = vmatmul.mubr.msk.f32.vlgmr.msra.gmra.mxu1 %vm76_vm1, %v2753_v6  ;;  %5415 = vmatprep.subr.mxu1 %v5809_v0 }
0x1b58   :  { %5416 = vmatpush3.msra.mxu1 %v6408_v31  ;;  %5423 = vmatprep.mubr.msk.f32.mxu1 %vm5810_vm0, %v5809_v0 }
0x1b59   :  { %5417 = vmatprep.subr.mxu1 %v5809_v0 }
0x1b5a   :  { %5418 = vmatpush3.msra.mxu1 %v6417_v34 }
0x1b5b   :  { %5419 = vmatprep.subr.mxu1 %v5809_v0 }
0x1b5c   :  { %5420 = vmatpush3.msra.mxu1 %v6424_v35 }
0x1b5d   :  { %5421 = vmatprep.subr.mxu1 %v5809_v0 }
0x1b5e   :  { %5422 = vmatpush3.msra.mxu1 %v6431_v36 }
0x1b5f   :  { %5437 = vmatprep.subr.mxu1 %v5809_v0 }
0x1c05   :  { %v2653_v59 = vpop.f32.mrf.mxu1 }
0x1c06   :  { %v2654_v61 = vadd.f32 %v6438_v39, %v2653_v59 }
0x1c07   :  { %v5359_v60 = vpop.f32.mrf.mxu1 }
0x1c0f   :  { %v2822_v62 = vpop.f32.mrf.mxu1 }
0x1c10   :  { %v2826_v63 = vadd.f32 %v2822_v62, %v2654_v61 }
0x1c11   :  { %v5381_v3 = vpop.f32.mrf.mxu1 }
0x1c12   :  { %5701 = vtanh.f32 %v2826_v63  ;;  %v2827_v16 = vmul.f32 0.5, %v2826_v63 }
0x1c17   :  { %v3001_v9 = vpop.f32.mrf.mxu1 }
0x1c18   :  { %v3005_v11 = vadd.f32 %v3001_v9, %v2862_v8 }
0x1c19   :  { %v5403_v12 = vpop.f32.mrf.mxu1 }
0x1c1a   :  { %v3006_v13 = vadd.f32 %v6339_v54, %v3005_v11 }
0x1c1c   :  { %5703 = vtanh.f32 %v3006_v13  ;;  %v3007_v7 = vmul.f32 0.5, %v3006_v13 }
0x1c1d   :  { %5705 = vtanh.f32 %v2827_v16 }
0x1c1e   :  { %5707 = vtanh.f32 %v3007_v7 }
0x1c1f   :  { %v5702_v14 = vpop.eup %5701 }
0x1c20   :  { %2834 = vrot.lane.b32.xlu1 %v5702_v14, %s5812_s29 }
0x1c29   :  { %v5704_v15 = vpop.eup %5703 }
0x1c2a   :  { %3014 = vrot.lane.b32.xlu0 %v5704_v15, %s5812_s29  ;;  %v5706_v17 = vpop.eup %5705 }
0x1c2b   :  { %v2829_v18 = vmul.f32 0.5, %v5706_v17  ;;  %v5708_v37 = vpop.eup %5707 }
0x1c2c   :  { %v3009_v38 = vmul.f32 0.5, %v5708_v37 }
0x1c2d   :  { %v2830_v10 = vadd.f32 0.5, %v2829_v18 }
0x1c2e   :  { %v3010_v41 = vadd.f32 0.5, %v3009_v38 }
0x1c2f   :  { %v2832_v44 = vmul.f32 %v2830_v10, %v6560_v27 }
0x1c30   :  { %v3012_v47 = vmul.f32 %v3010_v41, %v6564_v53 }
0x1c92   :  { %v2835_v19 = vpop.permute.xlu1 %2834 }
0x1c93   :  { %v2837_v24 = vmul.f32 %v2835_v19, %v2830_v10 }
0x1c95   :  { %2839 = vrot.lane.b32.xlu1 %v2837_v24, %s5812_s29 }
0x1c9c   :  { %v3015_v42 = vpop.permute.xlu0 %3014 }
0x1c9d   :  { %v3017_v43 = vmul.f32 %v3015_v42, %v3010_v41 }
0x1c9f   :  { %3019 = vrot.lane.b32.xlu0 %v3017_v43, %s5812_s29 }
0x1d07   :  { %v2840_v45 = vpop.permute.xlu1 %2839 }
0x1d08   :  { %v6616_v46 = vadd.f32 %v2840_v45, %v2832_v44 }
0x1d0a   :  { %5709 = vtanh.f32 %v6616_v46 }
0x1d11   :  { %v3020_v25 = vpop.permute.xlu0 %3019 }
0x1d12   :  { %v6620_v48 = vadd.f32 %v3020_v25, %v3012_v47 }
0x1d14   :  { %5711 = vtanh.f32 %v6620_v48 }
0x1d17   :  { %v5710_v49 = vpop.eup %5709 }
0x1d18   :  { %2845 = vrot.lane.b32.xlu1 %v5710_v49, %s5812_s29 }
0x1d21   :  { %v5712_v50 = vpop.eup %5711 }
0x1d22   :  { %3025 = vrot.lane.b32.xlu0 %v5712_v50, %s5812_s29 }
0x1d8a   :  { %v2846_v51 = vpop.permute.xlu1 %2845 }
0x1d8b   :  { %v2848_v27 = vmul.f32 %v2846_v51, %v2830_v10 }
0x1d8d   :  { %2850 = vrot.lane.b32.xlu1 %v2848_v27, %s5813_s27 }
0x1d91   :  { %3137 = vperm.xlu1 %5586, %v4790_v52   ;;  %v6750_v52 = vld [vmem:[%s7068_s3] ss:$0 sm:$0xff] }
0x1d94   :  { %v3026_v28 = vpop.permute.xlu0 %3025 }
0x1d95   :  { %v3028_v53 = vmul.f32 %v3026_v28, %v3010_v41  ;;  %v4794_v41 = vld [vmem:[%s7064_s0 + $0x60] sm:$0xff] }
0x1d97   :  { %3030 = vrot.lane.b32.xlu0 %v3028_v53, %s5813_s27 }
0x1dff   :  { %v2851_v40 = vpop.permute.xlu1 %2850 }
0x1e00   :  { %2854 = vst.msk [vmem:[#allocation2 + $0x48] sm:$0xff] %vm76_vm1, %v2851_v40  ;;  %5391 = vmatmul.mubr.msk.f32.vlgmr.msra.gmra.mxu0 %vm76_vm1, %v2851_v40 }
0x1e01   :  { %5405 = vmatpush3.msra.mxu0 %v6366_v20  ;;  %5412 = vmatprep.mubr.msk.f32.mxu0 %vm5810_vm0, %v5809_v0 }
0x1e02   :  { %5406 = vmatprep.subr.mxu0 %v5809_v0 }
0x1e03   :  { %5407 = vmatpush3.msra.mxu0 %v6375_v21 }
0x1e04   :  { %5408 = vmatprep.subr.mxu0 %v5809_v0 }
0x1e05   :  { %5409 = vmatpush3.msra.mxu0 %v6382_v22 }
0x1e06   :  { %5410 = vmatprep.subr.mxu0 %v5809_v0 }
0x1e07   :  { %5411 = vmatpush3.msra.mxu0 %v6389_v23 }
0x1e08   :  { %5426 = vmatprep.subr.mxu0 %v5809_v0 }
0x1e09   :  { %v3031_v55 = vpop.permute.xlu0 %3030 }
0x1e0a   :  { %5413 = vmatmul.mubr.msk.f32.vlgmr.msra.gmra.mxu0 %vm76_vm1, %v3031_v55 }
0x1e0b   :  { %5427 = vmatpush3.msra.mxu0 %v6291_v29  ;;  %5434 = vmatprep.mubr.msk.f32.mxu0 %vm5810_vm0, %v5809_v0 }
0x1e0c   :  { %5428 = vmatprep.subr.mxu0 %v5809_v0  ;;  %v3138_v58 = vpop.permute.xlu1 %3137 }
0x1e0d   :  { %5429 = vmatpush3.msra.mxu0 %v6300_v30  ;;  %v3140_v1 = vmul.f32 %v6333_v26, %v3138_v58 }
0x1e0e   :  { %5430 = vmatprep.subr.mxu0 %v5809_v0 }
0x1e0f   :  { %5431 = vmatpush3.msra.mxu0 %v6307_v32 }
0x1e10   :  { %5432 = vmatprep.subr.mxu0 %v5809_v0 }
0x1e11   :  { %5433 = vmatpush3.msra.mxu0 %v6314_v33 }
0x1e12   :  { %5435 = vmatmul.mubr.msk.f32.vlgmr.msra.gmra.mxu0 %vm76_vm1, %v3031_v55  ;;  %5448 = vmatprep.subr.mxu0 %v5809_v0 }
0x1e13   :  { %5449 = vmatpush3.msra.mxu0 %v6408_v31  ;;  %5456 = vmatprep.mubr.msk.f32.mxu0 %vm5810_vm0, %v5809_v0 }
0x1e14   :  { %5450 = vmatprep.subr.mxu0 %v5809_v0 }
0x1e15   :  { %5451 = vmatpush3.msra.mxu0 %v6417_v34 }
0x1e16   :  { %5452 = vmatprep.subr.mxu0 %v5809_v0 }
0x1e17   :  { %5453 = vmatpush3.msra.mxu0 %v6424_v35 }
0x1e18   :  { %5454 = vmatprep.subr.mxu0 %v5809_v0 }
0x1e19   :  { %5455 = vmatpush3.msra.mxu0 %v6431_v36 }
0x1e1a   :  { %5470 = vmatprep.subr.mxu0 %v5809_v0 }
0x1ec0   :  { %v2931_v29 = vpop.f32.mrf.mxu0 }
0x1ec1   :  { %v2932_v32 = vadd.f32 %v6438_v39, %v2931_v29 }
0x1ec2   :  { %v5392_v30 = vpop.f32.mrf.mxu0 }
0x1eca   :  { %v3100_v33 = vpop.f32.mrf.mxu0 }
0x1ecb   :  { %v3104_v56 = vadd.f32 %v3100_v33, %v2932_v32 }
0x1ecc   :  { %v5414_v57 = vpop.f32.mrf.mxu0 }
0x1ecd   :  { %5713 = vtanh.f32 %v3104_v56  ;;  %v3105_v62 = vmul.f32 0.5, %v3104_v56 }
0x1ed2   :  { %v3279_v2 = vpop.f32.mrf.mxu0 }
0x1ed3   :  { %v3283_v5 = vadd.f32 %v3279_v2, %v3140_v1 }
0x1ed4   :  { %v5436_v6 = vpop.f32.mrf.mxu0 }
0x1ed5   :  { %v3284_v59 = vadd.f32 %v6339_v54, %v3283_v5 }
0x1ed7   :  { %5715 = vtanh.f32 %v3284_v59  ;;  %v3285_v63 = vmul.f32 0.5, %v3284_v59 }
0x1ed8   :  { %5717 = vtanh.f32 %v3105_v62 }
0x1ed9   :  { %5719 = vtanh.f32 %v3285_v63 }
0x1eda   :  { %v5714_v60 = vpop.eup %5713 }
0x1edb   :  { %3112 = vrot.lane.b32.xlu0 %v5714_v60, %s5812_s29 }
0x1ee4   :  { %v5716_v61 = vpop.eup %5715 }
0x1ee5   :  { %3292 = vrot.lane.b32.xlu1 %v5716_v61, %s5812_s29  ;;  %v5718_v3 = vpop.eup %5717 }
0x1ee6   :  { %v3107_v4 = vmul.f32 0.5, %v5718_v3  ;;  %v5720_v11 = vpop.eup %5719 }
0x1ee7   :  { %v3287_v54 = vmul.f32 0.5, %v5720_v11 }
0x1ee8   :  { %v3108_v8 = vadd.f32 0.5, %v3107_v4 }
0x1ee9   :  { %v3288_v12 = vadd.f32 0.5, %v3287_v54 }
0x1eea   :  { %v3110_v15 = vmul.f32 %v3108_v8, %v6616_v46 }
0x1eeb   :  { %v3290_v17 = vmul.f32 %v3288_v12, %v6620_v48 }
0x1f4d   :  { %v3113_v26 = vpop.permute.xlu0 %3112 }
0x1f4e   :  { %v3115_v9 = vmul.f32 %v3113_v26, %v3108_v8 }
0x1f50   :  { %3117 = vrot.lane.b32.xlu0 %v3115_v9, %s5812_s29  ;;  %v4798_v9 = vld [vmem:[%s7064_s0 + $0x68] sm:$0xff] }
0x1f57   :  { %v3293_v13 = vpop.permute.xlu1 %3292 }
0x1f58   :  { %v3295_v14 = vmul.f32 %v3293_v13, %v3288_v12  ;;  %v6777_v13 = vld [vmem:[%s7070_s4 + $0x18] sm:$0xff] }
0x1f5a   :  { %3297 = vrot.lane.b32.xlu1 %v3295_v14, %s5812_s29  ;;  %v6786_v14 = vld [vmem:[%s7070_s4 + $0x10] sm:$0xff] }
0x1fc2   :  { %v3118_v16 = vpop.permute.xlu0 %3117 }
0x1fc3   :  { %v6672_v7 = vadd.f32 %v3118_v16, %v3110_v15  ;;  %v6793_v15 = vld [vmem:[%s7070_s4 + $0x8] sm:$0xff]  ;;  %v6800_v16 = vld [vmem:[%s7070_s4] sm:$0xff] }
0x1fc5   :  { %5721 = vtanh.f32 %v6672_v7 }
0x1fcc   :  { %v3298_v18 = vpop.permute.xlu1 %3297 }
0x1fcd   :  { %v6676_v10 = vadd.f32 %v3298_v18, %v3290_v17  ;;  %v6819_v17 = vld [vmem:[%s7069_s5 + $0x18] sm:$0xff]  ;;  %v6828_v18 = vld [vmem:[%s7069_s5 + $0x10] sm:$0xff] }
0x1fcf   :  { %5723 = vtanh.f32 %v6676_v10 }
0x1fd2   :  { %v5722_v19 = vpop.eup %5721 }
0x1fd3   :  { %3123 = vrot.lane.b32.xlu0 %v5722_v19, %s5812_s29  ;;  %v6842_v19 = vld [vmem:[%s7069_s5] sm:$0xff] }
0x1fdc   :  { %v5724_v24 = vpop.eup %5723 }
0x1fdd   :  { %3303 = vrot.lane.b32.xlu1 %v5724_v24, %s5812_s29 }
0x2045   :  { %v3124_v37 = vpop.permute.xlu0 %3123 }
0x2046   :  { %v3126_v38 = vmul.f32 %v3124_v37, %v3108_v8 }
0x2048   :  { %3128 = vrot.lane.b32.xlu0 %v3126_v38, %s5813_s27  ;;  %v6849_v38 = vld [vmem:[%s7071_s6] ss:$0 sm:$0xff] }
0x204c   :  { %3415 = vperm.xlu0 %5585, %v4794_v41  }
0x204f   :  { %v3304_v42 = vpop.permute.xlu1 %3303 }
0x2050   :  { %v3306_v43 = vmul.f32 %v3304_v42, %v3288_v12 }
0x2052   :  { %3308 = vrot.lane.b32.xlu1 %v3306_v43, %s5813_s27 }
0x20ba   :  { %v3129_v44 = vpop.permute.xlu0 %3128 }
0x20bb   :  { %3132 = vst.msk [vmem:[#allocation2 + $0x50] sm:$0xff] %vm76_vm1, %v3129_v44  ;;  %5424 = vmatmul.mubr.msk.f32.vlgmr.msra.gmra.mxu1 %vm76_vm1, %v3129_v44 }
0x20bc   :  { %5438 = vmatpush3.msra.mxu1 %v6366_v20  ;;  %5445 = vmatprep.mubr.msk.f32.mxu1 %vm5810_vm0, %v5809_v0  ;;  %v6702_v20 = vld [vmem:[%s7063_s2 + $0x18] sm:$0xff] }
0x20bd   :  { %5439 = vmatprep.subr.mxu1 %v5809_v0 }
0x20be   :  { %5440 = vmatpush3.msra.mxu1 %v6375_v21  ;;  %v6711_v21 = vld [vmem:[%s7063_s2 + $0x10] sm:$0xff] }
0x20bf   :  { %5441 = vmatprep.subr.mxu1 %v5809_v0 }
0x20c0   :  { %5442 = vmatpush3.msra.mxu1 %v6382_v22  ;;  %v6718_v22 = vld [vmem:[%s7063_s2 + $0x8] sm:$0xff] }
0x20c1   :  { %5443 = vmatprep.subr.mxu1 %v5809_v0 }
0x20c2   :  { %5444 = vmatpush3.msra.mxu1 %v6389_v23  ;;  %v6725_v23 = vld [vmem:[%s7063_s2] sm:$0xff] }
0x20c3   :  { %5459 = vmatprep.subr.mxu1 %v5809_v0 }
0x20c4   :  { %v3309_v45 = vpop.permute.xlu1 %3308 }
0x20c5   :  { %5446 = vmatmul.mubr.msk.f32.vlgmr.msra.gmra.mxu1 %vm76_vm1, %v3309_v45 }
0x20c6   :  { %5460 = vmatpush3.msra.mxu1 %v6702_v20  ;;  %5467 = vmatprep.mubr.msk.f32.mxu1 %vm5810_vm0, %v5809_v0 }
0x20c7   :  { %5461 = vmatprep.subr.mxu1 %v5809_v0  ;;  %v3416_v50 = vpop.permute.xlu0 %3415 }
0x20c8   :  { %5462 = vmatpush3.msra.mxu1 %v6711_v21 }
0x20c9   :  { %5463 = vmatprep.subr.mxu1 %v5809_v0 }
0x20ca   :  { %5464 = vmatpush3.msra.mxu1 %v6718_v22 }
0x20cb   :  { %5465 = vmatprep.subr.mxu1 %v5809_v0 }
0x20cc   :  { %5466 = vmatpush3.msra.mxu1 %v6725_v23 }
0x20cd   :  { %5468 = vmatmul.mubr.msk.f32.vlgmr.msra.gmra.mxu1 %vm76_vm1, %v3309_v45  ;;  %5481 = vmatprep.subr.mxu1 %v5809_v0 }
0x20ce   :  { %5482 = vmatpush3.msra.mxu1 %v6408_v31  ;;  %5489 = vmatprep.mubr.msk.f32.mxu1 %vm5810_vm0, %v5809_v0 }
0x20cf   :  { %5483 = vmatprep.subr.mxu1 %v5809_v0 }
0x20d0   :  { %5484 = vmatpush3.msra.mxu1 %v6417_v34  ;;  %v6744_v34 = vld [vmem:[%s7067_s1] ss:$0 sm:$0xff] }
0x20d1   :  { %5485 = vmatprep.subr.mxu1 %v5809_v0 }
0x20d2   :  { %5486 = vmatpush3.msra.mxu1 %v6424_v35  ;;  %v3418_v35 = vmul.f32 %v6744_v34, %v3416_v50 }
0x20d3   :  { %5487 = vmatprep.subr.mxu1 %v5809_v0 }
0x20d4   :  { %5488 = vmatpush3.msra.mxu1 %v6431_v36 }
0x20d5   :  { %5503 = vmatprep.subr.mxu1 %v5809_v0 }
0x217b   :  { %v3209_v46 = vpop.f32.mrf.mxu1 }
0x217c   :  { %v3210_v31 = vadd.f32 %v6438_v39, %v3209_v46 }
0x217d   :  { %v5425_v47 = vpop.f32.mrf.mxu1 }
0x2185   :  { %v3378_v25 = vpop.f32.mrf.mxu1 }
0x2186   :  { %v3382_v48 = vadd.f32 %v3378_v25, %v3210_v31 }
0x2187   :  { %v5447_v49 = vpop.f32.mrf.mxu1 }
0x2188   :  { %5725 = vtanh.f32 %v3382_v48  ;;  %v3383_v40 = vmul.f32 0.5, %v3382_v48 }
0x218d   :  { %v3557_v51 = vpop.f32.mrf.mxu1 }
0x218e   :  { %v3561_v36 = vadd.f32 %v3557_v51, %v3418_v35 }
0x218f   :  { %v5469_v27 = vpop.f32.mrf.mxu1 }
0x2190   :  { %v3562_v39 = vadd.f32 %v6750_v52, %v3561_v36 }
0x2192   :  { %5727 = vtanh.f32 %v3562_v39  ;;  %v3563_v55 = vmul.f32 0.5, %v3562_v39 }
0x2193   :  { %5729 = vtanh.f32 %v3383_v40 }
0x2194   :  { %5731 = vtanh.f32 %v3563_v55 }
0x2195   :  { %v5726_v28 = vpop.eup %5725 }
0x2196   :  { %3390 = vrot.lane.b32.xlu1 %v5726_v28, %s5812_s29 }
0x219f   :  { %v5728_v53 = vpop.eup %5727 }
0x21a0   :  { %3570 = vrot.lane.b32.xlu0 %v5728_v53, %s5812_s29  ;;  %v5730_v29 = vpop.eup %5729 }
0x21a1   :  { %v3385_v30 = vmul.f32 0.5, %v5730_v29  ;;  %v5732_v57 = vpop.eup %5731 }
0x21a2   :  { %v3565_v58 = vmul.f32 0.5, %v5732_v57 }
0x21a3   :  { %v3386_v32 = vadd.f32 0.5, %v3385_v30 }
0x21a4   :  { %v3566_v1 = vadd.f32 0.5, %v3565_v58 }
0x21a5   :  { %v3388_v6 = vmul.f32 %v3386_v32, %v6672_v7 }
0x21a6   :  { %v3568_v61 = vmul.f32 %v3566_v1, %v6676_v10  ;;  %v6835_v10 = vld [vmem:[%s7069_s5 + $0x8] sm:$0xff] }
0x2208   :  { %v3391_v33 = vpop.permute.xlu1 %3390 }
0x2209   :  { %v3393_v56 = vmul.f32 %v3391_v33, %v3386_v32 }
0x220b   :  { %3395 = vrot.lane.b32.xlu1 %v3393_v56, %s5812_s29 }
0x2212   :  { %v3571_v2 = vpop.permute.xlu0 %3570 }
0x2213   :  { %v3573_v5 = vmul.f32 %v3571_v2, %v3566_v1 }
0x2215   :  { %3575 = vrot.lane.b32.xlu0 %v3573_v5, %s5812_s29 }
0x227d   :  { %v3396_v59 = vpop.permute.xlu1 %3395 }
0x227e   :  { %v6758_v60 = vadd.f32 %v3396_v59, %v3388_v6 }
0x2280   :  { %5733 = vtanh.f32 %v6758_v60 }
0x2287   :  { %v3576_v62 = vpop.permute.xlu0 %3575 }
0x2288   :  { %v6762_v63 = vadd.f32 %v3576_v62, %v3568_v61  ;;  %v4802_v61 = vld [vmem:[%s7064_s0 + $0x70] sm:$0xff] }
0x228a   :  { %5735 = vtanh.f32 %v6762_v63 }
0x228d   :  { %v5734_v3 = vpop.eup %5733 }
0x228e   :  { %3401 = vrot.lane.b32.xlu1 %v5734_v3, %s5812_s29 }
0x2297   :  { %v5736_v4 = vpop.eup %5735 }
0x2298   :  { %3581 = vrot.lane.b32.xlu0 %v5736_v4, %s5812_s29 }
0x2300   :  { %v3402_v8 = vpop.permute.xlu1 %3401 }
0x2301   :  { %v3404_v26 = vmul.f32 %v3402_v8, %v3386_v32 }
0x2303   :  { %3406 = vrot.lane.b32.xlu1 %v3404_v26, %s5813_s27 }
0x2307   :  { %3693 = vperm.xlu1 %5586, %v4798_v9  }
0x230a   :  { %v3582_v11 = vpop.permute.xlu0 %3581 }
0x230b   :  { %v3584_v54 = vmul.f32 %v3582_v11, %v3566_v1 }
0x230d   :  { %3586 = vrot.lane.b32.xlu0 %v3584_v54, %s5813_s27 }
0x2375   :  { %v3407_v12 = vpop.permute.xlu1 %3406 }
0x2376   :  { %3410 = vst.msk [vmem:[#allocation2 + $0x58] sm:$0xff] %vm76_vm1, %v3407_v12  ;;  %5457 = vmatmul.mubr.msk.f32.vlgmr.msra.gmra.mxu0 %vm76_vm1, %v3407_v12 }
0x2377   :  { %5471 = vmatpush3.msra.mxu0 %v6777_v13  ;;  %5478 = vmatprep.mubr.msk.f32.mxu0 %vm5810_vm0, %v5809_v0 }
0x2378   :  { %5472 = vmatprep.subr.mxu0 %v5809_v0 }
0x2379   :  { %5473 = vmatpush3.msra.mxu0 %v6786_v14 }
0x237a   :  { %5474 = vmatprep.subr.mxu0 %v5809_v0 }
0x237b   :  { %5475 = vmatpush3.msra.mxu0 %v6793_v15 }
0x237c   :  { %5476 = vmatprep.subr.mxu0 %v5809_v0 }
0x237d   :  { %5477 = vmatpush3.msra.mxu0 %v6800_v16 }
0x237e   :  { %5492 = vmatprep.subr.mxu0 %v5809_v0 }
0x237f   :  { %v3587_v7 = vpop.permute.xlu0 %3586 }
0x2380   :  { %5479 = vmatmul.mubr.msk.f32.vlgmr.msra.gmra.mxu0 %vm76_vm1, %v3587_v7 }
0x2381   :  { %5493 = vmatpush3.msra.mxu0 %v6702_v20  ;;  %5500 = vmatprep.mubr.msk.f32.mxu0 %vm5810_vm0, %v5809_v0 }
0x2382   :  { %5494 = vmatprep.subr.mxu0 %v5809_v0  ;;  %v3694_v45 = vpop.permute.xlu1 %3693 }
0x2383   :  { %5495 = vmatpush3.msra.mxu0 %v6711_v21  ;;  %v3696_v46 = vmul.f32 %v6744_v34, %v3694_v45 }
0x2384   :  { %5496 = vmatprep.subr.mxu0 %v5809_v0 }
0x2385   :  { %5497 = vmatpush3.msra.mxu0 %v6718_v22 }
0x2386   :  { %5498 = vmatprep.subr.mxu0 %v5809_v0 }
0x2387   :  { %5499 = vmatpush3.msra.mxu0 %v6725_v23 }
0x2388   :  { %5501 = vmatmul.mubr.msk.f32.vlgmr.msra.gmra.mxu0 %vm76_vm1, %v3587_v7  ;;  %5514 = vmatprep.subr.mxu0 %v5809_v0 }
0x2389   :  { %5515 = vmatpush3.msra.mxu0 %v6819_v17  ;;  %5522 = vmatprep.mubr.msk.f32.mxu0 %vm5810_vm0, %v5809_v0 }
0x238a   :  { %5516 = vmatprep.subr.mxu0 %v5809_v0 }
0x238b   :  { %5517 = vmatpush3.msra.mxu0 %v6828_v18 }
0x238c   :  { %5518 = vmatprep.subr.mxu0 %v5809_v0 }
0x238d   :  { %5519 = vmatpush3.msra.mxu0 %v6835_v10 }
0x238e   :  { %5520 = vmatprep.subr.mxu0 %v5809_v0 }
0x238f   :  { %5521 = vmatpush3.msra.mxu0 %v6842_v19 }
0x2390   :  { %5536 = vmatprep.subr.mxu0 %v5809_v0 }
0x2436   :  { %v3487_v24 = vpop.f32.mrf.mxu0 }
0x2437   :  { %v3488_v41 = vadd.f32 %v6849_v38, %v3487_v24 }
0x2438   :  { %v5458_v37 = vpop.f32.mrf.mxu0 }
0x2440   :  { %v3656_v42 = vpop.f32.mrf.mxu0 }
0x2441   :  { %v3660_v43 = vadd.f32 %v3656_v42, %v3488_v41 }
0x2442   :  { %v5480_v44 = vpop.f32.mrf.mxu0 }
0x2443   :  { %5737 = vtanh.f32 %v3660_v43  ;;  %v3661_v35 = vmul.f32 0.5, %v3660_v43 }
0x2448   :  { %v3835_v47 = vpop.f32.mrf.mxu0 }
0x2449   :  { %v3839_v31 = vadd.f32 %v3835_v47, %v3696_v46 }
0x244a   :  { %v5502_v25 = vpop.f32.mrf.mxu0 }
0x244b   :  { %v3840_v48 = vadd.f32 %v6750_v52, %v3839_v31 }
0x244d   :  { %5739 = vtanh.f32 %v3840_v48  ;;  %v3841_v51 = vmul.f32 0.5, %v3840_v48 }
0x244e   :  { %5741 = vtanh.f32 %v3661_v35 }
0x244f   :  { %5743 = vtanh.f32 %v3841_v51 }
0x2450   :  { %v5738_v49 = vpop.eup %5737 }
0x2451   :  { %3668 = vrot.lane.b32.xlu0 %v5738_v49, %s5812_s29 }
0x245a   :  { %v5740_v50 = vpop.eup %5739 }
0x245b   :  { %3848 = vrot.lane.b32.xlu1 %v5740_v50, %s5812_s29  ;;  %v5742_v36 = vpop.eup %5741 }
0x245c   :  { %v3663_v27 = vmul.f32 0.5, %v5742_v36  ;;  %v5744_v40 = vpop.eup %5743 }
0x245d   :  { %v3843_v55 = vmul.f32 0.5, %v5744_v40 }
0x245e   :  { %v3664_v39 = vadd.f32 0.5, %v3663_v27 }
0x245f   :  { %v3844_v29 = vadd.f32 0.5, %v3843_v55 }
0x2460   :  { %v3666_v33 = vmul.f32 %v3664_v39, %v6758_v60 }
0x2461   :  { %v3846_v58 = vmul.f32 %v3844_v29, %v6762_v63 }
0x24c3   :  { %v3669_v28 = vpop.permute.xlu0 %3668 }
0x24c4   :  { %v3671_v53 = vmul.f32 %v3669_v28, %v3664_v39 }
0x24c6   :  { %3673 = vrot.lane.b32.xlu0 %v3671_v53, %s5812_s29 }
0x24cd   :  { %v3849_v30 = vpop.permute.xlu1 %3848 }
0x24ce   :  { %v3851_v32 = vmul.f32 %v3849_v30, %v3844_v29 }
0x24d0   :  { %3853 = vrot.lane.b32.xlu1 %v3851_v32, %s5812_s29  ;;  %v4806_v32 = vld [vmem:[%s7064_s0 + $0x78] sm:$0xff] }
0x2538   :  { %v3674_v56 = vpop.permute.xlu0 %3673 }
0x2539   :  { %v6859_v57 = vadd.f32 %v3674_v56, %v3666_v33 }
0x253b   :  { %5745 = vtanh.f32 %v6859_v57 }
0x2542   :  { %v3854_v1 = vpop.permute.xlu1 %3853 }
0x2543   :  { %v6863_v2 = vadd.f32 %v3854_v1, %v3846_v58 }
0x2545   :  { %5747 = vtanh.f32 %v6863_v2 }
0x2548   :  { %v5746_v5 = vpop.eup %5745 }
0x2549   :  { %3679 = vrot.lane.b32.xlu0 %v5746_v5, %s5812_s29 }
0x2552   :  { %v5748_v6 = vpop.eup %5747 }
0x2553   :  { %3859 = vrot.lane.b32.xlu1 %v5748_v6, %s5812_s29 }
0x25bb   :  { %v3680_v59 = vpop.permute.xlu0 %3679 }
0x25bc   :  { %v3682_v60 = vmul.f32 %v3680_v59, %v3664_v39 }
0x25be   :  { %3684 = vrot.lane.b32.xlu0 %v3682_v60, %s5813_s27 }
0x25c2   :  { %3971 = vperm.xlu0 %5585, %v4802_v61  }
0x25c5   :  { %v3860_v62 = vpop.permute.xlu1 %3859 }
0x25c6   :  { %v3862_v63 = vmul.f32 %v3860_v62, %v3844_v29 }
0x25c8   :  { %3864 = vrot.lane.b32.xlu1 %v3862_v63, %s5813_s27 }
0x2630   :  { %v3685_v3 = vpop.permute.xlu0 %3684 }
0x2631   :  { %3688 = vst.msk [vmem:[#allocation2 + $0x60] sm:$0xff] %vm76_vm1, %v3685_v3  ;;  %5490 = vmatmul.mubr.msk.f32.vlgmr.msra.gmra.mxu1 %vm76_vm1, %v3685_v3 }
0x2632   :  { %5504 = vmatpush3.msra.mxu1 %v6777_v13  ;;  %5511 = vmatprep.mubr.msk.f32.mxu1 %vm5810_vm0, %v5809_v0 }
0x2633   :  { %5505 = vmatprep.subr.mxu1 %v5809_v0 }
0x2634   :  { %5506 = vmatpush3.msra.mxu1 %v6786_v14 }
0x2635   :  { %5507 = vmatprep.subr.mxu1 %v5809_v0 }
0x2636   :  { %5508 = vmatpush3.msra.mxu1 %v6793_v15 }
0x2637   :  { %5509 = vmatprep.subr.mxu1 %v5809_v0 }
0x2638   :  { %5510 = vmatpush3.msra.mxu1 %v6800_v16 }
0x2639   :  { %5525 = vmatprep.subr.mxu1 %v5809_v0 }
0x263a   :  { %v3865_v4 = vpop.permute.xlu1 %3864 }
0x263b   :  { %5512 = vmatmul.mubr.msk.f32.vlgmr.msra.gmra.mxu1 %vm76_vm1, %v3865_v4 }
0x263c   :  { %5526 = vmatpush3.msra.mxu1 %v6702_v20  ;;  %5533 = vmatprep.mubr.msk.f32.mxu1 %vm5810_vm0, %v5809_v0 }
0x263d   :  { %5527 = vmatprep.subr.mxu1 %v5809_v0  ;;  %v3972_v7 = vpop.permute.xlu0 %3971 }
0x263e   :  { %5528 = vmatpush3.msra.mxu1 %v6711_v21 }
0x263f   :  { %5529 = vmatprep.subr.mxu1 %v5809_v0 }
0x2640   :  { %5530 = vmatpush3.msra.mxu1 %v6718_v22 }
0x2641   :  { %5531 = vmatprep.subr.mxu1 %v5809_v0 }
0x2642   :  { %5532 = vmatpush3.msra.mxu1 %v6725_v23 }
0x2643   :  { %5534 = vmatmul.mubr.msk.f32.vlgmr.msra.gmra.mxu1 %vm76_vm1, %v3865_v4  ;;  %5547 = vmatprep.subr.mxu1 %v5809_v0 }
0x2644   :  { %5548 = vmatpush3.msra.mxu1 %v6819_v17  ;;  %5555 = vmatprep.mubr.msk.f32.mxu1 %vm5810_vm0, %v5809_v0  ;;  %v3974_v17 = vmul.f32 %v6744_v34, %v3972_v7 }
0x2645   :  { %5549 = vmatprep.subr.mxu1 %v5809_v0 }
0x2646   :  { %5550 = vmatpush3.msra.mxu1 %v6828_v18 }
0x2647   :  { %5551 = vmatprep.subr.mxu1 %v5809_v0 }
0x2648   :  { %5552 = vmatpush3.msra.mxu1 %v6835_v10 }
0x2649   :  { %5553 = vmatprep.subr.mxu1 %v5809_v0 }
0x264a   :  { %5554 = vmatpush3.msra.mxu1 %v6842_v19 }
0x264b   :  { %5569 = vmatprep.subr.mxu1 %v5809_v0 }
0x26f1   :  { %v3765_v8 = vpop.f32.mrf.mxu1 }
0x26f2   :  { %v3766_v9 = vadd.f32 %v6849_v38, %v3765_v8 }
0x26f3   :  { %v5491_v26 = vpop.f32.mrf.mxu1 }
0x26fb   :  { %v3934_v11 = vpop.f32.mrf.mxu1 }
0x26fc   :  { %v3938_v54 = vadd.f32 %v3934_v11, %v3766_v9 }
0x26fd   :  { %v5513_v12 = vpop.f32.mrf.mxu1 }
0x26fe   :  { %5749 = vtanh.f32 %v3938_v54  ;;  %v3939_v42 = vmul.f32 0.5, %v3938_v54 }
0x2703   :  { %v4113_v18 = vpop.f32.mrf.mxu1 }
0x2704   :  { %v4117_v24 = vadd.f32 %v4113_v18, %v3974_v17 }
0x2705   :  { %v5535_v10 = vpop.f32.mrf.mxu1 }
0x2706   :  { %v4118_v37 = vadd.f32 %v6750_v52, %v4117_v24 }
0x2708   :  { %5751 = vtanh.f32 %v4118_v37  ;;  %v4119_v43 = vmul.f32 0.5, %v4118_v37 }
0x2709   :  { %5753 = vtanh.f32 %v3939_v42 }
0x270a   :  { %5755 = vtanh.f32 %v4119_v43 }
0x270b   :  { %v5750_v19 = vpop.eup %5749 }
0x270c   :  { %3946 = vrot.lane.b32.xlu1 %v5750_v19, %s5812_s29 }
0x2715   :  { %v5752_v41 = vpop.eup %5751 }
0x2716   :  { %4126 = vrot.lane.b32.xlu0 %v5752_v41, %s5812_s29  ;;  %v5754_v44 = vpop.eup %5753 }
0x2717   :  { %v3941_v45 = vmul.f32 0.5, %v5754_v44  ;;  %v5756_v25 = vpop.eup %5755 }
0x2718   :  { %v4121_v48 = vmul.f32 0.5, %v5756_v25 }
0x2719   :  { %v3942_v46 = vadd.f32 0.5, %v3941_v45 }
0x271a   :  { %v4122_v49 = vadd.f32 0.5, %v4121_v48 }
0x271b   :  { %v3944_v51 = vmul.f32 %v3942_v46, %v6859_v57 }
0x271c   :  { %v4124_v39 = vmul.f32 %v4122_v49, %v6863_v2 }
0x277e   :  { %v3947_v47 = vpop.permute.xlu1 %3946 }
0x277f   :  { %v3949_v31 = vmul.f32 %v3947_v47, %v3942_v46 }
0x2781   :  { %3951 = vrot.lane.b32.xlu1 %v3949_v31, %s5812_s29 }
0x2788   :  { %v4127_v50 = vpop.permute.xlu0 %4126 }
0x2789   :  { %v4129_v35 = vmul.f32 %v4127_v50, %v4122_v49 }
0x278b   :  { %4131 = vrot.lane.b32.xlu0 %v4129_v35, %s5812_s29 }
0x27f3   :  { %v3952_v36 = vpop.permute.xlu1 %3951 }
0x27f4   :  { %v6915_v27 = vadd.f32 %v3952_v36, %v3944_v51 }
0x27f6   :  { %5757 = vtanh.f32 %v6915_v27 }
0x27fd   :  { %v4132_v28 = vpop.permute.xlu0 %4131 }
0x27fe   :  { %v6919_v53 = vadd.f32 %v4132_v28, %v4124_v39 }
0x2800   :  { %5759 = vtanh.f32 %v6919_v53 }
0x2803   :  { %v5758_v40 = vpop.eup %5757 }
0x2804   :  { %3957 = vrot.lane.b32.xlu1 %v5758_v40, %s5812_s29 }
0x280d   :  { %v5760_v55 = vpop.eup %5759 }
0x280e   :  { %4137 = vrot.lane.b32.xlu0 %v5760_v55, %s5812_s29 }
0x2876   :  { %v3958_v29 = vpop.permute.xlu1 %3957 }
0x2877   :  { %v3960_v30 = vmul.f32 %v3958_v29, %v3942_v46 }
0x2879   :  { %3962 = vrot.lane.b32.xlu1 %v3960_v30, %s5813_s27 }
0x287d   :  { %4249 = vperm.xlu1 %5586, %v4806_v32  }
0x2880   :  { %v4138_v33 = vpop.permute.xlu0 %4137 }
0x2881   :  { %v4140_v56 = vmul.f32 %v4138_v33, %v4122_v49 }
0x2883   :  { %4142 = vrot.lane.b32.xlu0 %v4140_v56, %s5813_s27  ;;  %v4523_v56 = vld [vmem:[#allocation2] sm:$0xff] }
0x28eb   :  { %v3963_v57 = vpop.permute.xlu1 %3962 }
0x28ec   :  { %3966 = vst.msk [vmem:[#allocation2 + $0x68] sm:$0xff] %vm76_vm1, %v3963_v57  ;;  %5523 = vmatmul.mubr.msk.f32.vlgmr.msra.gmra.mxu0 %vm76_vm1, %v3963_v57 }
0x28ed   :  { %5537 = vmatpush3.msra.mxu0 %v6777_v13  ;;  %5544 = vmatprep.mubr.msk.f32.mxu0 %vm5810_vm0, %v5809_v0 }
0x28ee   :  { %5538 = vmatprep.subr.mxu0 %v5809_v0 }
0x28ef   :  { %5539 = vmatpush3.msra.mxu0 %v6786_v14 }
0x28f0   :  { %5540 = vmatprep.subr.mxu0 %v5809_v0 }
0x28f1   :  { %5541 = vmatpush3.msra.mxu0 %v6793_v15 }
0x28f2   :  { %5542 = vmatprep.subr.mxu0 %v5809_v0 }
0x28f3   :  { %5543 = vmatpush3.msra.mxu0 %v6800_v16 }
0x28f4   :  { %5558 = vmatprep.subr.mxu0 %v5809_v0 }
0x28f5   :  { %v4143_v58 = vpop.permute.xlu0 %4142 }
0x28f6   :  { %5545 = vmatmul.mubr.msk.f32.vlgmr.msra.gmra.mxu0 %vm76_vm1, %v4143_v58 }
0x28f7   :  { %5559 = vmatpush3.msra.mxu0 %v6702_v20  ;;  %5566 = vmatprep.mubr.msk.f32.mxu0 %vm5810_vm0, %v5809_v0 }
0x28f8   :  { %5560 = vmatprep.subr.mxu0 %v5809_v0  ;;  %v4250_v60 = vpop.permute.xlu1 %4249 }
0x28f9   :  { %5561 = vmatpush3.msra.mxu0 %v6711_v21  ;;  %v4252_v21 = vmul.f32 %v6744_v34, %v4250_v60 }
0x28fa   :  { %5562 = vmatprep.subr.mxu0 %v5809_v0 }
0x28fb   :  { %5563 = vmatpush3.msra.mxu0 %v6718_v22 }
0x28fc   :  { %5564 = vmatprep.subr.mxu0 %v5809_v0 }
0x28fd   :  { %5565 = vmatpush3.msra.mxu0 %v6725_v23 }
0x28fe   :  { %5567 = vmatmul.mubr.msk.f32.vlgmr.msra.gmra.mxu0 %vm76_vm1, %v4143_v58  ;;  %v4531_v58 = vld [vmem:[#allocation2 + $0x40] sm:$0xff] }
0x29ac   :  { %v4043_v1 = vpop.f32.mrf.mxu0 }
0x29ad   :  { %v4044_v20 = vadd.f32 %v6849_v38, %v4043_v1 }
0x29ae   :  { %v5524_v2 = vpop.f32.mrf.mxu0 }
0x29b6   :  { %v4212_v5 = vpop.f32.mrf.mxu0 }
0x29b7   :  { %v4216_v6 = vadd.f32 %v4212_v5, %v4044_v20  ;;  %v4532_v20 = vld [vmem:[#allocation2 + $0x48] sm:$0xff] }
0x29b8   :  { %v5546_v59 = vpop.f32.mrf.mxu0 }
0x29b9   :  { %5761 = vtanh.f32 %v4216_v6  ;;  %v4217_v4 = vmul.f32 0.5, %v4216_v6  ;;  %v4533_v59 = vld [vmem:[#allocation2 + $0x50] sm:$0xff] }
0x29be   :  { %v4391_v61 = vpop.f32.mrf.mxu0 }
0x29bf   :  { %v4395_v62 = vadd.f32 %v4391_v61, %v4252_v21  ;;  %v4534_v61 = vld [vmem:[#allocation2 + $0x58] sm:$0xff] }
0x29c0   :  { %v5568_v22 = vpop.f32.mrf.mxu0 }
0x29c1   :  { %v4396_v63 = vadd.f32 %v6750_v52, %v4395_v62 }
0x29c3   :  { %5763 = vtanh.f32 %v4396_v63  ;;  %v4397_v8 = vmul.f32 0.5, %v4396_v63  ;;  %v4535_v63 = vld [vmem:[#allocation2 + $0x60] sm:$0xff] }
0x29c4   :  { %5765 = vtanh.f32 %v4217_v4  ;;  %v4536_v4 = vld [vmem:[#allocation2 + $0x68] sm:$0xff] }
0x29c5   :  { %5767 = vtanh.f32 %v4397_v8 }
0x29c6   :  { %v5762_v23 = vpop.eup %5761 }
0x29c7   :  { %4224 = vrot.lane.b32.xlu0 %v5762_v23, %s5812_s29 }
0x29d0   :  { %v5764_v3 = vpop.eup %5763 }
0x29d1   :  { %4404 = vrot.lane.b32.xlu1 %v5764_v3, %s5812_s29  ;;  %v5766_v26 = vpop.eup %5765 }
0x29d2   :  { %v4219_v9 = vmul.f32 0.5, %v5766_v26  ;;  %v5768_v12 = vpop.eup %5767 }
0x29d3   :  { %v4399_v52 = vmul.f32 0.5, %v5768_v12 }
0x29d4   :  { %v4220_v11 = vadd.f32 0.5, %v4219_v9 }
0x29d5   :  { %v4400_v7 = vadd.f32 0.5, %v4399_v52 }
0x29d6   :  { %v4222_v24 = vmul.f32 %v4220_v11, %v6915_v27 }
0x29d7   :  { %v4402_v19 = vmul.f32 %v4400_v7, %v6919_v53  ;;  %v4524_v53 = vld [vmem:[#allocation2 + $0x8] sm:$0xff] }
0x2a39   :  { %v4225_v34 = vpop.permute.xlu0 %4224 }
0x2a3a   :  { %v4227_v54 = vmul.f32 %v4225_v34, %v4220_v11 }
0x2a3c   :  { %4229 = vrot.lane.b32.xlu0 %v4227_v54, %s5812_s29 }
0x2a43   :  { %v4405_v17 = vpop.permute.xlu1 %4404 }
0x2a44   :  { %v4407_v18 = vmul.f32 %v4405_v17, %v4400_v7  ;;  %v4525_v17 = vld [vmem:[#allocation2 + $0x10] sm:$0xff] }
0x2a46   :  { %4409 = vrot.lane.b32.xlu1 %v4407_v18, %s5812_s29 }
0x2aae   :  { %v4230_v10 = vpop.permute.xlu0 %4229 }
0x2aaf   :  { %v4232_v37 = vadd.f32 %v4230_v10, %v4222_v24  ;;  %v4526_v24 = vld [vmem:[#allocation2 + $0x18] sm:$0xff] }
0x2ab1   :  { %5769 = vtanh.f32 %v4232_v37 }
0x2ab8   :  { %v4410_v41 = vpop.permute.xlu1 %4409 }
0x2ab9   :  { %v4412_v42 = vadd.f32 %v4410_v41, %v4402_v19  ;;  %v4527_v19 = vld [vmem:[#allocation2 + $0x20] sm:$0xff] }
0x2abb   :  { %5771 = vtanh.f32 %v4412_v42 }
0x2abe   :  { %v5770_v43 = vpop.eup %5769 }
0x2abf   :  { %4235 = vrot.lane.b32.xlu0 %v5770_v43, %s5812_s29  ;;  %v4528_v43 = vld [vmem:[#allocation2 + $0x28] sm:$0xff] }
0x2ac8   :  { %v5772_v44 = vpop.eup %5771 }
0x2ac9   :  { %4415 = vrot.lane.b32.xlu1 %v5772_v44, %s5812_s29 }
0x2b31   :  { %v4236_v45 = vpop.permute.xlu0 %4235 }
0x2b32   :  { %v4238_v46 = vmul.f32 %v4236_v45, %v4220_v11  ;;  %v16_v11 = vstv %s7073_s10 }
0x2b33   :  { %17 = vst [vmem:[#allocation3] sm:$0x1] %v16_v11 }
0x2b34   :  { %4240 = vrot.lane.b32.xlu0 %v4238_v46, %s5813_s27  ;;  %v4529_v46 = vld [vmem:[#allocation2 + $0x30] sm:$0xff] }
0x2b3b   :  { %v4416_v47 = vpop.permute.xlu1 %4415 }
0x2b3c   :  { %v4418_v31 = vmul.f32 %v4416_v47, %v4400_v7 }
0x2b3e   :  { %4420 = vrot.lane.b32.xlu1 %v4418_v31, %s5813_s27 }
0x2ba6   :  { %v4241_v25 = vpop.permute.xlu0 %4240 }
0x2ba7   :  { %4244 = vst.msk [vmem:[#allocation2 + $0x70] sm:$0xff] %vm76_vm1, %v4241_v25  ;;  %5556 = vmatmul.mubr.msk.f32.vlgmr.msra.gmra.mxu1 %vm76_vm1, %v4241_v25  ;;  %v4530_v25 = vld [vmem:[#allocation2 + $0x38] sm:$0xff] }
0x2ba8   :  { %5570 = vmatpush3.msra.mxu1 %v6777_v13  ;;  %5577 = vmatprep.mubr.msk.f32.mxu1 %vm5810_vm0, %v5809_v0 }
0x2ba9   :  { %5571 = vmatprep.subr.mxu1 %v5809_v0 }
0x2baa   :  { %5572 = vmatpush3.msra.mxu1 %v6786_v14 }
0x2bab   :  { %5573 = vmatprep.subr.mxu1 %v5809_v0 }
0x2bac   :  { %5574 = vmatpush3.msra.mxu1 %v6793_v15 }
0x2bad   :  { %5575 = vmatprep.subr.mxu1 %v5809_v0 }
0x2bae   :  { %5576 = vmatpush3.msra.mxu1 %v6800_v16  ;;  %v4537_v9 = vld [vmem:[#allocation2 + $0x70] sm:$0xff] }
0x2bb0   :  { %v4421_v48 = vpop.permute.xlu1 %4420 }
0x2bb1   :  { %5578 = vmatmul.mubr.msk.f32.vlgmr.msra.gmra.mxu1 %vm76_vm1, %v4421_v48 }
0x2c67   :  { %v4321_v49 = vpop.f32.mrf.mxu1 }
0x2c68   :  { %v4322_v50 = vadd.f32 %v6849_v38, %v4321_v49  ;;  %v6983_v38 = vld [vmem:[%s7072_s9] ss:$0 sm:$0xff] }
0x2c69   :  { %v5557_v13 = vpop.f32.mrf.mxu1  ;;  %v4546_v40 = vmul.f32 %v6983_v38, %v4524_v53  ;;  %v4545_v57 = vmul.f32 %v6983_v38, %v4523_v56  ;;  %v4553_v2 = vmul.f32 %v6983_v38, %v4531_v58  ;;  %v4554_v6 = vmul.f32 %v6983_v38, %v4532_v20 }
0x2c6a   :  { %v4555_v21 = vmul.f32 %v6983_v38, %v4533_v59  ;;  %v4556_v22 = vmul.f32 %v6983_v38, %v4534_v61  ;;  %v4557_v3 = vmul.f32 %v6983_v38, %v4535_v63  ;;  %v4558_v26 = vmul.f32 %v6983_v38, %v4536_v4 }
0x2c6b   :  { %v4564_v55 = vsel %vm76_vm1, %v4546_v40, 0.0  ;;  %v4561_v1 = vsel %vm76_vm1, %v4545_v57, 0.0  ;;  %v4585_v5 = vsel %vm76_vm1, %v4553_v2, 0.0  ;;  %v4588_v60 = vsel %vm76_vm1, %v4554_v6, 0.0 }
0x2c6c   :  { %v4591_v62 = vsel %vm76_vm1, %v4555_v21, 0.0  ;;  %v4594_v23 = vsel %vm76_vm1, %v4556_v22, 0.0  ;;  %v4597_v8 = vsel %vm76_vm1, %v4557_v3, 0.0  ;;  %v4600_v34 = vsel %vm76_vm1, %v4558_v26, 0.0 }
0x2c6d   :  { %v4559_v54 = vmul.f32 %v6983_v38, %v4537_v9  ;;  %v4547_v18 = vmul.f32 %v6983_v38, %v4525_v17  ;;  %v4549_v42 = vmul.f32 %v6983_v38, %v4527_v19  ;;  %v4550_v45 = vmul.f32 %v6983_v38, %v4528_v43 }
0x2c6e   :  { %v4551_v31 = vmul.f32 %v6983_v38, %v4529_v46  ;;  %v4552_v49 = vmul.f32 %v6983_v38, %v4530_v25  ;;  %v4650_v53 = vlaneseq }
0x2c6f   :  { %v4603_v12 = vsel %vm76_vm1, %v4559_v54, 0.0  ;;  %v4567_v10 = vsel %vm76_vm1, %v4547_v18, 0.0  ;;  %v4573_v44 = vsel %vm76_vm1, %v4549_v42, 0.0  ;;  %v4576_v47 = vsel %vm76_vm1, %v4550_v45, 0.0 }
0x2c70   :  { %v4579_v48 = vsel %vm76_vm1, %v4551_v31, 0.0  ;;  %v4582_v13 = vsel %vm76_vm1, %v4552_v49, 0.0 }
0x2c71   :  { %v4490_v35 = vpop.f32.mrf.mxu1 }
0x2c72   :  { %v4494_v51 = vadd.f32 %v4490_v35, %v4322_v50  ;;  %v4811_v50 = vld [vmem:[#allocation3] ss:$0 sm:$0xff] }
0x2c73   :  { %v5579_v36 = vpop.f32.mrf.mxu1 }
0x2c74   :  { %5773 = vtanh.f32 %v4494_v51  ;;  %v4495_v27 = vmul.f32 0.5, %v4494_v51 }
0x2c76   :  { %5775 = vtanh.f32 %v4495_v27 }
0x2c81   :  { %v5774_v14 = vpop.eup %5773 }
0x2c82   :  { %4502 = vrot.lane.b32.xlu0 %v5774_v14, %s5812_s29 }
0x2c83   :  { %v5776_v15 = vpop.eup %5775 }
0x2c84   :  { %v4497_v0 = vmul.f32 0.5, %v5776_v15 }
0x2c86   :  { %v4498_v39 = vadd.f32 0.5, %v4497_v0 }
0x2c88   :  { %v4500_v29 = vmul.f32 %v4498_v39, %v4232_v37  ;;  %v4548_v37 = vmul.f32 %v6983_v38, %v4526_v24 }
0x2c8a   :  { %v4570_v41 = vsel %vm76_vm1, %v4548_v37, 0.0 }
0x2cf4   :  { %v4503_v16 = vpop.permute.xlu0 %4502 }
0x2cf5   :  { %v4505_v28 = vmul.f32 %v4503_v16, %v4498_v39 }
0x2cf7   :  { %4507 = vrot.lane.b32.xlu1 %v4505_v28, %s5812_s29 }
0x2d1b   :  { %4565 = vadd.xlane.f32.xlu1 %v4564_v55  ;;  %v4651_v55 = vand.u32 127, %v4650_v53 }
0x2d69   :  { %v4508_v30 = vpop.permute.xlu1 %4507 }
0x2d6a   :  { %v4510_v32 = vadd.f32 %v4508_v30, %v4500_v29  ;;  %v4653_v29 = vshrl.u32 %v4650_v53, 7 }
0x2d6c   :  { %5777 = vtanh.f32 %v4510_v32 }
0x2d79   :  { %v5778_v33 = vpop.eup %5777 }
0x2d7a   :  { %4513 = vrot.lane.b32.xlu0 %v5778_v33, %s5812_s29  ;;  %v7023_v33 = vsub.s32 %v4651_v55, %v4653_v29 }
0x2d99   :  { %4562 = vadd.xlane.f32.xlu0 %v4561_v1 }
0x2d9d   :  { %4586 = vadd.xlane.f32.xlu0 %v4585_v5 }
0x2da1   :  { %4589 = vadd.xlane.f32.xlu0 %v4588_v60 }
0x2da4   :  { %v4566_v35 = vpop.xlane.xlu1 %4565 }
0x2da5   :  { %4592 = vadd.xlane.f32.xlu0 %v4591_v62 }
0x2da9   :  { %4595 = vadd.xlane.f32.xlu0 %v4594_v23 }
0x2dad   :  { %4598 = vadd.xlane.f32.xlu0 %v4597_v8 }
0x2db1   :  { %4601 = vadd.xlane.f32.xlu0 %v4600_v34 }
0x2db5   :  { %4604 = vadd.xlane.f32.xlu0 %v4603_v12 }
0x2dec   :  { %v4514_v52 = vpop.permute.xlu0 %4513 }
0x2ded   :  { %v4516_v7 = vmul.f32 %v4514_v52, %v4498_v39 }
0x2def   :  { %4518 = vrot.lane.b32.xlu1 %v4516_v7, %s5813_s27 }
0x2e13   :  { %4568 = vadd.xlane.f32.xlu1 %v4567_v10 }
0x2e17   :  { %4571 = vadd.xlane.f32.xlu1 %v4570_v41 }
0x2e1b   :  { %4574 = vadd.xlane.f32.xlu1 %v4573_v44 }
0x2e1f   :  { %4577 = vadd.xlane.f32.xlu1 %v4576_v47 }
0x2e22   :  { %v4563_v30 = vpop.xlane.xlu0 %4562 }
0x2e23   :  { %4580 = vadd.xlane.f32.xlu1 %v4579_v48 }
0x2e26   :  { %v4587_v34 = vpop.xlane.xlu0 %4586 }
0x2e27   :  { %4583 = vadd.xlane.f32.xlu1 %v4582_v13 }
0x2e2a   :  { %v4590_v54 = vpop.xlane.xlu0 %4589 }
0x2e2e   :  { %v4593_v12 = vpop.xlane.xlu0 %4592 }
0x2e32   :  { %v4596_v52 = vpop.xlane.xlu0 %4595 }
0x2e36   :  { %v4599_v18 = vpop.xlane.xlu0 %4598 }
0x2e38   :  { %4615 = vperm.xlu1 %5586, %v4811_v50  }
0x2e3a   :  { %v4602_v43 = vpop.xlane.xlu0 %4601 }
0x2e3e   :  { %v4605_v25 = vpop.xlane.xlu0 %4604 }
0x2e61   :  { %v4519_v51 = vpop.permute.xlu1 %4518 }
0x2e62   :  { %4522 = vst.msk [vmem:[#allocation2 + $0x78] sm:$0xff] %vm76_vm1, %v4519_v51 }
0x2e69   :  { %v4538_v36 = vld [vmem:[#allocation2 + $0x78] sm:$0xff] }
0x2e6a   :  { %v4560_v14 = vmul.f32 %v6983_v38, %v4538_v36 }
0x2e6c   :  { %v4606_v27 = vsel %vm76_vm1, %v4560_v14, 0.0 }
0x2e6d   :  { %4607 = vadd.xlane.f32.xlu0 %v4606_v27 }
0x2e9c   :  { %v4569_v15 = vpop.xlane.xlu1 %4568 }
0x2ea0   :  { %v4572_v0 = vpop.xlane.xlu1 %4571 }
0x2ea4   :  { %v4575_v39 = vpop.xlane.xlu1 %4574 }
0x2ea8   :  { %v4578_v16 = vpop.xlane.xlu1 %4577 }
0x2eac   :  { %v4581_v28 = vpop.xlane.xlu1 %4580 }
0x2eb0   :  { %v4584_v40 = vpop.xlane.xlu1 %4583 }
0x2eb4   :  { %v4616_v32 = vpop.permute.xlu1 %4615 }
0x2eb5   :  { %v4618_v56 = vadd.f32 %v4616_v32, %v4563_v30  ;;  %v4619_v57 = vadd.f32 %v4616_v32, %v4566_v35  ;;  %v4620_v58 = vadd.f32 %v4616_v32, %v4569_v15  ;;  %v4621_v38 = vadd.f32 %v4616_v32, %v4572_v0 }
0x2eb6   :  { %v4622_v2 = vadd.f32 %v4616_v32, %v4575_v39  ;;  %v4623_v6 = vadd.f32 %v4616_v32, %v4578_v16  ;;  %v4624_v59 = vadd.f32 %v4616_v32, %v4581_v28  ;;  %v4625_v60 = vadd.f32 %v4616_v32, %v4584_v40 }
0x2eb7   :  { %v4655_v1 = vrot.slane %v4618_v56, %v7023_v33  ;;  %v4659_v20 = vrot.slane %v4619_v57, %v7023_v33  ;;  %v4663_v5 = vrot.slane %v4620_v58, %v7023_v33  ;;  %v4667_v21 = vrot.slane %v4621_v38, %v7023_v33 }
0x2eb8   :  { %v4671_v62 = vrot.slane %v4622_v2, %v7023_v33  ;;  %v4675_v63 = vrot.slane %v4623_v6, %v7023_v33  ;;  %v4679_v3 = vrot.slane %v4624_v59, %v7023_v33  ;;  %v4683_v8 = vrot.slane %v4625_v60, %v7023_v33 }
0x2eb9   :  { %v4717_v61 = vsel %vm4716_vm2, %v4659_v20, %v4655_v1  ;;  %v4626_v7 = vadd.f32 %v4616_v32, %v4587_v34  ;;  %v4627_v17 = vadd.f32 %v4616_v32, %v4590_v54  ;;  %v4628_v24 = vadd.f32 %v4616_v32, %v4593_v12 }
0x2eba   :  { %v4719_v22 = vsel %vm4718_vm3, %v4663_v5, %v4717_v61  ;;  %v4629_v41 = vadd.f32 %v4616_v32, %v4596_v52  ;;  %v4630_v44 = vadd.f32 %v4616_v32, %v4599_v18  ;;  %v4631_v47 = vadd.f32 %v4616_v32, %v4602_v43 }
0x2ebb   :  { %v4721_v23 = vsel %vm4720_vm4, %v4667_v21, %v4719_v22  ;;  %v4687_v10 = vrot.slane %v4626_v7, %v7023_v33  ;;  %v4691_v37 = vrot.slane %v4627_v17, %v7023_v33  ;;  %v4695_v19 = vrot.slane %v4628_v24, %v7023_v33 }
0x2ebc   :  { %v4723_v4 = vsel %vm4722_vm5, %v4671_v62, %v4721_v23  ;;  %v4699_v46 = vrot.slane %v4629_v41, %v7023_v33  ;;  %v4703_v48 = vrot.slane %v4630_v44, %v7023_v33  ;;  %v4632_v49 = vadd.f32 %v4616_v32, %v4605_v25 }
0x2ebd   :  { %v4725_v26 = vsel %vm4724_vm6, %v4675_v63, %v4723_v4  ;;  %v4730_v42 = vsel %vm4716_vm2, %v4691_v37, %v4687_v10  ;;  %v4707_v50 = vrot.slane %v4631_v47, %v7023_v33 }
0x2ebe   :  { %v4727_v9 = vsel %vm4726_vm7, %v4679_v3, %v4725_v26  ;;  %v4731_v45 = vsel %vm4718_vm3, %v4695_v19, %v4730_v42  ;;  %v4711_v14 = vrot.slane %v4632_v49, %v7023_v33 }
0x2ebf   :  { %v4729_v11 = vsel %vm4728_vm8, %v4683_v8, %v4727_v9  ;;  %v4732_v31 = vsel %vm4720_vm4, %v4699_v46, %v4731_v45 }
0x2ec0   :  { %4740 = vst.msk [vmem:[%s7074_s11] sm:$0xff] %vm4739_vm9, %v4729_v11  ;;  %v4733_v13 = vsel %vm4722_vm5, %v4703_v48, %v4732_v31 }
0x2ec1   :  { %v4734_v51 = vsel %vm4724_vm6, %v4707_v50, %v4733_v13 }
0x2ec2   :  { %v4735_v15 = vsel %vm4726_vm7, %v4711_v14, %v4734_v51 }
0x2ef6   :  { %v4608_v35 = vpop.xlane.xlu0 %4607 }
0x2ef7   :  { %v4633_v36 = vadd.f32 %v4616_v32, %v4608_v35 }
0x2ef9   :  { %v4715_v27 = vrot.slane %v4633_v36, %v7023_v33 }
0x2efb   :  { %v4736_v0 = vsel %vm4728_vm8, %v4715_v27, %v4735_v15 }
0x2efc   :  { %4741 = vst.msk [vmem:[%s7074_s11 + $0x8] sm:$0xff] %vm4739_vm9, %v4736_v0 }

</bundles_post_ra>
